<compile_context>
chip_gen: v7x
topology: tpu7x:2x2x1
jax: 0.10.0
libtpu: 0.0.40
codegen_flags: <defaults>
</compile_context>

<pallas_src>
import numpy as np
import jax
import jax.numpy as jnp
from jax.experimental import pallas as pl
from jax.experimental.pallas import tpu as pltpu

EPS = 1e-5                 # BatchNorm3d default eps
KSIZE = 3
TAPS = KSIZE ** 3          # 27

# The bias/BN-shift folding below is only exact for this configuration
# (review correctness concern #3): reflect 'same' padding preserves per-channel
# constants, there is no activation between conv and BN, and BN runs in
# training mode (batch statistics).
ACTIVATION = None
BATCH_NORM = True
BN_TRAINING = True
RESIDUAL = True


def _round_up(x, m):
    return (x + m - 1) // m * m


# ---------------------------------------------------------------------------
# Pallas kernel: one (n, d) output plane = in-VMEM im2col + single MXU matmul
# ---------------------------------------------------------------------------
def _make_conv_kernel(c_in, k, k_pad, hp, wp, guard, with_stats):
    hpwp = hp * wp
    inv_hw = 1.0 / float((hp - 2) * (wp - 2))

    def kernel(*refs):
        if with_stats:
            mask_ref, x0_ref, x1_ref, x2_ref, w_ref, y_ref, stat_ref, patch_ref = refs
        else:
            x0_ref, x1_ref, x2_ref, w_ref, y_ref, patch_ref = refs
        planes = (x0_ref, x1_ref, x2_ref)

        # ---- build the (K_pad, Hp*Wp) patch matrix in VMEM (in-kernel im2col)
        if k_pad > k:   # zero alignment-pad rows (VMEM scratch is uninitialized)
            patch_ref[k:k_pad, :] = jnp.zeros((k_pad - k, hpwp), jnp.float32)
        for kd in range(KSIZE):
            xp = planes[kd][0, 0].astype(jnp.float32)            # (c_in, lane)
            for kh in range(KSIZE):
                for kw in range(KSIZE):
                    off = (kh - 1) * wp + (kw - 1)
                    tap = (kd * KSIZE + kh) * KSIZE + kw
                    start = guard + off                           # always >= 0
                    patch_ref[tap * c_in:(tap + 1) * c_in, :] = (
                        xp[:, start:start + hpwp])

        # ---- single MXU matmul: (c_out, K) @ (K, Hp*Wp), f32 accumulation
        yf = jnp.dot(w_ref[...], patch_ref[...],
                     preferred_element_type=jnp.float32)
        y_ref[0, 0] = yf.astype(y_ref.dtype)

        if with_stats:
            # per-plane Welford partials over the H*W interior (mask = 1 there)
            mask = mask_ref[...]                                  # (1, hpwp)
            m = jnp.sum(yf * mask, axis=1, keepdims=True) * inv_hw   # (c_out,1)
            d = (yf - m) * mask
            m2 = jnp.sum(d * d, axis=1, keepdims=True)               # (c_out,1)
            stat_ref[0, 0] = jnp.concatenate([m, m2], axis=1)        # (c_out,2)

    return kernel


def _conv_layer_call(xplanes, wmat, mask, c_out, hp, wp, guard, k, k_pad,
                     *, with_stats, out_dtype):
    n, dp, c_in, lane = xplanes.shape
    d = dp - 2
    hpwp = hp * wp
    kern = _make_conv_kernel(c_in, k, k_pad, hp, wp, guard, with_stats)

    def x_spec(kd):
        return pl.BlockSpec((1, 1, c_in, lane),
                            lambda i, j, kd=kd: (i, j + kd, 0, 0))

    in_specs = [x_spec(0), x_spec(1), x_spec(2),
                pl.BlockSpec((c_out, k_pad), lambda i, j: (0, 0))]
    inputs = [xplanes, xplanes, xplanes, wmat]
    out_specs = pl.BlockSpec((1, 1, c_out, hpwp), lambda i, j: (i, j, 0, 0))
    out_shape = jax.ShapeDtypeStruct((n, d, c_out, hpwp), out_dtype)
    if with_stats:
        in_specs = [pl.BlockSpec((1, hpwp), lambda i, j: (0, 0))] + in_specs
        inputs = [mask] + inputs
        out_specs = [out_specs,
                     pl.BlockSpec((1, 1, c_out, 2), lambda i, j: (i, j, 0, 0))]
        out_shape = [out_shape,
                     jax.ShapeDtypeStruct((n, d, c_out, 2), jnp.float32)]

    return pl.pallas_call(
        kern,
        grid=(n, d),
        in_specs=in_specs,
        out_specs=out_specs,
        out_shape=out_shape,
        scratch_shapes=[pltpu.VMEM((k_pad, hpwp), jnp.float32)],
        compiler_params=pltpu.CompilerParams(
            dimension_semantics=("parallel", "parallel")),
    )(*inputs)


# ---------------------------------------------------------------------------
# JAX glue: halo / plane-major layout, weight reordering, BN folding
# ---------------------------------------------------------------------------
def _embed_planes(h, guard, lane):
    """Compact (N, C, D, H, W) -> reflect-padded plane-major (N, D+2, C, lane) bf16.

    Each plane row is [guard zeros | Hp*Wp values | right-guard zeros] so every
    in-plane tap shift is an in-bounds static slice inside the kernel."""
    n, c, d, hh, ww = h.shape
    hp_, wp_ = hh + 2, ww + 2
    xp = jnp.pad(h, ((0, 0), (0, 0), (1, 1), (1, 1), (1, 1)), mode="reflect")
    xp = jnp.transpose(xp, (0, 2, 1, 3, 4)).reshape(n, d + 2, c, hp_ * wp_)
    xp = jnp.pad(xp, ((0, 0), (0, 0), (0, 0),
                      (guard, lane - guard - hp_ * wp_)))
    return xp.astype(jnp.bfloat16)


def _fold_weights(w, scale):
    """(C_out, C_in, 3, 3, 3) conv weight -> (C_out, K_pad) matmul weight with the
    previous layer's BN scale folded into the input channels.  Row order matches
    the kernel patch layout: row = tap*C_in + c_in, tap = (kd*3 + kh)*3 + kw."""
    if scale is not None:
        w = w * scale[None, :, None, None, None]
    c_out, c_in = w.shape[0], w.shape[1]
    k = c_in * TAPS
    wk = jnp.transpose(w.reshape(c_out, c_in, TAPS), (0, 2, 1)).reshape(c_out, k)
    k_pad = _round_up(k, 8)
    wk = jnp.pad(wk, ((0, 0), (0, k_pad - k)))
    return wk.astype(jnp.float32), k, k_pad


def _interior_mask(hp, wp):
    m = jnp.zeros((hp, wp), jnp.float32).at[1:-1, 1:-1].set(1.0)
    return m.reshape(1, hp * wp)


# ---------------------------------------------------------------------------
# Forward pass (n_layers=3, image_channels=1, channel_size=16, kernel_size=3,
# activation=None, batch_norm=True (train mode), residual=True)
# ---------------------------------------------------------------------------
def normalization_forward(x, params):
    """x: (N, C_img, D, H, W) float32 (NCDHW, matching the PyTorch module)."""
    assert ACTIVATION is None and BATCH_NORM and BN_TRAINING and RESIDUAL, (
        "bias/BN-shift folding is only exact for activation=None, train-mode BN")
    N, c_img, D, H, W = x.shape
    assert min(D, H, W) >= 2, "reflect padding needs spatial dims >= 2"
    Hp, Wp = H + 2, W + 2
    hpwp = Hp * Wp
    guard = Wp + 1                                    # max |in-plane tap offset|
    lane = _round_up(guard + hpwp + Wp + 1, 128)      # lane-padded plane width
    M = N * D * H * W
    HW = H * W

    mask = _interior_mask(Hp, Wp)

    h = x.astype(jnp.float32)          # compact activation (N, C, D, H, W)
    scale = None                       # previous BN scale  gamma * rsqrt(var+eps)
    shift = None                       # previous BN shift  beta - mu * scale

    # hidden Conv3d + BatchNorm3d blocks (conv bias dropped, BN folded forward)
    for (w, _b, gamma, beta) in params["hidden"]:
        c_out = w.shape[0]
        xplanes = _embed_planes(h, guard, lane)
        wmat, k, k_pad = _fold_weights(w, scale)
        y, stats = _conv_layer_call(xplanes, wmat, mask, c_out, Hp, Wp, guard,
                                    k, k_pad, with_stats=True,
                                    out_dtype=jnp.bfloat16)

        # stable merge of per-plane (mean, M2) partials -> global batch stats
        m_i = stats[..., 0]                                     # (N, D, c_out)
        m2_i = stats[..., 1]
        mu = jnp.mean(m_i, axis=(0, 1))                         # (c_out,)
        m2 = jnp.sum(m2_i, axis=(0, 1)) + HW * jnp.sum((m_i - mu) ** 2, axis=(0, 1))
        var = m2 / M
        scale = gamma * jax.lax.rsqrt(var + EPS)
        shift = beta - mu * scale

        # next layer's compact activation = un-normalized conv output interior
        y5 = y.reshape(N, D, c_out, Hp, Wp)[:, :, :, 1:-1, 1:-1]
        h = jnp.transpose(y5, (0, 2, 1, 3, 4))                  # (N, c_out, D, H, W)

    # final Conv3d back to image_channels; previous BN folded, then bias+residual
    wf, bf = params["final"]
    c_out = wf.shape[0]
    c_out_pad = max(c_out, 8)            # keep the MXU M-dim at a full sublane tile
    xplanes = _embed_planes(h, guard, lane)
    wmat, k, k_pad = _fold_weights(wf, scale)
    wmat = jnp.pad(wmat, ((0, c_out_pad - c_out), (0, 0)))
    yf = _conv_layer_call(xplanes, wmat, mask, c_out_pad, Hp, Wp, guard,
                          k, k_pad, with_stats=False, out_dtype=jnp.float32)

    bias_const = bf + jnp.sum(wf * shift[None, :, None, None, None],
                              axis=(1, 2, 3, 4))
    y5 = yf.reshape(N, D, c_out_pad, Hp, Wp)[:, :, :c_out, 1:-1, 1:-1]
    out = jnp.transpose(y5, (0, 2, 1, 3, 4))
    out = out + bias_const[None, :, None, None, None] + x
    return out


# ---------------------------------------------------------------------------
# Deterministic parameter init (shapes follow Normalization.__init__)
# ---------------------------------------------------------------------------
def init_params(key, n_layers=3, image_channels=1, channel_size=16, kernel_size=3):
    sizes = [image_channels] + (n_layers - 1) * [channel_size]
    hidden = []
    for cin, cout in zip(sizes, sizes[1:]):
        key, kw, kb = jax.random.split(key, 3)
        bound = 1.0 / float(cin * kernel_size ** 3) ** 0.5
        w = jax.random.uniform(kw, (cout, cin, kernel_size, kernel_size, kernel_size),
                               minval=-bound, maxval=bound, dtype=jnp.float32)
        b = jax.random.uniform(kb, (cout,), minval=-bound, maxval=bound,
                               dtype=jnp.float32)
        gamma = jnp.ones((cout,), jnp.float32)   # BatchNorm3d default init
        beta = jnp.zeros((cout,), jnp.float32)
        hidden.append((w, b, gamma, beta))

    cin, cout = sizes[-1], image_channels
    key, kw, kb = jax.random.split(key, 3)
    bound = 1.0 / float(cin * kernel_size ** 3) ** 0.5
    wf = jax.random.uniform(kw, (cout, cin, kernel_size, kernel_size, kernel_size),
                            minval=-bound, maxval=bound, dtype=jnp.float32)
    bf = jax.random.uniform(kb, (cout,), minval=-bound, maxval=bound,
                            dtype=jnp.float32)
    return {"hidden": hidden, "final": (wf, bf)}


# ---------------------------------------------------------------------------
# Pure-JAX f32 reference (lax 3-D conv) for a sanity check
# ---------------------------------------------------------------------------
def reference_forward(x, params):
    dn = ("NCDHW", "OIDHW", "NCDHW")
    h = x
    for (w, b, gamma, beta) in params["hidden"]:
        hp = jnp.pad(h, ((0, 0), (0, 0), (1, 1), (1, 1), (1, 1)), mode="reflect")
        y = jax.lax.conv_general_dilated(hp, w, (1, 1, 1), "VALID",
                                         dimension_numbers=dn)
        y = y + b[None, :, None, None, None]
        mu = jnp.mean(y, axis=(0, 2, 3, 4), keepdims=True)
        var = jnp.mean((y - mu) ** 2, axis=(0, 2, 3, 4), keepdims=True)
        h = (y - mu) / jnp.sqrt(var + EPS) * gamma[None, :, None, None, None] \
            + beta[None, :, None, None, None]
    w, b = params["final"]
    hp = jnp.pad(h, ((0, 0), (0, 0), (1, 1), (1, 1), (1, 1)), mode="reflect")
    y = jax.lax.conv_general_dilated(hp, w, (1, 1, 1), "VALID",
                                     dimension_numbers=dn)
    return y + b[None, :, None, None, None] + x


if __name__ == "__main__":
    key = jax.random.PRNGKey(0)
    kx, kp = jax.random.split(key)

    # NCDHW input (batch=2, image_channels=1, 16x16x16 volume).
    N, C, D, H, W = 2, 1, 16, 16, 16
    x = jax.random.normal(kx, (N, C, D, H, W), dtype=jnp.float32)
    params = init_params(kp)

    fwd = jax.jit(normalization_forward)
    out = jax.block_until_ready(fwd(x, params))

    ref = jax.block_until_ready(jax.jit(reference_forward)(x, params))
    assert out.shape == x.shape and out.dtype == jnp.float32
    np.testing.assert_allclose(np.asarray(out), np.asarray(ref),
                               rtol=2e-2, atol=3e-2)

    print("KERNEL_OK")
</pallas_src>

<mosaic_0001>
module attributes {stable_mosaic.version = 11 : i64} {
  func.func @kernel(%arg0: i32, %arg1: i32, %arg2: memref<1x324xf32, #tpu.memory_space<vmem>>, %arg3: memref<1x1x1x384xbf16, #tpu.memory_space<vmem>>, %arg4: memref<1x1x1x384xbf16, #tpu.memory_space<vmem>>, %arg5: memref<1x1x1x384xbf16, #tpu.memory_space<vmem>>, %arg6: memref<16x32xf32, #tpu.memory_space<vmem>>, %arg7: memref<1x1x16x324xbf16, #tpu.memory_space<vmem>>, %arg8: memref<1x1x16x2xf32, #tpu.memory_space<vmem>>, %arg9: memref<32x324xf32, #tpu.memory_space<vmem>>) attributes {dimension_semantics = [#tpu.dimension_semantics<parallel>, #tpu.dimension_semantics<parallel>], iteration_bounds = array<i64: 2, 16>, scalar_prefetch = 0 : i64, scratch_operands = 1 : i64, tpu.core_type = #tpu.core_type<tc>, window_params = [{pipeline_mode = #tpu.pipeline_mode<synchronous>, transform_indices = @transform_0, window_bounds = array<i64: 1, 324>}, {transform_indices = @transform_1, window_bounds = array<i64: 1, 1, 1, 384>}, {transform_indices = @transform_2, window_bounds = array<i64: 1, 1, 1, 384>}, {transform_indices = @transform_3, window_bounds = array<i64: 1, 1, 1, 384>}, {pipeline_mode = #tpu.pipeline_mode<synchronous>, transform_indices = @transform_4, window_bounds = array<i64: 16, 32>}, {transform_indices = @transform_5, window_bounds = array<i64: 1, 1, 16, 324>}, {transform_indices = @transform_6, window_bounds = array<i64: 1, 1, 16, 2>}]} {
    %cst = arith.constant 0.000000e+00 : f32
    %0 = vector.broadcast %cst : f32 to vector<5x324xf32>
    %c27 = arith.constant 27 : index
    %c0 = arith.constant 0 : index
    %1 = vector.load %arg9[%c27, %c0] : memref<32x324xf32, #tpu.memory_space<vmem>>, vector<5x324xf32>
    tpu.vector_store %arg9[%c27, %c0], %0 {strides = array<i32>} : memref<32x324xf32, #tpu.memory_space<vmem>>, vector<5x324xf32>,
    %c0_0 = arith.constant 0 : index
    %c0_1 = arith.constant 0 : index
    %c0_2 = arith.constant 0 : index
    %c0_3 = arith.constant 0 : index
    %2 = vector.load %arg3[%c0_0, %c0_1, %c0_2, %c0_3] : memref<1x1x1x384xbf16, #tpu.memory_space<vmem>>, vector<1x1x1x384xbf16>
    %3 = vector.shape_cast %2 : vector<1x1x1x384xbf16> to vector<1x384xbf16>
    %4 = arith.extf %3 : vector<1x384xbf16> to vector<1x384xf32>
    %5 = vector.extract_strided_slice %4 {offsets = [0, 0], sizes = [1, 324], strides = [1, 1]} : vector<1x384xf32> to vector<1x324xf32>
    %c0_4 = arith.constant 0 : index
    %c0_5 = arith.constant 0 : index
    %6 = vector.load %arg9[%c0_4, %c0_5] : memref<32x324xf32, #tpu.memory_space<vmem>>, vector<1x324xf32>
    tpu.vector_store %arg9[%c0_4, %c0_5], %5 {strides = array<i32>} : memref<32x324xf32, #tpu.memory_space<vmem>>, vector<1x324xf32>,
    %7 = vector.extract_strided_slice %4 {offsets = [0, 1], sizes = [1, 324], strides = [1, 1]} : vector<1x384xf32> to vector<1x324xf32>
    %c1 = arith.constant 1 : index
    %c0_6 = arith.constant 0 : index
    %8 = vector.load %arg9[%c1, %c0_6] : memref<32x324xf32, #tpu.memory_space<vmem>>, vector<1x324xf32>
    tpu.vector_store %arg9[%c1, %c0_6], %7 {strides = array<i32>} : memref<32x324xf32, #tpu.memory_space<vmem>>, vector<1x324xf32>,
    %9 = vector.extract_strided_slice %4 {offsets = [0, 2], sizes = [1, 324], strides = [1, 1]} : vector<1x384xf32> to vector<1x324xf32>
    %c2 = arith.constant 2 : index
    %c0_7 = arith.constant 0 : index
    %10 = vector.load %arg9[%c2, %c0_7] : memref<32x324xf32, #tpu.memory_space<vmem>>, vector<1x324xf32>
    tpu.vector_store %arg9[%c2, %c0_7], %9 {strides = array<i32>} : memref<32x324xf32, #tpu.memory_space<vmem>>, vector<1x324xf32>,
    %11 = vector.extract_strided_slice %4 {offsets = [0, 18], sizes = [1, 324], strides = [1, 1]} : vector<1x384xf32> to vector<1x324xf32>
    %c3 = arith.constant 3 : index
    %c0_8 = arith.constant 0 : index
    %12 = vector.load %arg9[%c3, %c0_8] : memref<32x324xf32, #tpu.memory_space<vmem>>, vector<1x324xf32>
    tpu.vector_store %arg9[%c3, %c0_8], %11 {strides = array<i32>} : memref<32x324xf32, #tpu.memory_space<vmem>>, vector<1x324xf32>,
    %13 = vector.extract_strided_slice %4 {offsets = [0, 19], sizes = [1, 324], strides = [1, 1]} : vector<1x384xf32> to vector<1x324xf32>
    %c4 = arith.constant 4 : index
    %c0_9 = arith.constant 0 : index
    %14 = vector.load %arg9[%c4, %c0_9] : memref<32x324xf32, #tpu.memory_space<vmem>>, vector<1x324xf32>
    tpu.vector_store %arg9[%c4, %c0_9], %13 {strides = array<i32>} : memref<32x324xf32, #tpu.memory_space<vmem>>, vector<1x324xf32>,
    %15 = vector.extract_strided_slice %4 {offsets = [0, 20], sizes = [1, 324], strides = [1, 1]} : vector<1x384xf32> to vector<1x324xf32>
    %c5 = arith.constant 5 : index
    %c0_10 = arith.constant 0 : index
    %16 = vector.load %arg9[%c5, %c0_10] : memref<32x324xf32, #tpu.memory_space<vmem>>, vector<1x324xf32>
    tpu.vector_store %arg9[%c5, %c0_10], %15 {strides = array<i32>} : memref<32x324xf32, #tpu.memory_space<vmem>>, vector<1x324xf32>,
    %17 = vector.extract_strided_slice %4 {offsets = [0, 36], sizes = [1, 324], strides = [1, 1]} : vector<1x384xf32> to vector<1x324xf32>
    %c6 = arith.constant 6 : index
    %c0_11 = arith.constant 0 : index
    %18 = vector.load %arg9[%c6, %c0_11] : memref<32x324xf32, #tpu.memory_space<vmem>>, vector<1x324xf32>
    tpu.vector_store %arg9[%c6, %c0_11], %17 {strides = array<i32>} : memref<32x324xf32, #tpu.memory_space<vmem>>, vector<1x324xf32>,
    %19 = vector.extract_strided_slice %4 {offsets = [0, 37], sizes = [1, 324], strides = [1, 1]} : vector<1x384xf32> to vector<1x324xf32>
    %c7 = arith.constant 7 : index
    %c0_12 = arith.constant 0 : index
    %20 = vector.load %arg9[%c7, %c0_12] : memref<32x324xf32, #tpu.memory_space<vmem>>, vector<1x324xf32>
    tpu.vector_store %arg9[%c7, %c0_12], %19 {strides = array<i32>} : memref<32x324xf32, #tpu.memory_space<vmem>>, vector<1x324xf32>,
    %21 = vector.extract_strided_slice %4 {offsets = [0, 38], sizes = [1, 324], strides = [1, 1]} : vector<1x384xf32> to vector<1x324xf32>
    %c8 = arith.constant 8 : index
    %c0_13 = arith.constant 0 : index
    %22 = vector.load %arg9[%c8, %c0_13] : memref<32x324xf32, #tpu.memory_space<vmem>>, vector<1x324xf32>
    tpu.vector_store %arg9[%c8, %c0_13], %21 {strides = array<i32>} : memref<32x324xf32, #tpu.memory_space<vmem>>, vector<1x324xf32>,
    %c0_14 = arith.constant 0 : index
    %c0_15 = arith.constant 0 : index
    %c0_16 = arith.constant 0 : index
    %c0_17 = arith.constant 0 : index
    %23 = vector.load %arg4[%c0_14, %c0_15, %c0_16, %c0_17] : memref<1x1x1x384xbf16, #tpu.memory_space<vmem>>, vector<1x1x1x384xbf16>
    %24 = vector.shape_cast %23 : vector<1x1x1x384xbf16> to vector<1x384xbf16>
    %25 = arith.extf %24 : vector<1x384xbf16> to vector<1x384xf32>
    %26 = vector.extract_strided_slice %25 {offsets = [0, 0], sizes = [1, 324], strides = [1, 1]} : vector<1x384xf32> to vector<1x324xf32>
    %c9 = arith.constant 9 : index
    %c0_18 = arith.constant 0 : index
    %27 = vector.load %arg9[%c9, %c0_18] : memref<32x324xf32, #tpu.memory_space<vmem>>, vector<1x324xf32>
    tpu.vector_store %arg9[%c9, %c0_18], %26 {strides = array<i32>} : memref<32x324xf32, #tpu.memory_space<vmem>>, vector<1x324xf32>,
    %28 = vector.extract_strided_slice %25 {offsets = [0, 1], sizes = [1, 324], strides = [1, 1]} : vector<1x384xf32> to vector<1x324xf32>
    %c10 = arith.constant 10 : index
    %c0_19 = arith.constant 0 : index
    %29 = vector.load %arg9[%c10, %c0_19] : memref<32x324xf32, #tpu.memory_space<vmem>>, vector<1x324xf32>
    tpu.vector_store %arg9[%c10, %c0_19], %28 {strides = array<i32>} : memref<32x324xf32, #tpu.memory_space<vmem>>, vector<1x324xf32>,
    %30 = vector.extract_strided_slice %25 {offsets = [0, 2], sizes = [1, 324], strides = [1, 1]} : vector<1x384xf32> to vector<1x324xf32>
    %c11 = arith.constant 11 : index
    %c0_20 = arith.constant 0 : index
    %31 = vector.load %arg9[%c11, %c0_20] : memref<32x324xf32, #tpu.memory_space<vmem>>, vector<1x324xf32>
    tpu.vector_store %arg9[%c11, %c0_20], %30 {strides = array<i32>} : memref<32x324xf32, #tpu.memory_space<vmem>>, vector<1x324xf32>,
    %32 = vector.extract_strided_slice %25 {offsets = [0, 18], sizes = [1, 324], strides = [1, 1]} : vector<1x384xf32> to vector<1x324xf32>
    %c12 = arith.constant 12 : index
    %c0_21 = arith.constant 0 : index
    %33 = vector.load %arg9[%c12, %c0_21] : memref<32x324xf32, #tpu.memory_space<vmem>>, vector<1x324xf32>
    tpu.vector_store %arg9[%c12, %c0_21], %32 {strides = array<i32>} : memref<32x324xf32, #tpu.memory_space<vmem>>, vector<1x324xf32>,
    %34 = vector.extract_strided_slice %25 {offsets = [0, 19], sizes = [1, 324], strides = [1, 1]} : vector<1x384xf32> to vector<1x324xf32>
    %c13 = arith.constant 13 : index
    %c0_22 = arith.constant 0 : index
    %35 = vector.load %arg9[%c13, %c0_22] : memref<32x324xf32, #tpu.memory_space<vmem>>, vector<1x324xf32>
    tpu.vector_store %arg9[%c13, %c0_22], %34 {strides = array<i32>} : memref<32x324xf32, #tpu.memory_space<vmem>>, vector<1x324xf32>,
    %36 = vector.extract_strided_slice %25 {offsets = [0, 20], sizes = [1, 324], strides = [1, 1]} : vector<1x384xf32> to vector<1x324xf32>
    %c14 = arith.constant 14 : index
    %c0_23 = arith.constant 0 : index
    %37 = vector.load %arg9[%c14, %c0_23] : memref<32x324xf32, #tpu.memory_space<vmem>>, vector<1x324xf32>
    tpu.vector_store %arg9[%c14, %c0_23], %36 {strides = array<i32>} : memref<32x324xf32, #tpu.memory_space<vmem>>, vector<1x324xf32>,
    %38 = vector.extract_strided_slice %25 {offsets = [0, 36], sizes = [1, 324], strides = [1, 1]} : vector<1x384xf32> to vector<1x324xf32>
    %c15 = arith.constant 15 : index
    %c0_24 = arith.constant 0 : index
    %39 = vector.load %arg9[%c15, %c0_24] : memref<32x324xf32, #tpu.memory_space<vmem>>, vector<1x324xf32>
    tpu.vector_store %arg9[%c15, %c0_24], %38 {strides = array<i32>} : memref<32x324xf32, #tpu.memory_space<vmem>>, vector<1x324xf32>,
    %40 = vector.extract_strided_slice %25 {offsets = [0, 37], sizes = [1, 324], strides = [1, 1]} : vector<1x384xf32> to vector<1x324xf32>
    %c16 = arith.constant 16 : index
    %c0_25 = arith.constant 0 : index
    %41 = vector.load %arg9[%c16, %c0_25] : memref<32x324xf32, #tpu.memory_space<vmem>>, vector<1x324xf32>
    tpu.vector_store %arg9[%c16, %c0_25], %40 {strides = array<i32>} : memref<32x324xf32, #tpu.memory_space<vmem>>, vector<1x324xf32>,
    %42 = vector.extract_strided_slice %25 {offsets = [0, 38], sizes = [1, 324], strides = [1, 1]} : vector<1x384xf32> to vector<1x324xf32>
    %c17 = arith.constant 17 : index
    %c0_26 = arith.constant 0 : index
    %43 = vector.load %arg9[%c17, %c0_26] : memref<32x324xf32, #tpu.memory_space<vmem>>, vector<1x324xf32>
    tpu.vector_store %arg9[%c17, %c0_26], %42 {strides = array<i32>} : memref<32x324xf32, #tpu.memory_space<vmem>>, vector<1x324xf32>,
    %c0_27 = arith.constant 0 : index
    %c0_28 = arith.constant 0 : index
    %c0_29 = arith.constant 0 : index
    %c0_30 = arith.constant 0 : index
    %44 = vector.load %arg5[%c0_27, %c0_28, %c0_29, %c0_30] : memref<1x1x1x384xbf16, #tpu.memory_space<vmem>>, vector<1x1x1x384xbf16>
    %45 = vector.shape_cast %44 : vector<1x1x1x384xbf16> to vector<1x384xbf16>
    %46 = arith.extf %45 : vector<1x384xbf16> to vector<1x384xf32>
    %47 = vector.extract_strided_slice %46 {offsets = [0, 0], sizes = [1, 324], strides = [1, 1]} : vector<1x384xf32> to vector<1x324xf32>
    %c18 = arith.constant 18 : index
    %c0_31 = arith.constant 0 : index
    %48 = vector.load %arg9[%c18, %c0_31] : memref<32x324xf32, #tpu.memory_space<vmem>>, vector<1x324xf32>
    tpu.vector_store %arg9[%c18, %c0_31], %47 {strides = array<i32>} : memref<32x324xf32, #tpu.memory_space<vmem>>, vector<1x324xf32>,
    %49 = vector.extract_strided_slice %46 {offsets = [0, 1], sizes = [1, 324], strides = [1, 1]} : vector<1x384xf32> to vector<1x324xf32>
    %c19 = arith.constant 19 : index
    %c0_32 = arith.constant 0 : index
    %50 = vector.load %arg9[%c19, %c0_32] : memref<32x324xf32, #tpu.memory_space<vmem>>, vector<1x324xf32>
    tpu.vector_store %arg9[%c19, %c0_32], %49 {strides = array<i32>} : memref<32x324xf32, #tpu.memory_space<vmem>>, vector<1x324xf32>,
    %51 = vector.extract_strided_slice %46 {offsets = [0, 2], sizes = [1, 324], strides = [1, 1]} : vector<1x384xf32> to vector<1x324xf32>
    %c20 = arith.constant 20 : index
    %c0_33 = arith.constant 0 : index
    %52 = vector.load %arg9[%c20, %c0_33] : memref<32x324xf32, #tpu.memory_space<vmem>>, vector<1x324xf32>
    tpu.vector_store %arg9[%c20, %c0_33], %51 {strides = array<i32>} : memref<32x324xf32, #tpu.memory_space<vmem>>, vector<1x324xf32>,
    %53 = vector.extract_strided_slice %46 {offsets = [0, 18], sizes = [1, 324], strides = [1, 1]} : vector<1x384xf32> to vector<1x324xf32>
    %c21 = arith.constant 21 : index
    %c0_34 = arith.constant 0 : index
    %54 = vector.load %arg9[%c21, %c0_34] : memref<32x324xf32, #tpu.memory_space<vmem>>, vector<1x324xf32>
    tpu.vector_store %arg9[%c21, %c0_34], %53 {strides = array<i32>} : memref<32x324xf32, #tpu.memory_space<vmem>>, vector<1x324xf32>,
    %55 = vector.extract_strided_slice %46 {offsets = [0, 19], sizes = [1, 324], strides = [1, 1]} : vector<1x384xf32> to vector<1x324xf32>
    %c22 = arith.constant 22 : index
    %c0_35 = arith.constant 0 : index
    %56 = vector.load %arg9[%c22, %c0_35] : memref<32x324xf32, #tpu.memory_space<vmem>>, vector<1x324xf32>
    tpu.vector_store %arg9[%c22, %c0_35], %55 {strides = array<i32>} : memref<32x324xf32, #tpu.memory_space<vmem>>, vector<1x324xf32>,
    %57 = vector.extract_strided_slice %46 {offsets = [0, 20], sizes = [1, 324], strides = [1, 1]} : vector<1x384xf32> to vector<1x324xf32>
    %c23 = arith.constant 23 : index
    %c0_36 = arith.constant 0 : index
    %58 = vector.load %arg9[%c23, %c0_36] : memref<32x324xf32, #tpu.memory_space<vmem>>, vector<1x324xf32>
    tpu.vector_store %arg9[%c23, %c0_36], %57 {strides = array<i32>} : memref<32x324xf32, #tpu.memory_space<vmem>>, vector<1x324xf32>,
    %59 = vector.extract_strided_slice %46 {offsets = [0, 36], sizes = [1, 324], strides = [1, 1]} : vector<1x384xf32> to vector<1x324xf32>
    %c24 = arith.constant 24 : index
    %c0_37 = arith.constant 0 : index
    %60 = vector.load %arg9[%c24, %c0_37] : memref<32x324xf32, #tpu.memory_space<vmem>>, vector<1x324xf32>
    tpu.vector_store %arg9[%c24, %c0_37], %59 {strides = array<i32>} : memref<32x324xf32, #tpu.memory_space<vmem>>, vector<1x324xf32>,
    %61 = vector.extract_strided_slice %46 {offsets = [0, 37], sizes = [1, 324], strides = [1, 1]} : vector<1x384xf32> to vector<1x324xf32>
    %c25 = arith.constant 25 : index
    %c0_38 = arith.constant 0 : index
    %62 = vector.load %arg9[%c25, %c0_38] : memref<32x324xf32, #tpu.memory_space<vmem>>, vector<1x324xf32>
    tpu.vector_store %arg9[%c25, %c0_38], %61 {strides = array<i32>} : memref<32x324xf32, #tpu.memory_space<vmem>>, vector<1x324xf32>,
    %63 = vector.extract_strided_slice %46 {offsets = [0, 38], sizes = [1, 324], strides = [1, 1]} : vector<1x384xf32> to vector<1x324xf32>
    %c26 = arith.constant 26 : index
    %c0_39 = arith.constant 0 : index
    %64 = vector.load %arg9[%c26, %c0_39] : memref<32x324xf32, #tpu.memory_space<vmem>>, vector<1x324xf32>
    tpu.vector_store %arg9[%c26, %c0_39], %63 {strides = array<i32>} : memref<32x324xf32, #tpu.memory_space<vmem>>, vector<1x324xf32>,
    %c0_40 = arith.constant 0 : index
    %c0_41 = arith.constant 0 : index
    %65 = vector.load %arg6[%c0_40, %c0_41] : memref<16x32xf32, #tpu.memory_space<vmem>>, vector<16x32xf32>
    %c0_42 = arith.constant 0 : index
    %c0_43 = arith.constant 0 : index
    %66 = vector.load %arg9[%c0_42, %c0_43] : memref<32x324xf32, #tpu.memory_space<vmem>>, vector<32x324xf32>
    %cst_44 = arith.constant dense<0.000000e+00> : vector<16x324xf32>
    %67 = tpu.matmul %65, %66, %cst_44 {dimension_numbers = #tpu.dot_dimension_numbers<[1], [0], [0], [1], [0, 0, 1, 1], [], []>} : vector<16x32xf32>, vector<32x324xf32>, vector<16x324xf32> -> vector<16x324xf32>
    %68 = arith.truncf %67 : vector<16x324xf32> to vector<16x324xbf16>
    %c0_45 = arith.constant 0 : index
    %c0_46 = arith.constant 0 : index
    %c0_47 = arith.constant 0 : index
    %c0_48 = arith.constant 0 : index
    %69 = vector.load %arg7[%c0_45, %c0_46, %c0_47, %c0_48] : memref<1x1x16x324xbf16, #tpu.memory_space<vmem>>, vector<1x1x16x324xbf16>
    %70 = vector.shape_cast %69 : vector<1x1x16x324xbf16> to vector<16x324xbf16>
    %71 = vector.shape_cast %68 : vector<16x324xbf16> to vector<1x1x16x324xbf16>
    tpu.vector_store %arg7[%c0_45, %c0_46, %c0_47, %c0_48], %71 {strides = array<i32>} : memref<1x1x16x324xbf16, #tpu.memory_space<vmem>>, vector<1x1x16x324xbf16>,
    %c0_49 = arith.constant 0 : index
    %c0_50 = arith.constant 0 : index
    %72 = vector.load %arg2[%c0_49, %c0_50] : memref<1x324xf32, #tpu.memory_space<vmem>>, vector<1x324xf32>
    %73 = vector.broadcast %72 : vector<1x324xf32> to vector<16x324xf32>
    %74 = arith.mulf %67, %73 : vector<16x324xf32>
    %cst_51 = arith.constant dense<0.000000e+00> : vector<16xf32>
    %75 = vector.multi_reduction <add>, %74, %cst_51 [1] : vector<16x324xf32> to vector<16xf32>
    %76 = vector.shape_cast %75 : vector<16xf32> to vector<16x1xf32>
    %cst_52 = arith.constant 3.906250e-03 : f32
    %77 = vector.broadcast %cst_52 : f32 to vector<16x1xf32>
    %78 = arith.mulf %76, %77 : vector<16x1xf32>
    %79 = vector.broadcast %78 : vector<16x1xf32> to vector<16x324xf32>
    %80 = arith.subf %67, %79 : vector<16x324xf32>
    %81 = vector.broadcast %72 : vector<1x324xf32> to vector<16x324xf32>
    %82 = arith.mulf %80, %81 : vector<16x324xf32>
    %83 = arith.mulf %82, %82 : vector<16x324xf32>
    %cst_53 = arith.constant dense<0.000000e+00> : vector<16xf32>
    %84 = vector.multi_reduction <add>, %83, %cst_53 [1] : vector<16x324xf32> to vector<16xf32>
    %85 = vector.shape_cast %84 : vector<16xf32> to vector<16x1xf32>
    %86 = tpu.concatenate %78, %85 in 1 : vector<16x1xf32>, vector<16x1xf32> -> vector<16x2xf32>
    %c0_54 = arith.constant 0 : index
    %c0_55 = arith.constant 0 : index
    %c0_56 = arith.constant 0 : index
    %c0_57 = arith.constant 0 : index
    %87 = vector.load %arg8[%c0_54, %c0_55, %c0_56, %c0_57] : memref<1x1x16x2xf32, #tpu.memory_space<vmem>>, vector<1x1x16x2xf32>
    %88 = vector.shape_cast %87 : vector<1x1x16x2xf32> to vector<16x2xf32>
    %89 = vector.shape_cast %86 : vector<16x2xf32> to vector<1x1x16x2xf32>
    tpu.vector_store %arg8[%c0_54, %c0_55, %c0_56, %c0_57], %89 {strides = array<i32>} : memref<1x1x16x2xf32, #tpu.memory_space<vmem>>, vector<1x1x16x2xf32>,
    return
  }
  func.func @transform_0(%arg0: i32, %arg1: i32) -> (i32, i32) {
    %c0_i32 = arith.constant 0 : i32
    %c0_i32_0 = arith.constant 0 : i32
    %c0_i32_1 = arith.constant 0 : i32
    return %c0_i32, %c0_i32_0 : i32, i32
  }
  func.func @transform_1(%arg0: i32, %arg1: i32) -> (i32, i32, i32, i32) {
    %c0_i32 = arith.constant 0 : i32
    %0 = arith.addi %arg1, %c0_i32 : i32
    %c0_i32_0 = arith.constant 0 : i32
    %c0_i32_1 = arith.constant 0 : i32
    %c0_i32_2 = arith.constant 0 : i32
    return %arg0, %0, %c0_i32_0, %c0_i32_1 : i32, i32, i32, i32
  }
  func.func @transform_2(%arg0: i32, %arg1: i32) -> (i32, i32, i32, i32) {
    %c1_i32 = arith.constant 1 : i32
    %0 = arith.addi %arg1, %c1_i32 : i32
    %c0_i32 = arith.constant 0 : i32
    %c0_i32_0 = arith.constant 0 : i32
    %c0_i32_1 = arith.constant 0 : i32
    return %arg0, %0, %c0_i32, %c0_i32_0 : i32, i32, i32, i32
  }
  func.func @transform_3(%arg0: i32, %arg1: i32) -> (i32, i32, i32, i32) {
    %c2_i32 = arith.constant 2 : i32
    %0 = arith.addi %arg1, %c2_i32 : i32
    %c0_i32 = arith.constant 0 : i32
    %c0_i32_0 = arith.constant 0 : i32
    %c0_i32_1 = arith.constant 0 : i32
    return %arg0, %0, %c0_i32, %c0_i32_0 : i32, i32, i32, i32
  }
  func.func @transform_4(%arg0: i32, %arg1: i32) -> (i32, i32) {
    %c0_i32 = arith.constant 0 : i32
    %c0_i32_0 = arith.constant 0 : i32
    %c0_i32_1 = arith.constant 0 : i32
    return %c0_i32, %c0_i32_0 : i32, i32
  }
  func.func @transform_5(%arg0: i32, %arg1: i32) -> (i32, i32, i32, i32) {
    %c0_i32 = arith.constant 0 : i32
    %c0_i32_0 = arith.constant 0 : i32
    %c0_i32_1 = arith.constant 0 : i32
    return %arg0, %arg1, %c0_i32, %c0_i32_0 : i32, i32, i32, i32
  }
  func.func @transform_6(%arg0: i32, %arg1: i32) -> (i32, i32, i32, i32) {
    %c0_i32 = arith.constant 0 : i32
    %c0_i32_0 = arith.constant 0 : i32
    %c0_i32_1 = arith.constant 0 : i32
    return %arg0, %arg1, %c0_i32, %c0_i32_0 : i32, i32, i32, i32
  }
}

module attributes {stable_mosaic.version = 11 : i64} {
  func.func @kernel(%arg0: i32, %arg1: i32, %arg2: memref<1x324xf32, #tpu.memory_space<vmem>>, %arg3: memref<1x1x16x384xbf16, #tpu.memory_space<vmem>>, %arg4: memref<1x1x16x384xbf16, #tpu.memory_space<vmem>>, %arg5: memref<1x1x16x384xbf16, #tpu.memory_space<vmem>>, %arg6: memref<16x432xf32, #tpu.memory_space<vmem>>, %arg7: memref<1x1x16x324xbf16, #tpu.memory_space<vmem>>, %arg8: memref<1x1x16x2xf32, #tpu.memory_space<vmem>>, %arg9: memref<432x324xf32, #tpu.memory_space<vmem>>) attributes {dimension_semantics = [#tpu.dimension_semantics<parallel>, #tpu.dimension_semantics<parallel>], iteration_bounds = array<i64: 2, 16>, scalar_prefetch = 0 : i64, scratch_operands = 1 : i64, tpu.core_type = #tpu.core_type<tc>, window_params = [{pipeline_mode = #tpu.pipeline_mode<synchronous>, transform_indices = @transform_0, window_bounds = array<i64: 1, 324>}, {transform_indices = @transform_1, window_bounds = array<i64: 1, 1, 16, 384>}, {transform_indices = @transform_2, window_bounds = array<i64: 1, 1, 16, 384>}, {transform_indices = @transform_3, window_bounds = array<i64: 1, 1, 16, 384>}, {pipeline_mode = #tpu.pipeline_mode<synchronous>, transform_indices = @transform_4, window_bounds = array<i64: 16, 432>}, {transform_indices = @transform_5, window_bounds = array<i64: 1, 1, 16, 324>}, {transform_indices = @transform_6, window_bounds = array<i64: 1, 1, 16, 2>}]} {
    %c0 = arith.constant 0 : index
    %c0_0 = arith.constant 0 : index
    %c0_1 = arith.constant 0 : index
    %c0_2 = arith.constant 0 : index
    %0 = vector.load %arg3[%c0, %c0_0, %c0_1, %c0_2] : memref<1x1x16x384xbf16, #tpu.memory_space<vmem>>, vector<1x1x16x384xbf16>
    %1 = vector.shape_cast %0 : vector<1x1x16x384xbf16> to vector<16x384xbf16>
    %2 = arith.extf %1 : vector<16x384xbf16> to vector<16x384xf32>
    %3 = vector.extract_strided_slice %2 {offsets = [0, 0], sizes = [16, 324], strides = [1, 1]} : vector<16x384xf32> to vector<16x324xf32>
    %c0_3 = arith.constant 0 : index
    %c0_4 = arith.constant 0 : index
    %4 = vector.load %arg9[%c0_3, %c0_4] : memref<432x324xf32, #tpu.memory_space<vmem>>, vector<16x324xf32>
    tpu.vector_store %arg9[%c0_3, %c0_4], %3 {strides = array<i32>} : memref<432x324xf32, #tpu.memory_space<vmem>>, vector<16x324xf32>,
    %5 = vector.extract_strided_slice %2 {offsets = [0, 1], sizes = [16, 324], strides = [1, 1]} : vector<16x384xf32> to vector<16x324xf32>
    %c16 = arith.constant 16 : index
    %c0_5 = arith.constant 0 : index
    %6 = vector.load %arg9[%c16, %c0_5] : memref<432x324xf32, #tpu.memory_space<vmem>>, vector<16x324xf32>
    tpu.vector_store %arg9[%c16, %c0_5], %5 {strides = array<i32>} : memref<432x324xf32, #tpu.memory_space<vmem>>, vector<16x324xf32>,
    %7 = vector.extract_strided_slice %2 {offsets = [0, 2], sizes = [16, 324], strides = [1, 1]} : vector<16x384xf32> to vector<16x324xf32>
    %c32 = arith.constant 32 : index
    %c0_6 = arith.constant 0 : index
    %8 = vector.load %arg9[%c32, %c0_6] : memref<432x324xf32, #tpu.memory_space<vmem>>, vector<16x324xf32>
    tpu.vector_store %arg9[%c32, %c0_6], %7 {strides = array<i32>} : memref<432x324xf32, #tpu.memory_space<vmem>>, vector<16x324xf32>,
    %9 = vector.extract_strided_slice %2 {offsets = [0, 18], sizes = [16, 324], strides = [1, 1]} : vector<16x384xf32> to vector<16x324xf32>
    %c48 = arith.constant 48 : index
    %c0_7 = arith.constant 0 : index
    %10 = vector.load %arg9[%c48, %c0_7] : memref<432x324xf32, #tpu.memory_space<vmem>>, vector<16x324xf32>
    tpu.vector_store %arg9[%c48, %c0_7], %9 {strides = array<i32>} : memref<432x324xf32, #tpu.memory_space<vmem>>, vector<16x324xf32>,
    %11 = vector.extract_strided_slice %2 {offsets = [0, 19], sizes = [16, 324], strides = [1, 1]} : vector<16x384xf32> to vector<16x324xf32>
    %c64 = arith.constant 64 : index
    %c0_8 = arith.constant 0 : index
    %12 = vector.load %arg9[%c64, %c0_8] : memref<432x324xf32, #tpu.memory_space<vmem>>, vector<16x324xf32>
    tpu.vector_store %arg9[%c64, %c0_8], %11 {strides = array<i32>} : memref<432x324xf32, #tpu.memory_space<vmem>>, vector<16x324xf32>,
    %13 = vector.extract_strided_slice %2 {offsets = [0, 20], sizes = [16, 324], strides = [1, 1]} : vector<16x384xf32> to vector<16x324xf32>
    %c80 = arith.constant 80 : index
    %c0_9 = arith.constant 0 : index
    %14 = vector.load %arg9[%c80, %c0_9] : memref<432x324xf32, #tpu.memory_space<vmem>>, vector<16x324xf32>
    tpu.vector_store %arg9[%c80, %c0_9], %13 {strides = array<i32>} : memref<432x324xf32, #tpu.memory_space<vmem>>, vector<16x324xf32>,
    %15 = vector.extract_strided_slice %2 {offsets = [0, 36], sizes = [16, 324], strides = [1, 1]} : vector<16x384xf32> to vector<16x324xf32>
    %c96 = arith.constant 96 : index
    %c0_10 = arith.constant 0 : index
    %16 = vector.load %arg9[%c96, %c0_10] : memref<432x324xf32, #tpu.memory_space<vmem>>, vector<16x324xf32>
    tpu.vector_store %arg9[%c96, %c0_10], %15 {strides = array<i32>} : memref<432x324xf32, #tpu.memory_space<vmem>>, vector<16x324xf32>,
    %17 = vector.extract_strided_slice %2 {offsets = [0, 37], sizes = [16, 324], strides = [1, 1]} : vector<16x384xf32> to vector<16x324xf32>
    %c112 = arith.constant 112 : index
    %c0_11 = arith.constant 0 : index
    %18 = vector.load %arg9[%c112, %c0_11] : memref<432x324xf32, #tpu.memory_space<vmem>>, vector<16x324xf32>
    tpu.vector_store %arg9[%c112, %c0_11], %17 {strides = array<i32>} : memref<432x324xf32, #tpu.memory_space<vmem>>, vector<16x324xf32>,
    %19 = vector.extract_strided_slice %2 {offsets = [0, 38], sizes = [16, 324], strides = [1, 1]} : vector<16x384xf32> to vector<16x324xf32>
    %c128 = arith.constant 128 : index
    %c0_12 = arith.constant 0 : index
    %20 = vector.load %arg9[%c128, %c0_12] : memref<432x324xf32, #tpu.memory_space<vmem>>, vector<16x324xf32>
    tpu.vector_store %arg9[%c128, %c0_12], %19 {strides = array<i32>} : memref<432x324xf32, #tpu.memory_space<vmem>>, vector<16x324xf32>,
    %c0_13 = arith.constant 0 : index
    %c0_14 = arith.constant 0 : index
    %c0_15 = arith.constant 0 : index
    %c0_16 = arith.constant 0 : index
    %21 = vector.load %arg4[%c0_13, %c0_14, %c0_15, %c0_16] : memref<1x1x16x384xbf16, #tpu.memory_space<vmem>>, vector<1x1x16x384xbf16>
    %22 = vector.shape_cast %21 : vector<1x1x16x384xbf16> to vector<16x384xbf16>
    %23 = arith.extf %22 : vector<16x384xbf16> to vector<16x384xf32>
    %24 = vector.extract_strided_slice %23 {offsets = [0, 0], sizes = [16, 324], strides = [1, 1]} : vector<16x384xf32> to vector<16x324xf32>
    %c144 = arith.constant 144 : index
    %c0_17 = arith.constant 0 : index
    %25 = vector.load %arg9[%c144, %c0_17] : memref<432x324xf32, #tpu.memory_space<vmem>>, vector<16x324xf32>
    tpu.vector_store %arg9[%c144, %c0_17], %24 {strides = array<i32>} : memref<432x324xf32, #tpu.memory_space<vmem>>, vector<16x324xf32>,
    %26 = vector.extract_strided_slice %23 {offsets = [0, 1], sizes = [16, 324], strides = [1, 1]} : vector<16x384xf32> to vector<16x324xf32>
    %c160 = arith.constant 160 : index
    %c0_18 = arith.constant 0 : index
    %27 = vector.load %arg9[%c160, %c0_18] : memref<432x324xf32, #tpu.memory_space<vmem>>, vector<16x324xf32>
    tpu.vector_store %arg9[%c160, %c0_18], %26 {strides = array<i32>} : memref<432x324xf32, #tpu.memory_space<vmem>>, vector<16x324xf32>,
    %28 = vector.extract_strided_slice %23 {offsets = [0, 2], sizes = [16, 324], strides = [1, 1]} : vector<16x384xf32> to vector<16x324xf32>
    %c176 = arith.constant 176 : index
    %c0_19 = arith.constant 0 : index
    %29 = vector.load %arg9[%c176, %c0_19] : memref<432x324xf32, #tpu.memory_space<vmem>>, vector<16x324xf32>
    tpu.vector_store %arg9[%c176, %c0_19], %28 {strides = array<i32>} : memref<432x324xf32, #tpu.memory_space<vmem>>, vector<16x324xf32>,
    %30 = vector.extract_strided_slice %23 {offsets = [0, 18], sizes = [16, 324], strides = [1, 1]} : vector<16x384xf32> to vector<16x324xf32>
    %c192 = arith.constant 192 : index
    %c0_20 = arith.constant 0 : index
    %31 = vector.load %arg9[%c192, %c0_20] : memref<432x324xf32, #tpu.memory_space<vmem>>, vector<16x324xf32>
    tpu.vector_store %arg9[%c192, %c0_20], %30 {strides = array<i32>} : memref<432x324xf32, #tpu.memory_space<vmem>>, vector<16x324xf32>,
    %32 = vector.extract_strided_slice %23 {offsets = [0, 19], sizes = [16, 324], strides = [1, 1]} : vector<16x384xf32> to vector<16x324xf32>
    %c208 = arith.constant 208 : index
    %c0_21 = arith.constant 0 : index
    %33 = vector.load %arg9[%c208, %c0_21] : memref<432x324xf32, #tpu.memory_space<vmem>>, vector<16x324xf32>
    tpu.vector_store %arg9[%c208, %c0_21], %32 {strides = array<i32>} : memref<432x324xf32, #tpu.memory_space<vmem>>, vector<16x324xf32>,
    %34 = vector.extract_strided_slice %23 {offsets = [0, 20], sizes = [16, 324], strides = [1, 1]} : vector<16x384xf32> to vector<16x324xf32>
    %c224 = arith.constant 224 : index
    %c0_22 = arith.constant 0 : index
    %35 = vector.load %arg9[%c224, %c0_22] : memref<432x324xf32, #tpu.memory_space<vmem>>, vector<16x324xf32>
    tpu.vector_store %arg9[%c224, %c0_22], %34 {strides = array<i32>} : memref<432x324xf32, #tpu.memory_space<vmem>>, vector<16x324xf32>,
    %36 = vector.extract_strided_slice %23 {offsets = [0, 36], sizes = [16, 324], strides = [1, 1]} : vector<16x384xf32> to vector<16x324xf32>
    %c240 = arith.constant 240 : index
    %c0_23 = arith.constant 0 : index
    %37 = vector.load %arg9[%c240, %c0_23] : memref<432x324xf32, #tpu.memory_space<vmem>>, vector<16x324xf32>
    tpu.vector_store %arg9[%c240, %c0_23], %36 {strides = array<i32>} : memref<432x324xf32, #tpu.memory_space<vmem>>, vector<16x324xf32>,
    %38 = vector.extract_strided_slice %23 {offsets = [0, 37], sizes = [16, 324], strides = [1, 1]} : vector<16x384xf32> to vector<16x324xf32>
    %c256 = arith.constant 256 : index
    %c0_24 = arith.constant 0 : index
    %39 = vector.load %arg9[%c256, %c0_24] : memref<432x324xf32, #tpu.memory_space<vmem>>, vector<16x324xf32>
    tpu.vector_store %arg9[%c256, %c0_24], %38 {strides = array<i32>} : memref<432x324xf32, #tpu.memory_space<vmem>>, vector<16x324xf32>,
    %40 = vector.extract_strided_slice %23 {offsets = [0, 38], sizes = [16, 324], strides = [1, 1]} : vector<16x384xf32> to vector<16x324xf32>
    %c272 = arith.constant 272 : index
    %c0_25 = arith.constant 0 : index
    %41 = vector.load %arg9[%c272, %c0_25] : memref<432x324xf32, #tpu.memory_space<vmem>>, vector<16x324xf32>
    tpu.vector_store %arg9[%c272, %c0_25], %40 {strides = array<i32>} : memref<432x324xf32, #tpu.memory_space<vmem>>, vector<16x324xf32>,
    %c0_26 = arith.constant 0 : index
    %c0_27 = arith.constant 0 : index
    %c0_28 = arith.constant 0 : index
    %c0_29 = arith.constant 0 : index
    %42 = vector.load %arg5[%c0_26, %c0_27, %c0_28, %c0_29] : memref<1x1x16x384xbf16, #tpu.memory_space<vmem>>, vector<1x1x16x384xbf16>
    %43 = vector.shape_cast %42 : vector<1x1x16x384xbf16> to vector<16x384xbf16>
    %44 = arith.extf %43 : vector<16x384xbf16> to vector<16x384xf32>
    %45 = vector.extract_strided_slice %44 {offsets = [0, 0], sizes = [16, 324], strides = [1, 1]} : vector<16x384xf32> to vector<16x324xf32>
    %c288 = arith.constant 288 : index
    %c0_30 = arith.constant 0 : index
    %46 = vector.load %arg9[%c288, %c0_30] : memref<432x324xf32, #tpu.memory_space<vmem>>, vector<16x324xf32>
    tpu.vector_store %arg9[%c288, %c0_30], %45 {strides = array<i32>} : memref<432x324xf32, #tpu.memory_space<vmem>>, vector<16x324xf32>,
    %47 = vector.extract_strided_slice %44 {offsets = [0, 1], sizes = [16, 324], strides = [1, 1]} : vector<16x384xf32> to vector<16x324xf32>
    %c304 = arith.constant 304 : index
    %c0_31 = arith.constant 0 : index
    %48 = vector.load %arg9[%c304, %c0_31] : memref<432x324xf32, #tpu.memory_space<vmem>>, vector<16x324xf32>
    tpu.vector_store %arg9[%c304, %c0_31], %47 {strides = array<i32>} : memref<432x324xf32, #tpu.memory_space<vmem>>, vector<16x324xf32>,
    %49 = vector.extract_strided_slice %44 {offsets = [0, 2], sizes = [16, 324], strides = [1, 1]} : vector<16x384xf32> to vector<16x324xf32>
    %c320 = arith.constant 320 : index
    %c0_32 = arith.constant 0 : index
    %50 = vector.load %arg9[%c320, %c0_32] : memref<432x324xf32, #tpu.memory_space<vmem>>, vector<16x324xf32>
    tpu.vector_store %arg9[%c320, %c0_32], %49 {strides = array<i32>} : memref<432x324xf32, #tpu.memory_space<vmem>>, vector<16x324xf32>,
    %51 = vector.extract_strided_slice %44 {offsets = [0, 18], sizes = [16, 324], strides = [1, 1]} : vector<16x384xf32> to vector<16x324xf32>
    %c336 = arith.constant 336 : index
    %c0_33 = arith.constant 0 : index
    %52 = vector.load %arg9[%c336, %c0_33] : memref<432x324xf32, #tpu.memory_space<vmem>>, vector<16x324xf32>
    tpu.vector_store %arg9[%c336, %c0_33], %51 {strides = array<i32>} : memref<432x324xf32, #tpu.memory_space<vmem>>, vector<16x324xf32>,
    %53 = vector.extract_strided_slice %44 {offsets = [0, 19], sizes = [16, 324], strides = [1, 1]} : vector<16x384xf32> to vector<16x324xf32>
    %c352 = arith.constant 352 : index
    %c0_34 = arith.constant 0 : index
    %54 = vector.load %arg9[%c352, %c0_34] : memref<432x324xf32, #tpu.memory_space<vmem>>, vector<16x324xf32>
    tpu.vector_store %arg9[%c352, %c0_34], %53 {strides = array<i32>} : memref<432x324xf32, #tpu.memory_space<vmem>>, vector<16x324xf32>,
    %55 = vector.extract_strided_slice %44 {offsets = [0, 20], sizes = [16, 324], strides = [1, 1]} : vector<16x384xf32> to vector<16x324xf32>
    %c368 = arith.constant 368 : index
    %c0_35 = arith.constant 0 : index
    %56 = vector.load %arg9[%c368, %c0_35] : memref<432x324xf32, #tpu.memory_space<vmem>>, vector<16x324xf32>
    tpu.vector_store %arg9[%c368, %c0_35], %55 {strides = array<i32>} : memref<432x324xf32, #tpu.memory_space<vmem>>, vector<16x324xf32>,
    %57 = vector.extract_strided_slice %44 {offsets = [0, 36], sizes = [16, 324], strides = [1, 1]} : vector<16x384xf32> to vector<16x324xf32>
    %c384 = arith.constant 384 : index
    %c0_36 = arith.constant 0 : index
    %58 = vector.load %arg9[%c384, %c0_36] : memref<432x324xf32, #tpu.memory_space<vmem>>, vector<16x324xf32>
    tpu.vector_store %arg9[%c384, %c0_36], %57 {strides = array<i32>} : memref<432x324xf32, #tpu.memory_space<vmem>>, vector<16x324xf32>,
    %59 = vector.extract_strided_slice %44 {offsets = [0, 37], sizes = [16, 324], strides = [1, 1]} : vector<16x384xf32> to vector<16x324xf32>
    %c400 = arith.constant 400 : index
    %c0_37 = arith.constant 0 : index
    %60 = vector.load %arg9[%c400, %c0_37] : memref<432x324xf32, #tpu.memory_space<vmem>>, vector<16x324xf32>
    tpu.vector_store %arg9[%c400, %c0_37], %59 {strides = array<i32>} : memref<432x324xf32, #tpu.memory_space<vmem>>, vector<16x324xf32>,
    %61 = vector.extract_strided_slice %44 {offsets = [0, 38], sizes = [16, 324], strides = [1, 1]} : vector<16x384xf32> to vector<16x324xf32>
    %c416 = arith.constant 416 : index
    %c0_38 = arith.constant 0 : index
    %62 = vector.load %arg9[%c416, %c0_38] : memref<432x324xf32, #tpu.memory_space<vmem>>, vector<16x324xf32>
    tpu.vector_store %arg9[%c416, %c0_38], %61 {strides = array<i32>} : memref<432x324xf32, #tpu.memory_space<vmem>>, vector<16x324xf32>,
    %c0_39 = arith.constant 0 : index
    %c0_40 = arith.constant 0 : index
    %63 = vector.load %arg6[%c0_39, %c0_40] : memref<16x432xf32, #tpu.memory_space<vmem>>, vector<16x432xf32>
    %c0_41 = arith.constant 0 : index
    %c0_42 = arith.constant 0 : index
    %64 = vector.load %arg9[%c0_41, %c0_42] : memref<432x324xf32, #tpu.memory_space<vmem>>, vector<432x324xf32>
    %cst = arith.constant dense<0.000000e+00> : vector<16x324xf32>
    %65 = tpu.matmul %63, %64, %cst {dimension_numbers = #tpu.dot_dimension_numbers<[1], [0], [0], [1], [0, 0, 1, 1], [], []>} : vector<16x432xf32>, vector<432x324xf32>, vector<16x324xf32> -> vector<16x324xf32>
    %66 = arith.truncf %65 : vector<16x324xf32> to vector<16x324xbf16>
    %c0_43 = arith.constant 0 : index
    %c0_44 = arith.constant 0 : index
    %c0_45 = arith.constant 0 : index
    %c0_46 = arith.constant 0 : index
    %67 = vector.load %arg7[%c0_43, %c0_44, %c0_45, %c0_46] : memref<1x1x16x324xbf16, #tpu.memory_space<vmem>>, vector<1x1x16x324xbf16>
    %68 = vector.shape_cast %67 : vector<1x1x16x324xbf16> to vector<16x324xbf16>
    %69 = vector.shape_cast %66 : vector<16x324xbf16> to vector<1x1x16x324xbf16>
    tpu.vector_store %arg7[%c0_43, %c0_44, %c0_45, %c0_46], %69 {strides = array<i32>} : memref<1x1x16x324xbf16, #tpu.memory_space<vmem>>, vector<1x1x16x324xbf16>,
    %c0_47 = arith.constant 0 : index
    %c0_48 = arith.constant 0 : index
    %70 = vector.load %arg2[%c0_47, %c0_48] : memref<1x324xf32, #tpu.memory_space<vmem>>, vector<1x324xf32>
    %71 = vector.broadcast %70 : vector<1x324xf32> to vector<16x324xf32>
    %72 = arith.mulf %65, %71 : vector<16x324xf32>
    %cst_49 = arith.constant dense<0.000000e+00> : vector<16xf32>
    %73 = vector.multi_reduction <add>, %72, %cst_49 [1] : vector<16x324xf32> to vector<16xf32>
    %74 = vector.shape_cast %73 : vector<16xf32> to vector<16x1xf32>
    %cst_50 = arith.constant 3.906250e-03 : f32
    %75 = vector.broadcast %cst_50 : f32 to vector<16x1xf32>
    %76 = arith.mulf %74, %75 : vector<16x1xf32>
    %77 = vector.broadcast %76 : vector<16x1xf32> to vector<16x324xf32>
    %78 = arith.subf %65, %77 : vector<16x324xf32>
    %79 = vector.broadcast %70 : vector<1x324xf32> to vector<16x324xf32>
    %80 = arith.mulf %78, %79 : vector<16x324xf32>
    %81 = arith.mulf %80, %80 : vector<16x324xf32>
    %cst_51 = arith.constant dense<0.000000e+00> : vector<16xf32>
    %82 = vector.multi_reduction <add>, %81, %cst_51 [1] : vector<16x324xf32> to vector<16xf32>
    %83 = vector.shape_cast %82 : vector<16xf32> to vector<16x1xf32>
    %84 = tpu.concatenate %76, %83 in 1 : vector<16x1xf32>, vector<16x1xf32> -> vector<16x2xf32>
    %c0_52 = arith.constant 0 : index
    %c0_53 = arith.constant 0 : index
    %c0_54 = arith.constant 0 : index
    %c0_55 = arith.constant 0 : index
    %85 = vector.load %arg8[%c0_52, %c0_53, %c0_54, %c0_55] : memref<1x1x16x2xf32, #tpu.memory_space<vmem>>, vector<1x1x16x2xf32>
    %86 = vector.shape_cast %85 : vector<1x1x16x2xf32> to vector<16x2xf32>
    %87 = vector.shape_cast %84 : vector<16x2xf32> to vector<1x1x16x2xf32>
    tpu.vector_store %arg8[%c0_52, %c0_53, %c0_54, %c0_55], %87 {strides = array<i32>} : memref<1x1x16x2xf32, #tpu.memory_space<vmem>>, vector<1x1x16x2xf32>,
    return
  }
  func.func @transform_0(%arg0: i32, %arg1: i32) -> (i32, i32) {
    %c0_i32 = arith.constant 0 : i32
    %c0_i32_0 = arith.constant 0 : i32
    %c0_i32_1 = arith.constant 0 : i32
    return %c0_i32, %c0_i32_0 : i32, i32
  }
  func.func @transform_1(%arg0: i32, %arg1: i32) -> (i32, i32, i32, i32) {
    %c0_i32 = arith.constant 0 : i32
    %0 = arith.addi %arg1, %c0_i32 : i32
    %c0_i32_0 = arith.constant 0 : i32
    %c0_i32_1 = arith.constant 0 : i32
    %c0_i32_2 = arith.constant 0 : i32
    return %arg0, %0, %c0_i32_0, %c0_i32_1 : i32, i32, i32, i32
  }
  func.func @transform_2(%arg0: i32, %arg1: i32) -> (i32, i32, i32, i32) {
    %c1_i32 = arith.constant 1 : i32
    %0 = arith.addi %arg1, %c1_i32 : i32
    %c0_i32 = arith.constant 0 : i32
    %c0_i32_0 = arith.constant 0 : i32
    %c0_i32_1 = arith.constant 0 : i32
    return %arg0, %0, %c0_i32, %c0_i32_0 : i32, i32, i32, i32
  }
  func.func @transform_3(%arg0: i32, %arg1: i32) -> (i32, i32, i32, i32) {
    %c2_i32 = arith.constant 2 : i32
    %0 = arith.addi %arg1, %c2_i32 : i32
    %c0_i32 = arith.constant 0 : i32
    %c0_i32_0 = arith.constant 0 : i32
    %c0_i32_1 = arith.constant 0 : i32
    return %arg0, %0, %c0_i32, %c0_i32_0 : i32, i32, i32, i32
  }
  func.func @transform_4(%arg0: i32, %arg1: i32) -> (i32, i32) {
    %c0_i32 = arith.constant 0 : i32
    %c0_i32_0 = arith.constant 0 : i32
    %c0_i32_1 = arith.constant 0 : i32
    return %c0_i32, %c0_i32_0 : i32, i32
  }
  func.func @transform_5(%arg0: i32, %arg1: i32) -> (i32, i32, i32, i32) {
    %c0_i32 = arith.constant 0 : i32
    %c0_i32_0 = arith.constant 0 : i32
    %c0_i32_1 = arith.constant 0 : i32
    return %arg0, %arg1, %c0_i32, %c0_i32_0 : i32, i32, i32, i32
  }
  func.func @transform_6(%arg0: i32, %arg1: i32) -> (i32, i32, i32, i32) {
    %c0_i32 = arith.constant 0 : i32
    %c0_i32_0 = arith.constant 0 : i32
    %c0_i32_1 = arith.constant 0 : i32
    return %arg0, %arg1, %c0_i32, %c0_i32_0 : i32, i32, i32, i32
  }
}

module attributes {stable_mosaic.version = 11 : i64} {
  func.func @kernel(%arg0: i32, %arg1: i32, %arg2: memref<1x1x16x384xbf16, #tpu.memory_space<vmem>>, %arg3: memref<1x1x16x384xbf16, #tpu.memory_space<vmem>>, %arg4: memref<1x1x16x384xbf16, #tpu.memory_space<vmem>>, %arg5: memref<8x432xf32, #tpu.memory_space<vmem>>, %arg6: memref<1x1x8x324xf32, #tpu.memory_space<vmem>>, %arg7: memref<432x324xf32, #tpu.memory_space<vmem>>) attributes {dimension_semantics = [#tpu.dimension_semantics<parallel>, #tpu.dimension_semantics<parallel>], iteration_bounds = array<i64: 2, 16>, scalar_prefetch = 0 : i64, scratch_operands = 1 : i64, tpu.core_type = #tpu.core_type<tc>, window_params = [{transform_indices = @transform_0, window_bounds = array<i64: 1, 1, 16, 384>}, {transform_indices = @transform_1, window_bounds = array<i64: 1, 1, 16, 384>}, {transform_indices = @transform_2, window_bounds = array<i64: 1, 1, 16, 384>}, {pipeline_mode = #tpu.pipeline_mode<synchronous>, transform_indices = @transform_3, window_bounds = array<i64: 8, 432>}, {transform_indices = @transform_4, window_bounds = array<i64: 1, 1, 8, 324>}]} {
    %c0 = arith.constant 0 : index
    %c0_0 = arith.constant 0 : index
    %c0_1 = arith.constant 0 : index
    %c0_2 = arith.constant 0 : index
    %0 = vector.load %arg2[%c0, %c0_0, %c0_1, %c0_2] : memref<1x1x16x384xbf16, #tpu.memory_space<vmem>>, vector<1x1x16x384xbf16>
    %1 = vector.shape_cast %0 : vector<1x1x16x384xbf16> to vector<16x384xbf16>
    %2 = arith.extf %1 : vector<16x384xbf16> to vector<16x384xf32>
    %3 = vector.extract_strided_slice %2 {offsets = [0, 0], sizes = [16, 324], strides = [1, 1]} : vector<16x384xf32> to vector<16x324xf32>
    %c0_3 = arith.constant 0 : index
    %c0_4 = arith.constant 0 : index
    %4 = vector.load %arg7[%c0_3, %c0_4] : memref<432x324xf32, #tpu.memory_space<vmem>>, vector<16x324xf32>
    tpu.vector_store %arg7[%c0_3, %c0_4], %3 {strides = array<i32>} : memref<432x324xf32, #tpu.memory_space<vmem>>, vector<16x324xf32>,
    %5 = vector.extract_strided_slice %2 {offsets = [0, 1], sizes = [16, 324], strides = [1, 1]} : vector<16x384xf32> to vector<16x324xf32>
    %c16 = arith.constant 16 : index
    %c0_5 = arith.constant 0 : index
    %6 = vector.load %arg7[%c16, %c0_5] : memref<432x324xf32, #tpu.memory_space<vmem>>, vector<16x324xf32>
    tpu.vector_store %arg7[%c16, %c0_5], %5 {strides = array<i32>} : memref<432x324xf32, #tpu.memory_space<vmem>>, vector<16x324xf32>,
    %7 = vector.extract_strided_slice %2 {offsets = [0, 2], sizes = [16, 324], strides = [1, 1]} : vector<16x384xf32> to vector<16x324xf32>
    %c32 = arith.constant 32 : index
    %c0_6 = arith.constant 0 : index
    %8 = vector.load %arg7[%c32, %c0_6] : memref<432x324xf32, #tpu.memory_space<vmem>>, vector<16x324xf32>
    tpu.vector_store %arg7[%c32, %c0_6], %7 {strides = array<i32>} : memref<432x324xf32, #tpu.memory_space<vmem>>, vector<16x324xf32>,
    %9 = vector.extract_strided_slice %2 {offsets = [0, 18], sizes = [16, 324], strides = [1, 1]} : vector<16x384xf32> to vector<16x324xf32>
    %c48 = arith.constant 48 : index
    %c0_7 = arith.constant 0 : index
    %10 = vector.load %arg7[%c48, %c0_7] : memref<432x324xf32, #tpu.memory_space<vmem>>, vector<16x324xf32>
    tpu.vector_store %arg7[%c48, %c0_7], %9 {strides = array<i32>} : memref<432x324xf32, #tpu.memory_space<vmem>>, vector<16x324xf32>,
    %11 = vector.extract_strided_slice %2 {offsets = [0, 19], sizes = [16, 324], strides = [1, 1]} : vector<16x384xf32> to vector<16x324xf32>
    %c64 = arith.constant 64 : index
    %c0_8 = arith.constant 0 : index
    %12 = vector.load %arg7[%c64, %c0_8] : memref<432x324xf32, #tpu.memory_space<vmem>>, vector<16x324xf32>
    tpu.vector_store %arg7[%c64, %c0_8], %11 {strides = array<i32>} : memref<432x324xf32, #tpu.memory_space<vmem>>, vector<16x324xf32>,
    %13 = vector.extract_strided_slice %2 {offsets = [0, 20], sizes = [16, 324], strides = [1, 1]} : vector<16x384xf32> to vector<16x324xf32>
    %c80 = arith.constant 80 : index
    %c0_9 = arith.constant 0 : index
    %14 = vector.load %arg7[%c80, %c0_9] : memref<432x324xf32, #tpu.memory_space<vmem>>, vector<16x324xf32>
    tpu.vector_store %arg7[%c80, %c0_9], %13 {strides = array<i32>} : memref<432x324xf32, #tpu.memory_space<vmem>>, vector<16x324xf32>,
    %15 = vector.extract_strided_slice %2 {offsets = [0, 36], sizes = [16, 324], strides = [1, 1]} : vector<16x384xf32> to vector<16x324xf32>
    %c96 = arith.constant 96 : index
    %c0_10 = arith.constant 0 : index
    %16 = vector.load %arg7[%c96, %c0_10] : memref<432x324xf32, #tpu.memory_space<vmem>>, vector<16x324xf32>
    tpu.vector_store %arg7[%c96, %c0_10], %15 {strides = array<i32>} : memref<432x324xf32, #tpu.memory_space<vmem>>, vector<16x324xf32>,
    %17 = vector.extract_strided_slice %2 {offsets = [0, 37], sizes = [16, 324], strides = [1, 1]} : vector<16x384xf32> to vector<16x324xf32>
    %c112 = arith.constant 112 : index
    %c0_11 = arith.constant 0 : index
    %18 = vector.load %arg7[%c112, %c0_11] : memref<432x324xf32, #tpu.memory_space<vmem>>, vector<16x324xf32>
    tpu.vector_store %arg7[%c112, %c0_11], %17 {strides = array<i32>} : memref<432x324xf32, #tpu.memory_space<vmem>>, vector<16x324xf32>,
    %19 = vector.extract_strided_slice %2 {offsets = [0, 38], sizes = [16, 324], strides = [1, 1]} : vector<16x384xf32> to vector<16x324xf32>
    %c128 = arith.constant 128 : index
    %c0_12 = arith.constant 0 : index
    %20 = vector.load %arg7[%c128, %c0_12] : memref<432x324xf32, #tpu.memory_space<vmem>>, vector<16x324xf32>
    tpu.vector_store %arg7[%c128, %c0_12], %19 {strides = array<i32>} : memref<432x324xf32, #tpu.memory_space<vmem>>, vector<16x324xf32>,
    %c0_13 = arith.constant 0 : index
    %c0_14 = arith.constant 0 : index
    %c0_15 = arith.constant 0 : index
    %c0_16 = arith.constant 0 : index
    %21 = vector.load %arg3[%c0_13, %c0_14, %c0_15, %c0_16] : memref<1x1x16x384xbf16, #tpu.memory_space<vmem>>, vector<1x1x16x384xbf16>
    %22 = vector.shape_cast %21 : vector<1x1x16x384xbf16> to vector<16x384xbf16>
    %23 = arith.extf %22 : vector<16x384xbf16> to vector<16x384xf32>
    %24 = vector.extract_strided_slice %23 {offsets = [0, 0], sizes = [16, 324], strides = [1, 1]} : vector<16x384xf32> to vector<16x324xf32>
    %c144 = arith.constant 144 : index
    %c0_17 = arith.constant 0 : index
    %25 = vector.load %arg7[%c144, %c0_17] : memref<432x324xf32, #tpu.memory_space<vmem>>, vector<16x324xf32>
    tpu.vector_store %arg7[%c144, %c0_17], %24 {strides = array<i32>} : memref<432x324xf32, #tpu.memory_space<vmem>>, vector<16x324xf32>,
    %26 = vector.extract_strided_slice %23 {offsets = [0, 1], sizes = [16, 324], strides = [1, 1]} : vector<16x384xf32> to vector<16x324xf32>
    %c160 = arith.constant 160 : index
    %c0_18 = arith.constant 0 : index
    %27 = vector.load %arg7[%c160, %c0_18] : memref<432x324xf32, #tpu.memory_space<vmem>>, vector<16x324xf32>
    tpu.vector_store %arg7[%c160, %c0_18], %26 {strides = array<i32>} : memref<432x324xf32, #tpu.memory_space<vmem>>, vector<16x324xf32>,
    %28 = vector.extract_strided_slice %23 {offsets = [0, 2], sizes = [16, 324], strides = [1, 1]} : vector<16x384xf32> to vector<16x324xf32>
    %c176 = arith.constant 176 : index
    %c0_19 = arith.constant 0 : index
    %29 = vector.load %arg7[%c176, %c0_19] : memref<432x324xf32, #tpu.memory_space<vmem>>, vector<16x324xf32>
    tpu.vector_store %arg7[%c176, %c0_19], %28 {strides = array<i32>} : memref<432x324xf32, #tpu.memory_space<vmem>>, vector<16x324xf32>,
    %30 = vector.extract_strided_slice %23 {offsets = [0, 18], sizes = [16, 324], strides = [1, 1]} : vector<16x384xf32> to vector<16x324xf32>
    %c192 = arith.constant 192 : index
    %c0_20 = arith.constant 0 : index
    %31 = vector.load %arg7[%c192, %c0_20] : memref<432x324xf32, #tpu.memory_space<vmem>>, vector<16x324xf32>
    tpu.vector_store %arg7[%c192, %c0_20], %30 {strides = array<i32>} : memref<432x324xf32, #tpu.memory_space<vmem>>, vector<16x324xf32>,
    %32 = vector.extract_strided_slice %23 {offsets = [0, 19], sizes = [16, 324], strides = [1, 1]} : vector<16x384xf32> to vector<16x324xf32>
    %c208 = arith.constant 208 : index
    %c0_21 = arith.constant 0 : index
    %33 = vector.load %arg7[%c208, %c0_21] : memref<432x324xf32, #tpu.memory_space<vmem>>, vector<16x324xf32>
    tpu.vector_store %arg7[%c208, %c0_21], %32 {strides = array<i32>} : memref<432x324xf32, #tpu.memory_space<vmem>>, vector<16x324xf32>,
    %34 = vector.extract_strided_slice %23 {offsets = [0, 20], sizes = [16, 324], strides = [1, 1]} : vector<16x384xf32> to vector<16x324xf32>
    %c224 = arith.constant 224 : index
    %c0_22 = arith.constant 0 : index
    %35 = vector.load %arg7[%c224, %c0_22] : memref<432x324xf32, #tpu.memory_space<vmem>>, vector<16x324xf32>
    tpu.vector_store %arg7[%c224, %c0_22], %34 {strides = array<i32>} : memref<432x324xf32, #tpu.memory_space<vmem>>, vector<16x324xf32>,
    %36 = vector.extract_strided_slice %23 {offsets = [0, 36], sizes = [16, 324], strides = [1, 1]} : vector<16x384xf32> to vector<16x324xf32>
    %c240 = arith.constant 240 : index
    %c0_23 = arith.constant 0 : index
    %37 = vector.load %arg7[%c240, %c0_23] : memref<432x324xf32, #tpu.memory_space<vmem>>, vector<16x324xf32>
    tpu.vector_store %arg7[%c240, %c0_23], %36 {strides = array<i32>} : memref<432x324xf32, #tpu.memory_space<vmem>>, vector<16x324xf32>,
    %38 = vector.extract_strided_slice %23 {offsets = [0, 37], sizes = [16, 324], strides = [1, 1]} : vector<16x384xf32> to vector<16x324xf32>
    %c256 = arith.constant 256 : index
    %c0_24 = arith.constant 0 : index
    %39 = vector.load %arg7[%c256, %c0_24] : memref<432x324xf32, #tpu.memory_space<vmem>>, vector<16x324xf32>
    tpu.vector_store %arg7[%c256, %c0_24], %38 {strides = array<i32>} : memref<432x324xf32, #tpu.memory_space<vmem>>, vector<16x324xf32>,
    %40 = vector.extract_strided_slice %23 {offsets = [0, 38], sizes = [16, 324], strides = [1, 1]} : vector<16x384xf32> to vector<16x324xf32>
    %c272 = arith.constant 272 : index
    %c0_25 = arith.constant 0 : index
    %41 = vector.load %arg7[%c272, %c0_25] : memref<432x324xf32, #tpu.memory_space<vmem>>, vector<16x324xf32>
    tpu.vector_store %arg7[%c272, %c0_25], %40 {strides = array<i32>} : memref<432x324xf32, #tpu.memory_space<vmem>>, vector<16x324xf32>,
    %c0_26 = arith.constant 0 : index
    %c0_27 = arith.constant 0 : index
    %c0_28 = arith.constant 0 : index
    %c0_29 = arith.constant 0 : index
    %42 = vector.load %arg4[%c0_26, %c0_27, %c0_28, %c0_29] : memref<1x1x16x384xbf16, #tpu.memory_space<vmem>>, vector<1x1x16x384xbf16>
    %43 = vector.shape_cast %42 : vector<1x1x16x384xbf16> to vector<16x384xbf16>
    %44 = arith.extf %43 : vector<16x384xbf16> to vector<16x384xf32>
    %45 = vector.extract_strided_slice %44 {offsets = [0, 0], sizes = [16, 324], strides = [1, 1]} : vector<16x384xf32> to vector<16x324xf32>
    %c288 = arith.constant 288 : index
    %c0_30 = arith.constant 0 : index
    %46 = vector.load %arg7[%c288, %c0_30] : memref<432x324xf32, #tpu.memory_space<vmem>>, vector<16x324xf32>
    tpu.vector_store %arg7[%c288, %c0_30], %45 {strides = array<i32>} : memref<432x324xf32, #tpu.memory_space<vmem>>, vector<16x324xf32>,
    %47 = vector.extract_strided_slice %44 {offsets = [0, 1], sizes = [16, 324], strides = [1, 1]} : vector<16x384xf32> to vector<16x324xf32>
    %c304 = arith.constant 304 : index
    %c0_31 = arith.constant 0 : index
    %48 = vector.load %arg7[%c304, %c0_31] : memref<432x324xf32, #tpu.memory_space<vmem>>, vector<16x324xf32>
    tpu.vector_store %arg7[%c304, %c0_31], %47 {strides = array<i32>} : memref<432x324xf32, #tpu.memory_space<vmem>>, vector<16x324xf32>,
    %49 = vector.extract_strided_slice %44 {offsets = [0, 2], sizes = [16, 324], strides = [1, 1]} : vector<16x384xf32> to vector<16x324xf32>
    %c320 = arith.constant 320 : index
    %c0_32 = arith.constant 0 : index
    %50 = vector.load %arg7[%c320, %c0_32] : memref<432x324xf32, #tpu.memory_space<vmem>>, vector<16x324xf32>
    tpu.vector_store %arg7[%c320, %c0_32], %49 {strides = array<i32>} : memref<432x324xf32, #tpu.memory_space<vmem>>, vector<16x324xf32>,
    %51 = vector.extract_strided_slice %44 {offsets = [0, 18], sizes = [16, 324], strides = [1, 1]} : vector<16x384xf32> to vector<16x324xf32>
    %c336 = arith.constant 336 : index
    %c0_33 = arith.constant 0 : index
    %52 = vector.load %arg7[%c336, %c0_33] : memref<432x324xf32, #tpu.memory_space<vmem>>, vector<16x324xf32>
    tpu.vector_store %arg7[%c336, %c0_33], %51 {strides = array<i32>} : memref<432x324xf32, #tpu.memory_space<vmem>>, vector<16x324xf32>,
    %53 = vector.extract_strided_slice %44 {offsets = [0, 19], sizes = [16, 324], strides = [1, 1]} : vector<16x384xf32> to vector<16x324xf32>
    %c352 = arith.constant 352 : index
    %c0_34 = arith.constant 0 : index
    %54 = vector.load %arg7[%c352, %c0_34] : memref<432x324xf32, #tpu.memory_space<vmem>>, vector<16x324xf32>
    tpu.vector_store %arg7[%c352, %c0_34], %53 {strides = array<i32>} : memref<432x324xf32, #tpu.memory_space<vmem>>, vector<16x324xf32>,
    %55 = vector.extract_strided_slice %44 {offsets = [0, 20], sizes = [16, 324], strides = [1, 1]} : vector<16x384xf32> to vector<16x324xf32>
    %c368 = arith.constant 368 : index
    %c0_35 = arith.constant 0 : index
    %56 = vector.load %arg7[%c368, %c0_35] : memref<432x324xf32, #tpu.memory_space<vmem>>, vector<16x324xf32>
    tpu.vector_store %arg7[%c368, %c0_35], %55 {strides = array<i32>} : memref<432x324xf32, #tpu.memory_space<vmem>>, vector<16x324xf32>,
    %57 = vector.extract_strided_slice %44 {offsets = [0, 36], sizes = [16, 324], strides = [1, 1]} : vector<16x384xf32> to vector<16x324xf32>
    %c384 = arith.constant 384 : index
    %c0_36 = arith.constant 0 : index
    %58 = vector.load %arg7[%c384, %c0_36] : memref<432x324xf32, #tpu.memory_space<vmem>>, vector<16x324xf32>
    tpu.vector_store %arg7[%c384, %c0_36], %57 {strides = array<i32>} : memref<432x324xf32, #tpu.memory_space<vmem>>, vector<16x324xf32>,
    %59 = vector.extract_strided_slice %44 {offsets = [0, 37], sizes = [16, 324], strides = [1, 1]} : vector<16x384xf32> to vector<16x324xf32>
    %c400 = arith.constant 400 : index
    %c0_37 = arith.constant 0 : index
    %60 = vector.load %arg7[%c400, %c0_37] : memref<432x324xf32, #tpu.memory_space<vmem>>, vector<16x324xf32>
    tpu.vector_store %arg7[%c400, %c0_37], %59 {strides = array<i32>} : memref<432x324xf32, #tpu.memory_space<vmem>>, vector<16x324xf32>,
    %61 = vector.extract_strided_slice %44 {offsets = [0, 38], sizes = [16, 324], strides = [1, 1]} : vector<16x384xf32> to vector<16x324xf32>
    %c416 = arith.constant 416 : index
    %c0_38 = arith.constant 0 : index
    %62 = vector.load %arg7[%c416, %c0_38] : memref<432x324xf32, #tpu.memory_space<vmem>>, vector<16x324xf32>
    tpu.vector_store %arg7[%c416, %c0_38], %61 {strides = array<i32>} : memref<432x324xf32, #tpu.memory_space<vmem>>, vector<16x324xf32>,
    %c0_39 = arith.constant 0 : index
    %c0_40 = arith.constant 0 : index
    %63 = vector.load %arg5[%c0_39, %c0_40] : memref<8x432xf32, #tpu.memory_space<vmem>>, vector<8x432xf32>
    %c0_41 = arith.constant 0 : index
    %c0_42 = arith.constant 0 : index
    %64 = vector.load %arg7[%c0_41, %c0_42] : memref<432x324xf32, #tpu.memory_space<vmem>>, vector<432x324xf32>
    %cst = arith.constant dense<0.000000e+00> : vector<8x324xf32>
    %65 = tpu.matmul %63, %64, %cst {dimension_numbers = #tpu.dot_dimension_numbers<[1], [0], [0], [1], [0, 0, 1, 1], [], []>} : vector<8x432xf32>, vector<432x324xf32>, vector<8x324xf32> -> vector<8x324xf32>
    %c0_43 = arith.constant 0 : index
    %c0_44 = arith.constant 0 : index
    %c0_45 = arith.constant 0 : index
    %c0_46 = arith.constant 0 : index
    %66 = vector.load %arg6[%c0_43, %c0_44, %c0_45, %c0_46] : memref<1x1x8x324xf32, #tpu.memory_space<vmem>>, vector<1x1x8x324xf32>
    %67 = vector.shape_cast %66 : vector<1x1x8x324xf32> to vector<8x324xf32>
    %68 = vector.shape_cast %65 : vector<8x324xf32> to vector<1x1x8x324xf32>
    tpu.vector_store %arg6[%c0_43, %c0_44, %c0_45, %c0_46], %68 {strides = array<i32>} : memref<1x1x8x324xf32, #tpu.memory_space<vmem>>, vector<1x1x8x324xf32>,
    return
  }
  func.func @transform_0(%arg0: i32, %arg1: i32) -> (i32, i32, i32, i32) {
    %c0_i32 = arith.constant 0 : i32
    %0 = arith.addi %arg1, %c0_i32 : i32
    %c0_i32_0 = arith.constant 0 : i32
    %c0_i32_1 = arith.constant 0 : i32
    %c0_i32_2 = arith.constant 0 : i32
    return %arg0, %0, %c0_i32_0, %c0_i32_1 : i32, i32, i32, i32
  }
  func.func @transform_1(%arg0: i32, %arg1: i32) -> (i32, i32, i32, i32) {
    %c1_i32 = arith.constant 1 : i32
    %0 = arith.addi %arg1, %c1_i32 : i32
    %c0_i32 = arith.constant 0 : i32
    %c0_i32_0 = arith.constant 0 : i32
    %c0_i32_1 = arith.constant 0 : i32
    return %arg0, %0, %c0_i32, %c0_i32_0 : i32, i32, i32, i32
  }
  func.func @transform_2(%arg0: i32, %arg1: i32) -> (i32, i32, i32, i32) {
    %c2_i32 = arith.constant 2 : i32
    %0 = arith.addi %arg1, %c2_i32 : i32
    %c0_i32 = arith.constant 0 : i32
    %c0_i32_0 = arith.constant 0 : i32
    %c0_i32_1 = arith.constant 0 : i32
    return %arg0, %0, %c0_i32, %c0_i32_0 : i32, i32, i32, i32
  }
  func.func @transform_3(%arg0: i32, %arg1: i32) -> (i32, i32) {
    %c0_i32 = arith.constant 0 : i32
    %c0_i32_0 = arith.constant 0 : i32
    %c0_i32_1 = arith.constant 0 : i32
    return %c0_i32, %c0_i32_0 : i32, i32
  }
  func.func @transform_4(%arg0: i32, %arg1: i32) -> (i32, i32, i32, i32) {
    %c0_i32 = arith.constant 0 : i32
    %c0_i32_0 = arith.constant 0 : i32
    %c0_i32_1 = arith.constant 0 : i32
    return %arg0, %arg1, %c0_i32, %c0_i32_0 : i32, i32, i32, i32
  }
}

</mosaic_0001>

<bundles_post_ra>
// kernel: normalization_forward.3
= control target key start
LH: loop header
LB: loop body
LE: loop exit
PB: predicated region body
PF: predicated region fallthrough
CT: control target
= control target key end

     0   :  { %s1319_s21 = smov 0   ;;  %s1321_s22 = smov 0   ;;  %s1517_s0 = inlined_call_operand.vmem [shape: f32[1,324], index: 0, kind: input, shape index: {}]   ;;  %s1518_s1 = inlined_call_operand.vmem [shape: bf16[2,18,1,384], index: 1, kind: input, shape index: {}, may-alias: {1,2,3}]   ;;  %s1519_s2 = inlined_call_operand.vmem [shape: bf16[2,18,1,384], index: 2, kind: input, shape index: {}, may-alias: {1,2,3}]   ;;  %s1520_s3 = inlined_call_operand.vmem [shape: bf16[2,18,1,384], index: 3, kind: input, shape index: {}, may-alias: {1,2,3}]   ;;  %s1521_s4 = inlined_call_operand.vmem [shape: f32[16,32], index: 4, kind: input, shape index: {}]   ;;  %s1522_s5 = inlined_call_operand.vmem [shape: bf16[2,16,16,324], index: 5, kind: output, shape index: {0}]   ;;  %s1523_s6 = inlined_call_operand.vmem [shape: f32[2,16,16,2], index: 6, kind: output, shape index: {1}]  }
   0x1   :  { %s1323_s23 = smov 0   ;;  %s1325_s24 = smov 0  }
   0x2   :  { %s1327_s25 = smov 0  }
   0x3 LB: > { %s26_s26 = sadd.s32 1, %s1264_s23  ;;  %s29_s27 = sadd.s32 1, %s1268_s24  ;;  %s1272_s25 = sphi %s1327_s25, %s17_s25   ;;  %s1268_s24 = sphi %s1325_s24, %s1529_s24   ;;  %s1264_s23 = sphi %s1323_s23, %s1528_s23   ;;  %s1260_s22 = sphi %s1321_s22, %s1527_s22   ;;  %s1256_s21 = sphi %s1319_s21, %s1526_s21  }
   0x4   : > { %p27_p0 = scmp.ge.s32.totalorder %s26_s26, 16  ;;  %p1086_p1 = scmp.ge.s32.totalorder %s1272_s25, 1 }
   0x5   : > { %p274_p2 = scmp.lt.s32.totalorder %s1272_s25, 33 }
   0x6   : > { %s1531_s26 = smov (%p27_p0, %s26_s26), 0  ;;  %s1533_s27 = smov (!%p27_p0, %s29_s27), %s1268_s24 }
   0x7   : > { %p275_p3 = pnand %p1086_p1, %p274_p2  ;;  %p31_p4 = scmp.ge.s32.totalorder %s1533_s27, 2 }
   0x8   : > { %p338_p5 = scmp.lt.s32.totalorder (!%p275_p3), %s1260_s22, 1  ;;  %p340_p6 = scmp.lt.s32.totalorder (!%p275_p3), %s1256_s21, 17  ;;  %v394_v0 = vlaneseq (!%p275_p3)  ;;  %v1274_v1 = vmov (!%p275_p3), 1966171168   ;;  %v1283_v17 = vmov (!%p275_p3), 0.0   ;;  %vm386_vm1 = vcmask (!%p275_p3), 556035  }
   0x9   : > { %s1535_s27 = smov (%p31_p4, %s1533_s27), 0  ;;  %278 = sbr.rel (%p275_p3) target bundleno = 713 (0x2c9), region = 40 }
   0xa   : > { %s346_s28 = sadd.s32 (!%p275_p3), 1, %s1256_s21  ;;  %v392_v2 = vunpack.c.l.s4 (!%p275_p3), %v1274_v1  ;;  %v1359_v4 = vshrl.u32 (!%p275_p3), %v394_v0, 7  ;;  %s356_s17 = sadd.s32 (!%p275_p3), 2, %s1256_s21  ;;  %vm1371_vm0 = vcmp.lt.s32.totalorder (!%p275_p3), %v394_v0, 324  ;;  %385 = vst [vmem:[#allocation2 + $0x50] sm:$0xf8] (!%p275_p3), %v1283_v17  ;;  %718 = vmatprep.mubr.f32.mxu0 (!%p275_p3), %v1283_v17 }
   0xb   : > { %p349_p7 = scmp.lt.s32.totalorder (!%p275_p3), %s346_s28, 17  ;;  %p359_p8 = scmp.lt.s32.totalorder (!%p275_p3), %s356_s17, 17  ;;  %384 = vst [vmem:[#allocation2 + $0x48] sm:$0xf8] (!%p275_p3), %v1283_v17  ;;  %387 = vst.msk [vmem:[#allocation2 + $0x58] sm:$0xf8] (!%p275_p3), %vm386_vm1, %v1283_v17 }
   0xc   : > { %v393_v3 = vunpack.c.0.s8 (!%p275_p3), %v392_v2  ;;  %s1275_s19 = smov (!%p275_p3), 110   ;;  %s1276_s20 = smov (!%p275_p3), 127   ;;  %v1394_v18 = vld [vmem:[%s1521_s4] sm:$0xff] (!%p275_p3)  ;;  %vm647_vm2 = vcmask (!%p275_p3), 261120   ;;  %vm408_vm3 = vcmask (!%p275_p3), 1039360   ;;  %vm426_vm4 = vcmask (!%p275_p3), 900096  }
   0xd   : > { %s1277_s9 = smov (!%p275_p3), 109   ;;  %s1278_s10 = smov (!%p275_p3), 126   ;;  %1119 = vmatprep.mubr.msk.f32.mxu1 (!%p275_p3), %vm647_vm2, %v1394_v18  ;;  %vm417_vm5 = vcmask (!%p275_p3), 1031168   ;;  %vm435_vm6 = vcmask (!%p275_p3), 891904   ;;  %vm453_vm7 = vcmask (!%p275_p3), 752640   ;;  %vm444_vm8 = vcmask (!%p275_p3), 883712  }
   0xe   : > { %v396_v5 = vsub.s32 (!%p275_p3), %v393_v3, %v1359_v4  ;;  %vm471_vm9 = vcmask (!%p275_p3), 736256   ;;  %vm462_vm10 = vcmask (!%p275_p3), 744448   ;;  %v634_v10 = vld [vmem:[%s1521_s4 + $0x8] sm:$0xff] (!%p275_p3)  ;;  %p368_p9 = scmp.lt.s32.totalorder (!%p275_p3), %s1256_s21, 15  ;;  %vm827_vm11 = vcmask (!%p275_p3), 551936  }
   0xf   : > { %vm855_vm12 = vcmask (!%p275_p3), 556032   ;;  %vm895_vm13 = vcmask (!%p275_p3), 7168   ;;  %vm898_vm14 = vcmask (!%p275_p3), 15360  }
  0x10   : > { %s1537_s22 = smov (!%p338_p5, %s1260_s22), 1  ;;  %s1539_s28 = smov (!%p349_p7, %s346_s28), 17 }
  0x11   : > { %s341_s29 = scalar_select %p340_p6, %s1256_s21, 17 }
  0x12   : > { %s1357_s30 = smul.u32 54, %s1537_s22  ;;  %s1541_s17 = smov (!%p359_p8, %s356_s17), 17 }
  0x13   : > { %s1138_s7 = smul.u32 3, %s341_s29  ;;  %s1543_s21 = smov (!%p368_p9, %s1256_s21), 15 }
  0x14   : > { %s1140_s12 = smul.u32 3, %s1539_s28 }
  0x15   : > { %s344_s8 = sadd.s32 %s1357_s30, %s1138_s7  ;;  %s1141_s18 = smul.u32 3, %s1541_s17 }
  0x16   : > { %s345_s11 = scalar_lea.vmem %s1518_s1, %s344_s8  ;;  %s353_s13 = sadd.s32 %s1140_s12, %s1357_s30 }
  0x17   : > { %v388_v6 = vld [vmem:[%s345_s11] sm:$0x7]  ;;  %s354_s16 = scalar_lea.vmem %s1519_s2, %s353_s13  ;;  %s363_s28 = sadd.s32 %s1141_s18, %s1357_s30 }
  0x18   : > { %v389_v7 = vunpack.c.l.bf16 %v388_v6  ;;  %v477_v9 = vld [vmem:[%s354_s16] sm:$0x7]  ;;  %s364_s8 = scalar_lea.vmem %s1520_s3, %s363_s28  ;;  %s1279_s11 = smov 92  }
  0x19   : > { %v478_v11 = vunpack.c.l.bf16 %v477_v9  ;;  %v555_v14 = vld [vmem:[%s364_s8] sm:$0x7]  ;;  %s1280_s12 = smov 108   ;;  %s1281_s13 = smov 90  }
  0x1a   : > { %v397_v8 = vrot.slane %v389_v7, %v396_v5  ;;  %v556_v15 = vunpack.c.l.bf16 %v555_v14  ;;  %s1282_s30 = smov 91   ;;  %s1142_s18 = smul.u32 6, %s1543_s21 }
  0x1b   : > { %v486_v12 = vrot.slane %v478_v11, %v396_v5 }
  0x1c   : > { %403 = vst.msk [vmem:[#allocation2] ss:$8 sm:$0x7] %vm1371_vm0, %v397_v8  ;;  %v564_v16 = vrot.slane %v556_v15, %v396_v5 }
  0x1d   : > { %v1204_v13 = vpack.i.bf16 %v486_v12, %v397_v8  ;;  %489 = vst.msk [vmem:[#allocation2 + $0x19] ss:$8 sm:$0x7] %vm1371_vm0, %v486_v12 }
  0x1e   : > { %567 = vst.msk [vmem:[#allocation2 + $0x32] ss:$8 sm:$0x7] %vm1371_vm0, %v564_v16 }
  0x1f   : > { %1205 = vrot.lane.b32.xlu1 %v1204_v13, %s1275_s19  ;;  %1195 = vrot.lane.b32.xlu0 %v1204_v13, %s1276_s20 }
  0x23   : > { %1210 = vrot.lane.b32.xlu1 %v1204_v13, %s1277_s9  ;;  %1200 = vrot.lane.b32.xlu0 %v1204_v13, %s1278_s10 }
  0x27   : > { %1220 = vrot.lane.b32.xlu1 %v1204_v13, %s1279_s11  ;;  %1215 = vrot.lane.b32.xlu0 %v1204_v13, %s1280_s12 }
  0x2b   : > { %1230 = vrot.lane.b32.xlu1 %v1204_v13, %s1281_s13  ;;  %1225 = vrot.lane.b32.xlu0 %v1204_v13, %s1282_s30 }
  0x2f   : > { %577 = vrot.lane.b32.xlu1 %v564_v16, %s1278_s10  ;;  %569 = vrot.lane.b32.xlu0 %v564_v16, %s1276_s20 }
  0x33   : > { %593 = vrot.lane.b32.xlu1 %v564_v16, %s1277_s9  ;;  %585 = vrot.lane.b32.xlu0 %v564_v16, %s1275_s19  ;;  %s1143_s19 = smul.u32 96, %s1537_s22 }
  0x35   : > { %s372_s29 = sadd.s32 %s1143_s19, %s1142_s18 }
  0x36   : > { %s1087_s7 = sshll.u32 %s372_s29, 2 }
  0x37   : > { %609 = vrot.lane.b32.xlu1 %v564_v16, %s1279_s11  ;;  %601 = vrot.lane.b32.xlu0 %v564_v16, %s1280_s12  ;;  %s374_s10 = scalar_lea.vmem %s1522_s5, %s1087_s7  ;;  %s1088_s11 = sshll.u32 %s1543_s21, 1 }
  0x38   : > { %s1089_s12 = sshll.u32 %s1537_s22, 5 }
  0x3b   : > { %625 = vrot.lane.b32.xlu1 %v564_v16, %s1281_s13  ;;  %617 = vrot.lane.b32.xlu0 %v564_v16, %s1282_s30  ;;  %s381_s13 = sadd.s32 %s1089_s12, %s1088_s11 }
  0x3c   : > { %s1090_s30 = sshll.u32 %s381_s13, 3 }
  0x3d   : > { %s383_s16 = scalar_lea.vmem %s1523_s6, %s1090_s30 }
  0x91   : > { %v1206_v19 = vpop.permute.xlu1 %1205  ;;  %v1196_v20 = vpop.permute.xlu0 %1195 }
  0x92   : > { %v1208_v21 = vunpack.i.h.bf16 %v1206_v19  ;;  %v1207_v22 = vunpack.i.l.bf16 %v1206_v19  ;;  %v1198_v23 = vunpack.i.h.bf16 %v1196_v20  ;;  %v1197_v24 = vunpack.i.l.bf16 %v1196_v20 }
  0x94   : > { %v509_v25 = vrot.slane %v1208_v21, 1  ;;  %v425_v26 = vrot.slane %v1207_v22, 1  ;;  %v493_v27 = vrot.slane %v1198_v23, 1  ;;  %v407_v28 = vrot.slane %v1197_v24, 1 }
  0x95   : > { %v1211_v29 = vpop.permute.xlu1 %1210  ;;  %v1201_v30 = vpop.permute.xlu0 %1200 }
  0x96   : > { %v1213_v31 = vunpack.i.h.bf16 %v1211_v29  ;;  %v1212_v32 = vunpack.i.l.bf16 %v1211_v29  ;;  %v1203_v33 = vunpack.i.h.bf16 %v1201_v30  ;;  %v1202_v34 = vunpack.i.l.bf16 %v1201_v30 }
  0x97   : > { %v409_v35 = vsel %vm408_vm3, %v1197_v24, %v407_v28  ;;  %v494_v36 = vsel %vm408_vm3, %v1198_v23, %v493_v27  ;;  %v427_v37 = vsel %vm426_vm4, %v1207_v22, %v425_v26  ;;  %v510_v38 = vsel %vm426_vm4, %v1208_v21, %v509_v25 }
  0x98   : > { %v517_v39 = vrot.slane %v1213_v31, 1  ;;  %v434_v40 = vrot.slane %v1212_v32, 1  ;;  %v501_v41 = vrot.slane %v1203_v33, 1  ;;  %v416_v42 = vrot.slane %v1202_v34, 1 }
  0x99   : > { %412 = vst.msk [vmem:[#allocation2 + $0x1] ss:$8 sm:$0x7] %vm1371_vm0, %v409_v35  ;;  %497 = vst.msk [vmem:[#allocation2 + $0x1a] ss:$8 sm:$0x7] %vm1371_vm0, %v494_v36  ;;  %v1221_v43 = vpop.permute.xlu1 %1220  ;;  %v1216_v44 = vpop.permute.xlu0 %1215 }
  0x9a   : > { %430 = vst.msk [vmem:[#allocation2 + $0x3] ss:$8 sm:$0x7] %vm1371_vm0, %v427_v37  ;;  %513 = vst.msk [vmem:[#allocation2 + $0x1c] ss:$8 sm:$0x7] %vm1371_vm0, %v510_v38  ;;  %v1223_v45 = vunpack.i.h.bf16 %v1221_v43  ;;  %v1222_v46 = vunpack.i.l.bf16 %v1221_v43  ;;  %v1218_v47 = vunpack.i.h.bf16 %v1216_v44  ;;  %v1217_v48 = vunpack.i.l.bf16 %v1216_v44 }
  0x9b   : > { %v418_v49 = vsel %vm417_vm5, %v1202_v34, %v416_v42  ;;  %v502_v50 = vsel %vm417_vm5, %v1203_v33, %v501_v41  ;;  %v436_v51 = vsel %vm435_vm6, %v1212_v32, %v434_v40  ;;  %v518_v52 = vsel %vm435_vm6, %v1213_v31, %v517_v39 }
  0x9c   : > { %v533_v53 = vrot.slane %v1223_v45, 1  ;;  %v452_v54 = vrot.slane %v1222_v46, 1  ;;  %v525_v55 = vrot.slane %v1218_v47, 1  ;;  %v443_v56 = vrot.slane %v1217_v48, 1 }
  0x9d   : > { %421 = vst.msk [vmem:[#allocation2 + $0x2] ss:$8 sm:$0x7] %vm1371_vm0, %v418_v49  ;;  %505 = vst.msk [vmem:[#allocation2 + $0x1b] ss:$8 sm:$0x7] %vm1371_vm0, %v502_v50  ;;  %v1231_v57 = vpop.permute.xlu1 %1230  ;;  %v1226_v58 = vpop.permute.xlu0 %1225 }
  0x9e   : > { %439 = vst.msk [vmem:[#allocation2 + $0x4] ss:$8 sm:$0x7] %vm1371_vm0, %v436_v51  ;;  %521 = vst.msk [vmem:[#allocation2 + $0x1d] ss:$8 sm:$0x7] %vm1371_vm0, %v518_v52  ;;  %v1233_v59 = vunpack.i.h.bf16 %v1231_v57  ;;  %v1232_v60 = vunpack.i.l.bf16 %v1231_v57  ;;  %v1228_v61 = vunpack.i.h.bf16 %v1226_v58  ;;  %v1227_v62 = vunpack.i.l.bf16 %v1226_v58 }
  0x9f   : > { %v454_v63 = vsel %vm453_vm7, %v1222_v46, %v452_v54  ;;  %v534_v0 = vsel %vm453_vm7, %v1223_v45, %v533_v53  ;;  %v445_v1 = vsel %vm444_vm8, %v1217_v48, %v443_v56  ;;  %v526_v2 = vsel %vm444_vm8, %v1218_v47, %v525_v55  ;;  %v831_v58 = vld [vmem:[%s1517_s0] sm:$0x7] }
  0xa0   : > { %v549_v3 = vrot.slane %v1233_v59, 1  ;;  %v470_v5 = vrot.slane %v1232_v60, 1  ;;  %v541_v6 = vrot.slane %v1228_v61, 1  ;;  %v461_v7 = vrot.slane %v1227_v62, 1 }
  0xa1   : > { %457 = vst.msk [vmem:[#allocation2 + $0x6] ss:$8 sm:$0x7] %vm1371_vm0, %v454_v63  ;;  %537 = vst.msk [vmem:[#allocation2 + $0x1f] ss:$8 sm:$0x7] %vm1371_vm0, %v534_v0  ;;  %v578_v8 = vpop.permute.xlu1 %577  ;;  %v570_v9 = vpop.permute.xlu0 %569 }
  0xa2   : > { %448 = vst.msk [vmem:[#allocation2 + $0x5] ss:$8 sm:$0x7] %vm1371_vm0, %v445_v1  ;;  %529 = vst.msk [vmem:[#allocation2 + $0x1e] ss:$8 sm:$0x7] %vm1371_vm0, %v526_v2  ;;  %v472_v13 = vsel %vm471_vm9, %v1232_v60, %v470_v5  ;;  %v550_v14 = vsel %vm471_vm9, %v1233_v59, %v549_v3  ;;  %v463_v15 = vsel %vm462_vm10, %v1227_v62, %v461_v7 }
  0xa3   : > { %v579_v11 = vrot.slane %v578_v8, 1  ;;  %v571_v12 = vrot.slane %v570_v9, 1  ;;  %475 = vst.msk [vmem:[#allocation2 + $0x18] ss:$8 sm:$0x7] %vm1371_vm0, %v472_v13  ;;  %v542_v16 = vsel %vm462_vm10, %v1228_v61, %v541_v6  ;;  %v835_v57 = vsub.s32 0, %v1359_v4 }
  0xa4   : > { %553 = vst.msk [vmem:[#allocation2 + $0x31] ss:$8 sm:$0x7] %vm1371_vm0, %v550_v14  ;;  %466 = vst.msk [vmem:[#allocation2 + $0x7] ss:$8 sm:$0x7] %vm1371_vm0, %v463_v15 }
  0xa5   : > { %v580_v19 = vsel %vm417_vm5, %v578_v8, %v579_v11  ;;  %v572_v20 = vsel %vm408_vm3, %v570_v9, %v571_v12  ;;  %545 = vst.msk [vmem:[#allocation2 + $0x30] ss:$8 sm:$0x7] %vm1371_vm0, %v542_v16  ;;  %v594_v21 = vpop.permute.xlu1 %593  ;;  %v586_v22 = vpop.permute.xlu0 %585  ;;  %v839_v59 = vsub.s32 1, %v1359_v4 }
  0xa6   : > { %583 = vst.msk [vmem:[#allocation2 + $0x34] ss:$8 sm:$0x7] %vm1371_vm0, %v580_v19  ;;  %575 = vst.msk [vmem:[#allocation2 + $0x33] ss:$8 sm:$0x7] %vm1371_vm0, %v572_v20 }
  0xa7   : > { %v595_v23 = vrot.slane %v594_v21, 1  ;;  %v587_v24 = vrot.slane %v586_v22, 1  ;;  %v840_v61 = vrot.slane %v831_v58, %v839_v59 }
  0xa9   : > { %v596_v25 = vsel %vm435_vm6, %v594_v21, %v595_v23  ;;  %v588_v26 = vsel %vm426_vm4, %v586_v22, %v587_v24  ;;  %v610_v27 = vpop.permute.xlu1 %609  ;;  %v602_v28 = vpop.permute.xlu0 %601 }
  0xaa   : > { %599 = vst.msk [vmem:[#allocation2 + $0x36] ss:$8 sm:$0x7] %vm1371_vm0, %v596_v25  ;;  %591 = vst.msk [vmem:[#allocation2 + $0x35] ss:$8 sm:$0x7] %vm1371_vm0, %v588_v26 }
  0xab   : > { %v611_v29 = vrot.slane %v610_v27, 1  ;;  %v603_v30 = vrot.slane %v602_v28, 1  ;;  %v639_v31 = vld [vmem:[#allocation2 + $0x20] sm:$0xff]  ;;  %v640_v32 = vld [vmem:[#allocation2 + $0x28] sm:$0xff]  ;;  %v638_v33 = vld [vmem:[#allocation2 + $0x18] sm:$0xff] }
  0xac   : > { %v636_v34 = vld [vmem:[#allocation2 + $0x8] sm:$0xff]  ;;  %v637_v35 = vld [vmem:[#allocation2 + $0x10] sm:$0xff]  ;;  %v635_v36 = vld [vmem:[#allocation2] sm:$0xff] }
  0xad   : > { %v612_v37 = vsel %vm453_vm7, %v610_v27, %v611_v29  ;;  %v604_v38 = vsel %vm444_vm8, %v602_v28, %v603_v30  ;;  %v1122_v39 = vpack.c.bf16 %v639_v31, %v636_v34  ;;  %v1130_v40 = vpack.c.bf16 %v640_v32, %v637_v35  ;;  %v626_v41 = vpop.permute.xlu1 %625  ;;  %v618_v42 = vpop.permute.xlu0 %617 }
  0xae   : > { %615 = vst.msk [vmem:[#allocation2 + $0x48] ss:$8 sm:$0x7] %vm1371_vm0, %v612_v37  ;;  %607 = vst.msk [vmem:[#allocation2 + $0x37] ss:$8 sm:$0x7] %vm1371_vm0, %v604_v38  ;;  %v1124_v43 = vpack.c.bf16 %v638_v33, %v635_v36 }
  0xaf   : > { %v627_v44 = vrot.slane %v626_v41, 1  ;;  %v619_v45 = vrot.slane %v618_v42, 1  ;;  %1123 = vmatprep.subr.bf16.mxu0 %v1122_v39  ;;  %1131 = vmatprep.subr.bf16.mxu1 %v1130_v40 }
  0xb0   : > { %1125 = vmatpush1.bf16.msra.mxu0 %v1124_v43  ;;  %1133 = vmatpush3.bf16.msra.mxu1 %v1130_v40 }
  0xb1   : > { %v628_v46 = vsel %vm471_vm9, %v626_v41, %v627_v44  ;;  %v620_v47 = vsel %vm462_vm10, %v618_v42, %v619_v45 }
  0xb2   : > { %631 = vst.msk [vmem:[#allocation2 + $0x4a] ss:$8 sm:$0x7] %vm1371_vm0, %v628_v46  ;;  %623 = vst.msk [vmem:[#allocation2 + $0x49] ss:$8 sm:$0x7] %vm1371_vm0, %v620_v47 }
  0xb5   : > { %v642_v48 = vld [vmem:[#allocation2 + $0x38] sm:$0xff]  ;;  %v643_v49 = vld [vmem:[#allocation2 + $0x40] sm:$0xff]  ;;  %v641_v50 = vld [vmem:[#allocation2 + $0x30] sm:$0xff] }
  0xb9   : > { %v645_v51 = vld [vmem:[#allocation2 + $0x50] sm:$0xff]  ;;  %v646_v52 = vld [vmem:[#allocation2 + $0x58] sm:$0xff]  ;;  %v644_v53 = vld [vmem:[#allocation2 + $0x48] sm:$0xff] }
  0xba   : > { %v1126_v54 = vpack.c.bf16 %v645_v51, %v642_v48  ;;  %v1134_v55 = vpack.c.bf16 %v646_v52, %v643_v49  ;;  %v1128_v56 = vpack.c.bf16 %v644_v53, %v641_v50 }
  0xbc   : > { %1127 = vmatprep.subr.bf16.mxu0 %v1126_v54  ;;  %1135 = vmatprep.subr.bf16.mxu1 %v1134_v55 }
  0xbd   : > { %1129 = vmatpush1.bf16.msra.mxu0 %v1128_v56  ;;  %1137 = vmatpush3.bf16.msra.mxu1 %v1134_v55 }
  0xc0   : > { %1091 = vmatmul.mubr.msk.f32.vlgmr.msra.gmra.mrb[0].mxu0 %vm647_vm2, %v1394_v18  ;;  %1120 = vmatmul.mubr.msk.f32.vlgmr.msra.gmra.mrb[0].mxu1 %vm647_vm2, %v634_v10  ;;  %v843_v18 = vsub.s32 2, %v1359_v4 }
  0xc1   : > { %724 = vmatprep.mubr.f32.mxu0 %v1283_v17  ;;  %v836_v17 = vrot.slane %v831_v58, %v835_v57 }
  0xc2   : > { %v844_v60 = vrot.slane %v831_v58, %v843_v18 }
  0xc4   : > { %1092 = vmatmul.mubr.msk.f32.gmra.mrb[2].mxu0 %vm647_vm2, %v634_v10 }
 0x193   : > { %v720_v62 = vpop.f32.mrb[0].mxu0  ;;  %v1121_v63 = vpop.f32.mrb[0].mxu1 }
 0x194   : > { %v848_v0 = vmul.f32 %v836_v17, %v720_v62  ;;  %v1104_v1 = vpack.c.bf16 %v1121_v63, %v1121_v63  ;;  %v722_v2 = vpop.f32.mrb[1].mxu0  ;;  %v797_v3 = vpop.f32.mrb[1].mxu1  ;;  %v853_v12 = vmul.f32 %v1121_v63, %v844_v60 }
 0x195   : > { %v1101_v5 = vpack.c.bf16 %v722_v2, %v720_v62  ;;  %v849_v6 = vmul.f32 %v840_v61, %v722_v2  ;;  %v1102_v7 = vpack.c.bf16 %v797_v3, %v797_v3  ;;  %v850_v4 = vmul.f32 %v844_v60, %v797_v3 }
 0x196   : > { %830 = vst.msk [vmem:[%s374_s10 + $0x14] sm:$0xf] %vm827_vm11, %v1104_v1  ;;  %v861_v21 = vsel %vm855_vm12, %v853_v12, 0.0 }
 0x197   : > { %826 = vst [vmem:[%s374_s10] sm:$0xff] %v1101_v5  ;;  %828 = vst.msk [vmem:[%s374_s10 + $0x8] sm:$0xf] %vm827_vm11, %v1102_v7  ;;  %v726_v8 = vpop.f32.mrb[2].mxu0  ;;  %v854_v9 = vadd.f32 %v849_v6, %v848_v0  ;;  %v856_v11 = vsel %vm855_vm12, %v850_v4, 0.0 }
 0x198   : > { %v851_v13 = vmul.f32 %v836_v17, %v726_v8  ;;  %v728_v14 = vpop.f32.mrb[3].mxu0 }
 0x199   : > { %v1103_v15 = vpack.c.bf16 %v728_v14, %v726_v8  ;;  %v852_v16 = vmul.f32 %v840_v61, %v728_v14  ;;  %v857_v19 = vadd.f32 %v856_v11, %v854_v9 }
 0x19b   : > { %829 = vst [vmem:[%s374_s10 + $0xc] sm:$0xff] %v1103_v15  ;;  %858 = vadd.xlane.f32.xlu0 %v857_v19  ;;  %v860_v20 = vadd.f32 %v852_v16, %v851_v13 }
 0x19d   : > { %v862_v22 = vadd.f32 %v861_v21, %v860_v20 }
 0x19f   : > { %863 = vadd.xlane.f32.xlu1 %v862_v22 }
 0x228   : > { %v859_v23 = vpop.xlane.xlu0 %858 }
 0x229   : > { %v865_v24 = vmul.f32 0.00390625, %v859_v23 }
 0x22b   : > { %v867_v25 = vsub.f32 %v720_v62, %v865_v24  ;;  %v868_v26 = vsub.f32 %v722_v2, %v865_v24  ;;  %v869_v27 = vsub.f32 %v797_v3, %v865_v24 }
 0x22c   : > { %v864_v28 = vpop.xlane.xlu1 %863 }
 0x22d   : > { %v866_v29 = vmul.f32 0.00390625, %v864_v28  ;;  %v873_v30 = vmul.f32 %v867_v25, %v836_v17  ;;  %v874_v31 = vmul.f32 %v868_v26, %v840_v61  ;;  %v875_v32 = vmul.f32 %v869_v27, %v844_v60 }
 0x22f   : > { %v870_v33 = vsub.f32 %v726_v8, %v866_v29  ;;  %v871_v34 = vsub.f32 %v728_v14, %v866_v29  ;;  %v879_v35 = vmul.f32 %v873_v30, %v873_v30  ;;  %v880_v36 = vmul.f32 %v874_v31, %v874_v31 }
 0x230   : > { %v881_v37 = vmul.f32 %v875_v32, %v875_v32  ;;  %v872_v38 = vsub.f32 %v1121_v63, %v866_v29 }
 0x231   : > { %v885_v39 = vadd.f32 %v880_v36, %v879_v35  ;;  %v876_v40 = vmul.f32 %v870_v33, %v836_v17  ;;  %v877_v41 = vmul.f32 %v871_v34, %v840_v61 }
 0x232   : > { %v886_v42 = vsel %vm855_vm12, %v881_v37, 0.0  ;;  %v878_v43 = vmul.f32 %v872_v38, %v844_v60 }
 0x233   : > { %v887_v44 = vadd.f32 %v886_v42, %v885_v39  ;;  %v882_v45 = vmul.f32 %v876_v40, %v876_v40  ;;  %v883_v46 = vmul.f32 %v877_v41, %v877_v41 }
 0x234   : > { %v884_v47 = vmul.f32 %v878_v43, %v878_v43 }
 0x235   : > { %888 = vadd.xlane.f32.xlu0 %v887_v44  ;;  %v890_v48 = vadd.f32 %v883_v46, %v882_v45 }
 0x236   : > { %v891_v49 = vsel %vm855_vm12, %v884_v47, 0.0 }
 0x237   : > { %v892_v50 = vadd.f32 %v891_v49, %v890_v48 }
 0x239   : > { %893 = vadd.xlane.f32.xlu0 %v892_v50 }
 0x2c2   : > { %v889_v51 = vpop.xlane.xlu0 %888 }
 0x2c3   : > { %v896_v52 = vsel %vm895_vm13, %v865_v24, %v889_v51 }
 0x2c4   : > { %899 = vst.msk [vmem:[%s383_s16] sm:$0xff] %vm898_vm14, %v896_v52 }
 0x2c6   : > { %v894_v53 = vpop.xlane.xlu0 %893 }
 0x2c7   : > { %v897_v54 = vsel %vm895_vm13, %v866_v29, %v894_v53 }
 0x2c8   : > { %900 = vst.msk [vmem:[%s383_s16 + $0x8] sm:$0xff] %vm898_vm14, %v897_v54 }
 0x2c9 PF: > { %s17_s25 = sadd.s32 1, %s1272_s25   ;;  %s1526_s21 = smov %s1264_s23 }
 0x2ca   : > { %p14_p10 = scmp.ge.s32.totalorder %s17_s25, 34   ;;  %s1527_s22 = smov %s1268_s24 }
 0x2cb   : > { %s1528_s23 = smov %s1531_s26  ;;  %s1529_s24 = smov %s1535_s27 }
 0x2cc   :  { %16 = sbr.rel (!%p14_p10) target bundleno = 3 (0x3), region = 114 }

// kernel: normalization_forward.4
= control target key start
LH: loop header
LB: loop body
LE: loop exit
PB: predicated region body
PF: predicated region fallthrough
CT: control target
= control target key end

     0   :  { %s2649_s21 = smov 0   ;;  %s2651_s22 = smov 0   ;;  %s3081_s0 = inlined_call_operand.vmem [shape: f32[1,324], index: 0, kind: input, shape index: {}]   ;;  %s3082_s1 = inlined_call_operand.vmem [shape: bf16[2,18,16,384], index: 1, kind: input, shape index: {}, may-alias: {1,2,3}]   ;;  %s3083_s2 = inlined_call_operand.vmem [shape: bf16[2,18,16,384], index: 2, kind: input, shape index: {}, may-alias: {1,2,3}]   ;;  %s3084_s3 = inlined_call_operand.vmem [shape: bf16[2,18,16,384], index: 3, kind: input, shape index: {}, may-alias: {1,2,3}]   ;;  %s3085_s4 = inlined_call_operand.vmem [shape: f32[16,432], index: 4, kind: input, shape index: {}]   ;;  %s3086_s5 = inlined_call_operand.vmem [shape: bf16[2,16,16,324], index: 5, kind: output, shape index: {0}]   ;;  %s3087_s6 = inlined_call_operand.vmem [shape: f32[2,16,16,2], index: 6, kind: output, shape index: {1}]  }
   0x1   :  { %s2653_s23 = smov 0   ;;  %s2655_s24 = smov 0  }
   0x2   :  { %s2657_s25 = smov 0  }
   0x3 LB: > { %s26_s26 = sadd.s32 1, %s2595_s23  ;;  %s29_s27 = sadd.s32 1, %s2599_s24  ;;  %s2603_s25 = sphi %s2657_s25, %s17_s25   ;;  %s2599_s24 = sphi %s2655_s24, %s3091_s24   ;;  %s2595_s23 = sphi %s2653_s23, %s3090_s23   ;;  %s2591_s22 = sphi %s2651_s22, %s3089_s22   ;;  %s2587_s21 = sphi %s2649_s21, %s3088_s21  }
   0x4   : > { %p27_p0 = scmp.ge.s32.totalorder %s26_s26, 16  ;;  %p1909_p1 = scmp.ge.s32.totalorder %s2603_s25, 1 }
   0x5   : > { %p277_p2 = scmp.lt.s32.totalorder %s2603_s25, 33 }
   0x6   : > { %s3093_s26 = smov (%p27_p0, %s26_s26), 0  ;;  %s3095_s27 = smov (!%p27_p0, %s29_s27), %s2599_s24 }
   0x7   : > { %p278_p3 = pnand %p1909_p1, %p277_p2  ;;  %p31_p4 = scmp.ge.s32.totalorder %s3095_s27, 2 }
   0x8   : > { %p344_p5 = scmp.lt.s32.totalorder (!%p278_p3), %s2591_s22, 1  ;;  %p346_p6 = scmp.lt.s32.totalorder (!%p278_p3), %s2587_s21, 17  ;;  %vm405_vm0 = vcmask (!%p278_p3), 556032   ;;  %v1141_v40 = vld [vmem:[%s3085_s4 + $0x8] sm:$0xff] (!%p278_p3)  ;;  %vm428_vm1 = vcmask (!%p278_p3), 1039360   ;;  %vm457_vm2 = vcmask (!%p278_p3), 1031168  }
   0x9   : > { %s3097_s27 = smov (%p31_p4, %s3095_s27), 0  ;;  %281 = sbr.rel (%p278_p3) target bundleno = 820 (0x334), region = 40 }
   0xa   : > { %s353_s12 = sadd.s32 (!%p278_p3), 1, %s2587_s21  ;;  %s364_s13 = sadd.s32 (!%p278_p3), 2, %s2587_s21  ;;  %1535 = vmatprep.mubr.f32.mxu1 (!%p278_p3), %v1141_v40  ;;  %1381 = vmatprep.mubr.f32.mxu0 (!%p278_p3), %v1141_v40  ;;  %vm486_vm3 = vcmask (!%p278_p3), 900096   ;;  %vm515_vm4 = vcmask (!%p278_p3), 891904   ;;  %vm544_vm5 = vcmask (!%p278_p3), 883712   ;;  %vm573_vm6 = vcmask (!%p278_p3), 752640  }
   0xb   : > { %p356_p7 = scmp.lt.s32.totalorder (!%p278_p3), %s353_s12, 17  ;;  %p367_p8 = scmp.lt.s32.totalorder (!%p278_p3), %s364_s13, 17  ;;  %vm602_vm7 = vcmask (!%p278_p3), 744448   ;;  %vm631_vm8 = vcmask (!%p278_p3), 736256   ;;  %vm1310_vm9 = vcmask (!%p278_p3), 392192   ;;  %vm1642_vm10 = vcmask (!%p278_p3), 551936  }
   0xc   : > { %s2605_s15 = smov (!%p278_p3), 127   ;;  %p377_p9 = scmp.lt.s32.totalorder (!%p278_p3), %s2587_s21, 15  ;;  %vm1709_vm11 = vcmask (!%p278_p3), 7168   ;;  %vm1712_vm12 = vcmask (!%p278_p3), 15360  }
  0x10   : > { %s3099_s22 = smov (!%p344_p5, %s2591_s22), 1  ;;  %s3101_s12 = smov (!%p356_p7, %s353_s12), 17 }
  0x11   : > { %s347_s28 = scalar_select %p346_p6, %s2587_s21, 17 }
  0x12   : > { %s2686_s29 = smul.u32 108, %s3099_s22  ;;  %s3103_s13 = smov (!%p367_p8, %s364_s13), 17 }
  0x13   : > { %s2146_s30 = smul.u32 6, %s347_s28  ;;  %s3105_s21 = smov (!%p377_p9, %s2587_s21), 15 }
  0x14   : > { %s2148_s14 = smul.u32 6, %s3101_s12  ;;  %s2608_s12 = smov 109  }
  0x15   : > { %s350_s7 = sadd.s32 %s2686_s29, %s2146_s30  ;;  %s2149_s16 = smul.u32 6, %s3103_s13 }
  0x16   : > { %s1910_s8 = sshll.u32 %s350_s7, 2  ;;  %s360_s17 = sadd.s32 %s2148_s14, %s2686_s29 }
  0x17   : > { %s352_s11 = scalar_lea.vmem %s3082_s1, %s1910_s8  ;;  %s1911_s18 = sshll.u32 %s360_s17, 2 }
  0x18   : > { %v393_v0 = vld [vmem:[%s352_s11] sm:$0xff]  ;;  %v394_v1 = vld [vmem:[%s352_s11 + $0x8] ss:$12 sps:$4 sm:$0xff]   ;;  %v395_v2 = vld [vmem:[%s352_s11 + $0xc] sm:$0xff]  ;;  %s371_s19 = sadd.s32 %s2149_s16, %s2686_s29  ;;  %s362_s30 = scalar_lea.vmem %s3083_s2, %s1911_s18 }
  0x19   : > { %v398_v3 = vunpack.c.h.bf16 %v393_v0  ;;  %v399_v4 = vunpack.c.l.bf16 %v394_v1  ;;  %v397_v5 = vunpack.c.l.bf16 %v393_v0  ;;  %v400_v6 = vunpack.c.l.bf16 %v395_v2  ;;  %s1912_s7 = sshll.u32 %s371_s19, 2  ;;  %s2606_s8 = smov 126   ;;  %v2715_v14 = vld [vmem:[%s362_s30] sm:$0xff]  ;;  %v649_v15 = vld [vmem:[%s362_s30 + $0x8] ss:$12 sps:$4 sm:$0xff]   ;;  %v2721_v18 = vld [vmem:[%s362_s30 + $0xc] sm:$0xff] }
  0x1a   : > { %v401_v7 = vunpack.c.h.bf16 %v395_v2  ;;  %v402_v8 = vunpack.c.h.bf16 %v394_v1  ;;  %v2561_v11 = vcombine.low %v393_v0, %v395_v2  ;;  %v2562_v12 = vcombine.high %v393_v0, %v395_v2  ;;  %s373_s29 = scalar_lea.vmem %s3084_s3, %s1912_s7  ;;  %s2607_s11 = smov 110  }
  0x1b   : > { %v2694_v9 = vpack.i.bf16 %v399_v4, %v398_v3  ;;  %v2696_v10 = vpack.i.bf16 %v400_v6, %v397_v5  ;;  %406 = vst.msk [vmem:[#allocation2 + $0x10] sm:$0xff] %vm405_vm0, %v399_v4  ;;  %v653_v16 = vunpack.c.h.bf16 %v2715_v14  ;;  %v654_v17 = vunpack.c.l.bf16 %v649_v15  ;;  %v894_v21 = vld [vmem:[%s373_s29] sm:$0xff]  ;;  %v895_v22 = vld [vmem:[%s373_s29 + $0x8] ss:$12 sps:$4 sm:$0xff]   ;;  %v896_v27 = vld [vmem:[%s373_s29 + $0xc] sm:$0xff]  ;;  %s2609_s13 = smov 108  }
  0x1c   : > { %409 = vst.msk [vmem:[#allocation2 + $0x28] sm:$0xff] %vm405_vm0, %v402_v8  ;;  %v2704_v13 = vpack.i.bf16 %v402_v8, %v401_v7  ;;  %1970 = vmatprep.subr.bf16.mxu0 %v2562_v12  ;;  %v657_v19 = vunpack.c.h.bf16 %v649_v15  ;;  %v652_v20 = vunpack.c.l.bf16 %v2715_v14  ;;  %v656_v23 = vunpack.c.h.bf16 %v2721_v18  ;;  %s2610_s14 = smov 92   ;;  %s2611_s16 = smov 91  }
  0x1d   : > { %2202 = vrot.lane.b32.xlu0 %v2694_v9, %s2605_s15  ;;  %2212 = vrot.lane.b32.xlu1 %v2696_v10, %s2605_s15  ;;  %v655_v24 = vunpack.c.l.bf16 %v2721_v18  ;;  %v899_v25 = vunpack.c.h.bf16 %v894_v21  ;;  %v900_v26 = vunpack.c.l.bf16 %v895_v22  ;;  %v902_v28 = vunpack.c.h.bf16 %v896_v27  ;;  %660 = vst.msk [vmem:[#allocation2 + $0x1c0] sm:$0xff] %vm405_vm0, %v654_v17  ;;  %s2612_s17 = smov 90   ;;  %s2151_s18 = smul.u32 96, %s3099_s22 }
  0x1e   : > { %1972 = vmatpush1.bf16.msra.mxu0 %v2561_v11  ;;  %v903_v29 = vunpack.c.h.bf16 %v895_v22  ;;  %v898_v30 = vunpack.c.l.bf16 %v894_v21  ;;  %663 = vst.msk [vmem:[#allocation2 + $0x1d8] sm:$0xff] %vm405_vm0, %v657_v19  ;;  %v901_v32 = vunpack.c.l.bf16 %v896_v27  ;;  %v2563_v35 = vcombine.high %v2715_v14, %v2721_v18  ;;  %s1914_s9 = sshll.u32 %s3105_s21, 1  ;;  %s1915_s10 = sshll.u32 %s3099_s22, 5 }
  0x1f   : > { %v2732_v31 = vpack.i.bf16 %v900_v26, %v899_v25  ;;  %905 = vst [vmem:[#allocation2 + $0x368] sm:$0xff] %v899_v25  ;;  %906 = vst.msk [vmem:[#allocation2 + $0x370] sm:$0xff] %vm405_vm0, %v900_v26  ;;  %v2564_v36 = vcombine.low %v2715_v14, %v2721_v18  ;;  %v2321_v37 = vpack.i.bf16 %v654_v17, %v653_v16  ;;  %s390_s29 = sadd.s32 %s1915_s10, %s1914_s9 }
  0x20   : > { %v2735_v33 = vpack.i.bf16 %v903_v29, %v902_v28  ;;  %908 = vst [vmem:[#allocation2 + $0x380] sm:$0xff] %v902_v28  ;;  %904 = vst [vmem:[#allocation2 + $0x360] sm:$0xff] %v898_v30  ;;  %v2738_v34 = vpack.i.bf16 %v901_v32, %v898_v30  ;;  %v2326_v38 = vpack.i.bf16 %v657_v19, %v656_v23 }
  0x21   : > { %2207 = vrot.lane.b32.xlu0 %v2704_v13, %s2605_s15  ;;  %2217 = vrot.lane.b32.xlu1 %v2694_v9, %s2606_s8  ;;  %909 = vst.msk [vmem:[#allocation2 + $0x388] sm:$0xff] %vm405_vm0, %v903_v29  ;;  %907 = vst [vmem:[#allocation2 + $0x378] sm:$0xff] %v901_v32  ;;  %v2331_v39 = vpack.i.bf16 %v655_v24, %v652_v20 }
  0x25   : > { %2222 = vrot.lane.b32.xlu0 %v2704_v13, %s2606_s8  ;;  %2227 = vrot.lane.b32.xlu1 %v2696_v10, %s2606_s8 }
  0x29   : > { %2232 = vrot.lane.b32.xlu0 %v2694_v9, %s2607_s11  ;;  %2237 = vrot.lane.b32.xlu1 %v2704_v13, %s2607_s11 }
  0x2d   : > { %2242 = vrot.lane.b32.xlu0 %v2696_v10, %s2607_s11  ;;  %2247 = vrot.lane.b32.xlu1 %v2694_v9, %s2608_s12 }
  0x31   : > { %2252 = vrot.lane.b32.xlu0 %v2704_v13, %s2608_s12  ;;  %2257 = vrot.lane.b32.xlu1 %v2696_v10, %s2608_s12 }
  0x35   : > { %2262 = vrot.lane.b32.xlu0 %v2694_v9, %s2609_s13  ;;  %2267 = vrot.lane.b32.xlu1 %v2704_v13, %s2609_s13 }
  0x39   : > { %2272 = vrot.lane.b32.xlu0 %v2696_v10, %s2609_s13  ;;  %2277 = vrot.lane.b32.xlu1 %v2694_v9, %s2610_s14 }
  0x3d   : > { %2282 = vrot.lane.b32.xlu0 %v2704_v13, %s2610_s14  ;;  %2287 = vrot.lane.b32.xlu1 %v2696_v10, %s2610_s14 }
  0x41   : > { %2292 = vrot.lane.b32.xlu0 %v2694_v9, %s2611_s16  ;;  %2297 = vrot.lane.b32.xlu1 %v2704_v13, %s2611_s16 }
  0x45   : > { %2302 = vrot.lane.b32.xlu0 %v2696_v10, %s2611_s16  ;;  %2307 = vrot.lane.b32.xlu1 %v2694_v9, %s2612_s17 }
  0x49   : > { %2312 = vrot.lane.b32.xlu0 %v2704_v13, %s2612_s17  ;;  %2317 = vrot.lane.b32.xlu1 %v2696_v10, %s2612_s17 }
  0x4d   : > { %2322 = vrot.lane.b32.xlu0 %v2321_v37, %s2605_s15  ;;  %2327 = vrot.lane.b32.xlu1 %v2326_v38, %s2605_s15 }
  0x51   : > { %2332 = vrot.lane.b32.xlu0 %v2331_v39, %s2605_s15  ;;  %2337 = vrot.lane.b32.xlu1 %v2321_v37, %s2606_s8 }
  0x55   : > { %2342 = vrot.lane.b32.xlu0 %v2326_v38, %s2606_s8  ;;  %2347 = vrot.lane.b32.xlu1 %v2331_v39, %s2606_s8 }
  0x59   : > { %2352 = vrot.lane.b32.xlu0 %v2321_v37, %s2607_s11  ;;  %2357 = vrot.lane.b32.xlu1 %v2326_v38, %s2607_s11 }
  0x5d   : > { %2362 = vrot.lane.b32.xlu0 %v2331_v39, %s2607_s11  ;;  %2367 = vrot.lane.b32.xlu1 %v2321_v37, %s2608_s12 }
  0x61   : > { %2372 = vrot.lane.b32.xlu0 %v2326_v38, %s2608_s12  ;;  %2377 = vrot.lane.b32.xlu1 %v2331_v39, %s2608_s12 }
  0x65   : > { %2382 = vrot.lane.b32.xlu0 %v2321_v37, %s2609_s13  ;;  %2387 = vrot.lane.b32.xlu1 %v2326_v38, %s2609_s13 }
  0x69   : > { %2392 = vrot.lane.b32.xlu0 %v2331_v39, %s2609_s13  ;;  %2397 = vrot.lane.b32.xlu1 %v2321_v37, %s2610_s14 }
  0x6d   : > { %2402 = vrot.lane.b32.xlu0 %v2326_v38, %s2610_s14  ;;  %2407 = vrot.lane.b32.xlu1 %v2331_v39, %s2610_s14 }
  0x71   : > { %2412 = vrot.lane.b32.xlu0 %v2321_v37, %s2611_s16  ;;  %2417 = vrot.lane.b32.xlu1 %v2326_v38, %s2611_s16 }
  0x75   : > { %2422 = vrot.lane.b32.xlu0 %v2331_v39, %s2611_s16  ;;  %2427 = vrot.lane.b32.xlu1 %v2321_v37, %s2612_s17 }
  0x79   : > { %2432 = vrot.lane.b32.xlu0 %v2326_v38, %s2612_s17  ;;  %2437 = vrot.lane.b32.xlu1 %v2331_v39, %s2612_s17 }
  0x7d   : > { %2442 = vrot.lane.b32.xlu0 %v2732_v31, %s2605_s15  ;;  %2447 = vrot.lane.b32.xlu1 %v2735_v33, %s2605_s15 }
  0x81   : > { %2452 = vrot.lane.b32.xlu0 %v2738_v34, %s2605_s15  ;;  %2457 = vrot.lane.b32.xlu1 %v2732_v31, %s2606_s8 }
  0x85   : > { %2462 = vrot.lane.b32.xlu0 %v2735_v33, %s2606_s8  ;;  %2467 = vrot.lane.b32.xlu1 %v2738_v34, %s2606_s8 }
  0x89   : > { %2472 = vrot.lane.b32.xlu0 %v2732_v31, %s2607_s11  ;;  %2477 = vrot.lane.b32.xlu1 %v2735_v33, %s2607_s11 }
  0x8d   : > { %2482 = vrot.lane.b32.xlu0 %v2738_v34, %s2607_s11  ;;  %2487 = vrot.lane.b32.xlu1 %v2732_v31, %s2608_s12  ;;  %s1916_s11 = sshll.u32 %s390_s29, 3 }
  0x8f   : > { %v2203_v41 = vpop.permute.xlu0 %2202  ;;  %v2213_v42 = vpop.permute.xlu1 %2212 }
  0x90   : > { %v2205_v43 = vunpack.i.h.bf16 %v2203_v41  ;;  %v2204_v44 = vunpack.i.l.bf16 %v2203_v41  ;;  %v2214_v45 = vunpack.i.l.bf16 %v2213_v42  ;;  %v2215_v47 = vunpack.i.h.bf16 %v2213_v42 }
  0x91   : > { %2492 = vrot.lane.b32.xlu0 %v2735_v33, %s2608_s12  ;;  %2497 = vrot.lane.b32.xlu1 %v2738_v34, %s2608_s12 }
  0x92   : > { %441 = vst.msk [vmem:[#allocation2 + $0x40] sm:$0xff] %vm405_vm0, %v2205_v43  ;;  %v430_v46 = vsel %vm428_vm1, %v2204_v44, %v2205_v43  ;;  %v429_v48 = vsel %vm428_vm1, %v2214_v45, %v2204_v44 }
  0x93   : > { %v2208_v49 = vpop.permute.xlu0 %2207  ;;  %v2218_v50 = vpop.permute.xlu1 %2217 }
  0x94   : > { %v2210_v51 = vunpack.i.h.bf16 %v2208_v49  ;;  %v2209_v52 = vunpack.i.l.bf16 %v2208_v49  ;;  %v2220_v53 = vunpack.i.h.bf16 %v2218_v50  ;;  %v2219_v54 = vunpack.i.l.bf16 %v2218_v50 }
  0x95   : > { %2502 = vrot.lane.b32.xlu0 %v2732_v31, %s2609_s13  ;;  %2507 = vrot.lane.b32.xlu1 %v2735_v33, %s2609_s13 }
  0x96   : > { %444 = vst.msk [vmem:[#allocation2 + $0x58] sm:$0xff] %vm405_vm0, %v2210_v51  ;;  %v431_v55 = vsel %vm428_vm1, %v2215_v47, %v2209_v52  ;;  %v432_v56 = vsel %vm428_vm1, %v2209_v52, %v2210_v51  ;;  %470 = vst.msk [vmem:[#allocation2 + $0x70] sm:$0xff] %vm405_vm0, %v2220_v53  ;;  %v459_v57 = vsel %vm457_vm2, %v2219_v54, %v2220_v53 }
  0x97   : > { %v2223_v58 = vpop.permute.xlu0 %2222  ;;  %v2228_v59 = vpop.permute.xlu1 %2227  ;;  %v1973_v60 = vpack.c.bf16 %v432_v56, %v430_v46  ;;  %v1975_v61 = vpack.c.bf16 %v431_v55, %v429_v48 }
  0x98   : > { %v2225_v62 = vunpack.i.h.bf16 %v2223_v58  ;;  %v2224_v63 = vunpack.i.l.bf16 %v2223_v58  ;;  %v2230_v0 = vunpack.i.h.bf16 %v2228_v59  ;;  %v2229_v1 = vunpack.i.l.bf16 %v2228_v59 }
  0x99   : > { %2512 = vrot.lane.b32.xlu0 %v2738_v34, %s2609_s13  ;;  %2517 = vrot.lane.b32.xlu1 %v2732_v31, %s2610_s14 }
  0x9a   : > { %473 = vst.msk [vmem:[#allocation2 + $0x88] sm:$0xff] %vm405_vm0, %v2225_v62  ;;  %v461_v2 = vsel %vm457_vm2, %v2224_v63, %v2225_v62  ;;  %v460_v3 = vsel %vm457_vm2, %v2230_v0, %v2224_v63  ;;  %v458_v4 = vsel %vm457_vm2, %v2229_v1, %v2219_v54  ;;  %1974 = vmatprep.subr.bf16.mxu0 %v1973_v60 }
  0x9b   : > { %v2233_v5 = vpop.permute.xlu0 %2232  ;;  %v2238_v6 = vpop.permute.xlu1 %2237  ;;  %1976 = vmatpush1.bf16.msra.mxu0 %v1975_v61  ;;  %v1977_v7 = vpack.c.bf16 %v461_v2, %v459_v57  ;;  %v1979_v8 = vpack.c.bf16 %v460_v3, %v458_v4 }
  0x9c   : > { %v2235_v9 = vunpack.i.h.bf16 %v2233_v5  ;;  %v2234_v10 = vunpack.i.l.bf16 %v2233_v5  ;;  %v2240_v11 = vunpack.i.h.bf16 %v2238_v6  ;;  %v2239_v12 = vunpack.i.l.bf16 %v2238_v6 }
  0x9d   : > { %2522 = vrot.lane.b32.xlu0 %v2735_v33, %s2610_s14  ;;  %2527 = vrot.lane.b32.xlu1 %v2738_v34, %s2610_s14  ;;  %s392_s14 = scalar_lea.vmem %s3087_s6, %s1916_s11 }
  0x9e   : > { %499 = vst.msk [vmem:[#allocation2 + $0xa0] sm:$0xff] %vm405_vm0, %v2235_v9  ;;  %v488_v13 = vsel %vm486_vm3, %v2234_v10, %v2235_v9  ;;  %502 = vst.msk [vmem:[#allocation2 + $0xb8] sm:$0xff] %vm405_vm0, %v2240_v11  ;;  %v490_v15 = vsel %vm486_vm3, %v2239_v12, %v2240_v11  ;;  %1978 = vmatprep.subr.bf16.mxu0 %v1977_v7 }
  0x9f   : > { %v2243_v16 = vpop.permute.xlu0 %2242  ;;  %v2248_v17 = vpop.permute.xlu1 %2247  ;;  %1980 = vmatpush1.bf16.msra.mxu0 %v1979_v8  ;;  %v1981_v19 = vpack.c.bf16 %v490_v15, %v488_v13 }
  0xa0   : > { %v2245_v20 = vunpack.i.h.bf16 %v2243_v16  ;;  %v2244_v21 = vunpack.i.l.bf16 %v2243_v16  ;;  %v2250_v22 = vunpack.i.h.bf16 %v2248_v17  ;;  %v2249_v23 = vunpack.i.l.bf16 %v2248_v17 }
  0xa1   : > { %2532 = vrot.lane.b32.xlu0 %v2732_v31, %s2611_s16  ;;  %2537 = vrot.lane.b32.xlu1 %v2735_v33, %s2611_s16 }
  0xa2   : > { %v487_v24 = vsel %vm486_vm3, %v2244_v21, %v2234_v10  ;;  %v489_v25 = vsel %vm486_vm3, %v2245_v20, %v2239_v12  ;;  %528 = vst.msk [vmem:[#allocation2 + $0xd0] sm:$0xff] %vm405_vm0, %v2250_v22  ;;  %v517_v26 = vsel %vm515_vm4, %v2249_v23, %v2250_v22  ;;  %1982 = vmatprep.subr.bf16.mxu0 %v1981_v19 }
  0xa3   : > { %v2253_v27 = vpop.permute.xlu0 %2252  ;;  %v2258_v28 = vpop.permute.xlu1 %2257  ;;  %v1983_v29 = vpack.c.bf16 %v489_v25, %v487_v24 }
  0xa4   : > { %v2255_v30 = vunpack.i.h.bf16 %v2253_v27  ;;  %v2254_v32 = vunpack.i.l.bf16 %v2253_v27  ;;  %v2260_v37 = vunpack.i.h.bf16 %v2258_v28  ;;  %v2259_v38 = vunpack.i.l.bf16 %v2258_v28 }
  0xa5   : > { %2542 = vrot.lane.b32.xlu0 %v2738_v34, %s2611_s16  ;;  %2547 = vrot.lane.b32.xlu1 %v2732_v31, %s2612_s17 }
  0xa6   : > { %531 = vst.msk [vmem:[#allocation2 + $0xe8] sm:$0xff] %vm405_vm0, %v2255_v30  ;;  %v519_v39 = vsel %vm515_vm4, %v2254_v32, %v2255_v30  ;;  %v518_v40 = vsel %vm515_vm4, %v2260_v37, %v2254_v32  ;;  %v516_v41 = vsel %vm515_vm4, %v2259_v38, %v2249_v23  ;;  %1984 = vmatpush1.bf16.msra.mxu0 %v1983_v29 }
  0xa7   : > { %v2263_v42 = vpop.permute.xlu0 %2262  ;;  %v2268_v43 = vpop.permute.xlu1 %2267  ;;  %v1985_v44 = vpack.c.bf16 %v519_v39, %v517_v26  ;;  %v1987_v45 = vpack.c.bf16 %v518_v40, %v516_v41 }
  0xa8   : > { %v2265_v46 = vunpack.i.h.bf16 %v2263_v42  ;;  %v2264_v47 = vunpack.i.l.bf16 %v2263_v42  ;;  %v2270_v48 = vunpack.i.h.bf16 %v2268_v43  ;;  %v2269_v49 = vunpack.i.l.bf16 %v2268_v43 }
  0xa9   : > { %2552 = vrot.lane.b32.xlu0 %v2735_v33, %s2612_s17  ;;  %2557 = vrot.lane.b32.xlu1 %v2738_v34, %s2612_s17  ;;  %s2150_s17 = smul.u32 6, %s3105_s21 }
  0xaa   : > { %557 = vst.msk [vmem:[#allocation2 + $0x100] sm:$0xff] %vm405_vm0, %v2265_v46  ;;  %v546_v31 = vsel %vm544_vm5, %v2264_v47, %v2265_v46  ;;  %560 = vst.msk [vmem:[#allocation2 + $0x118] sm:$0xff] %vm405_vm0, %v2270_v48  ;;  %v548_v50 = vsel %vm544_vm5, %v2269_v49, %v2270_v48  ;;  %1986 = vmatprep.subr.bf16.mxu0 %v1985_v44 }
  0xab   : > { %v2273_v51 = vpop.permute.xlu0 %2272  ;;  %v2278_v52 = vpop.permute.xlu1 %2277  ;;  %1988 = vmatpush1.bf16.msra.mxu0 %v1987_v45  ;;  %v1989_v53 = vpack.c.bf16 %v548_v50, %v546_v31  ;;  %v1150_v31 = vld [vmem:[#allocation2 + $0x10] sm:$0xff]  ;;  %s381_s20 = sadd.s32 %s2151_s18, %s2150_s17 }
  0xac   : > { %v2275_v54 = vunpack.i.h.bf16 %v2273_v51  ;;  %v2274_v55 = vunpack.i.l.bf16 %v2273_v51  ;;  %v2280_v33 = vunpack.i.h.bf16 %v2278_v52  ;;  %v2279_v56 = vunpack.i.l.bf16 %v2278_v52  ;;  %v1153_v52 = vld [vmem:[#allocation2 + $0x28] sm:$0xff]  ;;  %s1913_s28 = sshll.u32 %s381_s20, 2 }
  0xad   : > { %1990 = vmatprep.subr.bf16.mxu0 %v1989_v53  ;;  %v1204_v53 = vld [vmem:[#allocation2 + $0x1c0] sm:$0xff]  ;;  %s383_s8 = scalar_lea.vmem %s3086_s5, %s1913_s28 }
  0xae   : > { %v545_v34 = vsel %vm544_vm5, %v2274_v55, %v2264_v47  ;;  %v547_v57 = vsel %vm544_vm5, %v2275_v54, %v2269_v49  ;;  %586 = vst.msk [vmem:[#allocation2 + $0x130] sm:$0xff] %vm405_vm0, %v2280_v33  ;;  %v575_v58 = vsel %vm573_vm6, %v2279_v56, %v2280_v33  ;;  %v1207_v54 = vld [vmem:[#allocation2 + $0x1d8] sm:$0xff] }
  0xaf   : > { %v2283_v59 = vpop.permute.xlu0 %2282  ;;  %v2288_v60 = vpop.permute.xlu1 %2287  ;;  %v1991_v61 = vpack.c.bf16 %v547_v57, %v545_v34 }
  0xb0   : > { %v2285_v62 = vunpack.i.h.bf16 %v2283_v59  ;;  %v2284_v63 = vunpack.i.l.bf16 %v2283_v59  ;;  %v2290_v0 = vunpack.i.h.bf16 %v2288_v60  ;;  %v2289_v1 = vunpack.i.l.bf16 %v2288_v60 }
  0xb1   : > { %1992 = vmatpush1.bf16.msra.mxu0 %v1991_v61  ;;  %v2079_v61 = vpack.c.bf16 %v1153_v52, %v1150_v31 }
  0xb2   : > { %589 = vst.msk [vmem:[#allocation2 + $0x148] sm:$0xff] %vm405_vm0, %v2285_v62  ;;  %v577_v2 = vsel %vm573_vm6, %v2284_v63, %v2285_v62  ;;  %v576_v3 = vsel %vm573_vm6, %v2290_v0, %v2284_v63  ;;  %v574_v4 = vsel %vm573_vm6, %v2289_v1, %v2279_v56  ;;  %v2081_v62 = vpack.c.bf16 %v1207_v54, %v1204_v53 }
  0xb3   : > { %v2293_v5 = vpop.permute.xlu0 %2292  ;;  %v2298_v6 = vpop.permute.xlu1 %2297  ;;  %v1993_v7 = vpack.c.bf16 %v577_v2, %v575_v58  ;;  %v1995_v8 = vpack.c.bf16 %v576_v3, %v574_v4 }
  0xb4   : > { %v2295_v9 = vunpack.i.h.bf16 %v2293_v5  ;;  %v2294_v10 = vunpack.i.l.bf16 %v2293_v5  ;;  %v2300_v11 = vunpack.i.h.bf16 %v2298_v6  ;;  %v2299_v12 = vunpack.i.l.bf16 %v2298_v6 }
  0xb5   : > { %1994 = vmatprep.subr.bf16.mxu0 %v1993_v7 }
  0xb6   : > { %615 = vst.msk [vmem:[#allocation2 + $0x160] sm:$0xff] %vm405_vm0, %v2295_v9  ;;  %v604_v13 = vsel %vm602_vm7, %v2294_v10, %v2295_v9  ;;  %618 = vst.msk [vmem:[#allocation2 + $0x178] sm:$0xff] %vm405_vm0, %v2300_v11  ;;  %v606_v15 = vsel %vm602_vm7, %v2299_v12, %v2300_v11  ;;  %1996 = vmatpush1.bf16.msra.mxu0 %v1995_v8 }
  0xb7   : > { %v2303_v16 = vpop.permute.xlu0 %2302  ;;  %v2308_v17 = vpop.permute.xlu1 %2307  ;;  %v1997_v19 = vpack.c.bf16 %v606_v15, %v604_v13 }
  0xb8   : > { %v2305_v20 = vunpack.i.h.bf16 %v2303_v16  ;;  %v2304_v21 = vunpack.i.l.bf16 %v2303_v16  ;;  %v2310_v22 = vunpack.i.h.bf16 %v2308_v17  ;;  %v2309_v23 = vunpack.i.l.bf16 %v2308_v17 }
  0xb9   : > { %1998 = vmatprep.subr.bf16.mxu0 %v1997_v19 }
  0xba   : > { %v603_v24 = vsel %vm602_vm7, %v2304_v21, %v2294_v10  ;;  %v605_v25 = vsel %vm602_vm7, %v2305_v20, %v2299_v12  ;;  %644 = vst.msk [vmem:[#allocation2 + $0x190] sm:$0xff] %vm405_vm0, %v2310_v22  ;;  %v633_v26 = vsel %vm631_vm8, %v2309_v23, %v2310_v22  ;;  %v1159_v10 = vld [vmem:[#allocation2 + $0x58] sm:$0xff] }
  0xbb   : > { %v2313_v27 = vpop.permute.xlu0 %2312  ;;  %v2318_v28 = vpop.permute.xlu1 %2317  ;;  %v1999_v29 = vpack.c.bf16 %v605_v25, %v603_v24 }
  0xbc   : > { %v2315_v30 = vunpack.i.h.bf16 %v2313_v27  ;;  %v2314_v32 = vunpack.i.l.bf16 %v2313_v27  ;;  %v2320_v37 = vunpack.i.h.bf16 %v2318_v28  ;;  %v2319_v38 = vunpack.i.l.bf16 %v2318_v28  ;;  %v1165_v27 = vld [vmem:[#allocation2 + $0x88] sm:$0xff] }
  0xbd   : > { %2000 = vmatpush1.bf16.msra.mxu0 %v1999_v29 }
  0xbe   : > { %647 = vst.msk [vmem:[#allocation2 + $0x1a8] sm:$0xff] %vm405_vm0, %v2315_v30  ;;  %v635_v39 = vsel %vm631_vm8, %v2314_v32, %v2315_v30  ;;  %v634_v40 = vsel %vm631_vm8, %v2320_v37, %v2314_v32  ;;  %v632_v41 = vsel %vm631_vm8, %v2319_v38, %v2309_v23 }
  0xbf   : > { %v2323_v42 = vpop.permute.xlu0 %2322  ;;  %v2328_v43 = vpop.permute.xlu1 %2327  ;;  %v2001_v44 = vpack.c.bf16 %v635_v39, %v633_v26  ;;  %v2003_v45 = vpack.c.bf16 %v634_v40, %v632_v41  ;;  %v1162_v26 = vld [vmem:[#allocation2 + $0x70] sm:$0xff] }
  0xc0   : > { %v2325_v46 = vunpack.i.h.bf16 %v2323_v42  ;;  %v2324_v47 = vunpack.i.l.bf16 %v2323_v42  ;;  %v2330_v48 = vunpack.i.h.bf16 %v2328_v43  ;;  %v2329_v49 = vunpack.i.l.bf16 %v2328_v43 }
  0xc1   : > { %2002 = vmatprep.subr.bf16.mxu0 %v2001_v44  ;;  %v1198_v56 = vld [vmem:[#allocation2 + $0x190] sm:$0xff]  ;;  %v2087_v37 = vpack.c.bf16 %v1165_v27, %v1162_v26  ;;  %v1168_v44 = vld [vmem:[#allocation2 + $0xa0] sm:$0xff] }
  0xc2   : > { %694 = vst.msk [vmem:[#allocation2 + $0x1f0] sm:$0xff] %vm405_vm0, %v2325_v46  ;;  %v683_v50 = vsel %vm428_vm1, %v2324_v47, %v2325_v46  ;;  %697 = vst.msk [vmem:[#allocation2 + $0x208] sm:$0xff] %vm405_vm0, %v2330_v48  ;;  %v685_v51 = vsel %vm428_vm1, %v2329_v49, %v2330_v48  ;;  %2004 = vmatpush1.bf16.msra.mxu0 %v2003_v45  ;;  %v1171_v45 = vld [vmem:[#allocation2 + $0xb8] sm:$0xff] }
  0xc3   : > { %v2333_v55 = vpop.permute.xlu0 %2332  ;;  %v2338_v33 = vpop.permute.xlu1 %2337  ;;  %2006 = vmatprep.subr.bf16.mxu0 %v2563_v35  ;;  %v2009_v63 = vpack.c.bf16 %v685_v51, %v683_v50  ;;  %v2091_v52 = vpack.c.bf16 %v1171_v45, %v1168_v44 }
  0xc4   : > { %v2335_v34 = vunpack.i.h.bf16 %v2333_v55  ;;  %v2334_v57 = vunpack.i.l.bf16 %v2333_v55  ;;  %v2340_v58 = vunpack.i.h.bf16 %v2338_v33  ;;  %v2339_v59 = vunpack.i.l.bf16 %v2338_v33 }
  0xc5   : > { %v1201_v60 = vld [vmem:[#allocation2 + $0x1a8] sm:$0xff] }
  0xc6   : > { %v682_v0 = vsel %vm428_vm1, %v2334_v57, %v2324_v47  ;;  %v684_v1 = vsel %vm428_vm1, %v2335_v34, %v2329_v49  ;;  %722 = vst.msk [vmem:[#allocation2 + $0x220] sm:$0xff] %vm405_vm0, %v2340_v58  ;;  %v711_v2 = vsel %vm457_vm2, %v2339_v59, %v2340_v58  ;;  %v2077_v3 = vpack.c.bf16 %v1201_v60, %v1198_v56  ;;  %v1174_v34 = vld [vmem:[#allocation2 + $0xd0] sm:$0xff]  ;;  %v1177_v57 = vld [vmem:[#allocation2 + $0xe8] sm:$0xff] }
  0xc7   : > { %2008 = vmatpush1.bf16.msra.mxu0 %v2564_v36  ;;  %v2343_v35 = vpop.permute.xlu0 %2342  ;;  %v2348_v4 = vpop.permute.xlu1 %2347  ;;  %v2011_v5 = vpack.c.bf16 %v684_v1, %v682_v0  ;;  %v1156_v36 = vld [vmem:[#allocation2 + $0x40] sm:$0xff] }
  0xc8   : > { %2010 = vmatprep.subr.bf16.mxu0 %v2009_v63  ;;  %v2345_v6 = vunpack.i.h.bf16 %v2343_v35  ;;  %v2344_v7 = vunpack.i.l.bf16 %v2343_v35  ;;  %v2350_v8 = vunpack.i.h.bf16 %v2348_v4  ;;  %v2349_v9 = vunpack.i.l.bf16 %v2348_v4  ;;  %2078 = vmatprep.subr.bf16.mxu1 %v2077_v3 }
  0xc9   : > { %2080 = vmatpush3.bf16.msra.mxu1 %v2079_v61  ;;  %v1210_v11 = vld [vmem:[#allocation2 + $0x1f0] sm:$0xff]  ;;  %v1213_v12 = vld [vmem:[#allocation2 + $0x208] sm:$0xff]  ;;  %v2083_v17 = vpack.c.bf16 %v1159_v10, %v1156_v36 }
  0xca   : > { %725 = vst.msk [vmem:[#allocation2 + $0x238] sm:$0xff] %vm405_vm0, %v2345_v6  ;;  %v713_v13 = vsel %vm457_vm2, %v2344_v7, %v2345_v6  ;;  %v712_v14 = vsel %vm457_vm2, %v2350_v8, %v2344_v7  ;;  %v710_v18 = vsel %vm457_vm2, %v2349_v9, %v2339_v59  ;;  %2082 = vmatprep.subr.bf16.mxu1 %v2081_v62 }
  0xcb   : > { %v2353_v15 = vpop.permute.xlu0 %2352  ;;  %v2358_v16 = vpop.permute.xlu1 %2357  ;;  %v2085_v19 = vpack.c.bf16 %v1213_v12, %v1210_v11  ;;  %2012 = vmatpush1.bf16.msra.mxu0 %v2011_v5  ;;  %v2013_v20 = vpack.c.bf16 %v713_v13, %v711_v2  ;;  %v2015_v21 = vpack.c.bf16 %v712_v14, %v710_v18  ;;  %v2095_v2 = vpack.c.bf16 %v1177_v57, %v1174_v34 }
  0xcc   : > { %v2355_v22 = vunpack.i.h.bf16 %v2353_v15  ;;  %v2354_v23 = vunpack.i.l.bf16 %v2353_v15  ;;  %v2360_v24 = vunpack.i.h.bf16 %v2358_v16  ;;  %v2359_v25 = vunpack.i.l.bf16 %v2358_v16  ;;  %v1180_v16 = vld [vmem:[#allocation2 + $0x100] sm:$0xff] }
  0xcd   : > { %2084 = vmatpush3.bf16.msra.mxu1 %v2083_v17  ;;  %2014 = vmatprep.subr.bf16.mxu0 %v2013_v20  ;;  %v1216_v38 = vld [vmem:[#allocation2 + $0x220] sm:$0xff]  ;;  %v1183_v17 = vld [vmem:[#allocation2 + $0x118] sm:$0xff] }
  0xce   : > { %750 = vst.msk [vmem:[#allocation2 + $0x250] sm:$0xff] %vm405_vm0, %v2355_v22  ;;  %v739_v28 = vsel %vm486_vm3, %v2354_v23, %v2355_v22  ;;  %753 = vst.msk [vmem:[#allocation2 + $0x268] sm:$0xff] %vm405_vm0, %v2360_v24  ;;  %v741_v29 = vsel %vm486_vm3, %v2359_v25, %v2360_v24  ;;  %2086 = vmatprep.subr.bf16.mxu1 %v2085_v19  ;;  %v2099_v26 = vpack.c.bf16 %v1183_v17, %v1180_v16  ;;  %v1143_v16 = vld [vmem:[%s3085_s4 + $0x18] sm:$0xff] }
  0xcf   : > { %v2363_v30 = vpop.permute.xlu0 %2362  ;;  %v2368_v32 = vpop.permute.xlu1 %2367  ;;  %2016 = vmatpush1.bf16.msra.mxu0 %v2015_v21  ;;  %v2017_v39 = vpack.c.bf16 %v741_v29, %v739_v28 }
  0xd0   : > { %v2365_v40 = vunpack.i.h.bf16 %v2363_v30  ;;  %v2364_v41 = vunpack.i.l.bf16 %v2363_v30  ;;  %v2370_v42 = vunpack.i.h.bf16 %v2368_v32  ;;  %v2369_v43 = vunpack.i.l.bf16 %v2368_v32 }
  0xd1   : > { %2088 = vmatpush3.bf16.msra.mxu1 %v2087_v37  ;;  %v1219_v46 = vld [vmem:[#allocation2 + $0x238] sm:$0xff]  ;;  %2018 = vmatprep.subr.bf16.mxu0 %v2017_v39  ;;  %v1186_v37 = vld [vmem:[#allocation2 + $0x130] sm:$0xff] }
  0xd2   : > { %v738_v47 = vsel %vm486_vm3, %v2364_v41, %v2354_v23  ;;  %v740_v48 = vsel %vm486_vm3, %v2365_v40, %v2359_v25  ;;  %778 = vst.msk [vmem:[#allocation2 + $0x280] sm:$0xff] %vm405_vm0, %v2370_v42  ;;  %v767_v49 = vsel %vm515_vm4, %v2369_v43, %v2370_v42  ;;  %v2089_v31 = vpack.c.bf16 %v1219_v46, %v1216_v38  ;;  %v1189_v38 = vld [vmem:[#allocation2 + $0x148] sm:$0xff] }
  0xd3   : > { %v2373_v50 = vpop.permute.xlu0 %2372  ;;  %v2378_v51 = vpop.permute.xlu1 %2377  ;;  %v2019_v53 = vpack.c.bf16 %v740_v48, %v738_v47  ;;  %v2103_v47 = vpack.c.bf16 %v1189_v38, %v1186_v37 }
  0xd4   : > { %v2375_v54 = vunpack.i.h.bf16 %v2373_v50  ;;  %v2374_v55 = vunpack.i.l.bf16 %v2373_v50  ;;  %v2380_v33 = vunpack.i.h.bf16 %v2378_v51  ;;  %v2379_v56 = vunpack.i.l.bf16 %v2378_v51  ;;  %2090 = vmatprep.subr.bf16.mxu1 %v2089_v31 }
  0xd5   : > { %2092 = vmatpush3.bf16.msra.mxu1 %v2091_v52  ;;  %v1222_v58 = vld [vmem:[#allocation2 + $0x250] sm:$0xff]  ;;  %v1225_v59 = vld [vmem:[#allocation2 + $0x268] sm:$0xff]  ;;  %2020 = vmatpush1.bf16.msra.mxu0 %v2019_v53 }
  0xd6   : > { %781 = vst.msk [vmem:[#allocation2 + $0x298] sm:$0xff] %vm405_vm0, %v2375_v54  ;;  %v769_v60 = vsel %vm515_vm4, %v2374_v55, %v2375_v54  ;;  %v768_v61 = vsel %vm515_vm4, %v2380_v33, %v2374_v55  ;;  %v766_v62 = vsel %vm515_vm4, %v2379_v56, %v2369_v43  ;;  %v2093_v63 = vpack.c.bf16 %v1225_v59, %v1222_v58  ;;  %v1140_v55 = vld [vmem:[%s3085_s4] sm:$0xff]  ;;  %v2955_v58 = vld [vmem:[%s3085_s4 + $0x28] sm:$0xff] }
  0xd7   : > { %v2383_v0 = vpop.permute.xlu0 %2382  ;;  %v2388_v1 = vpop.permute.xlu1 %2387  ;;  %v2021_v3 = vpack.c.bf16 %v769_v60, %v767_v49  ;;  %v2023_v35 = vpack.c.bf16 %v768_v61, %v766_v62 }
  0xd8   : > { %v2385_v4 = vunpack.i.h.bf16 %v2383_v0  ;;  %v2384_v5 = vunpack.i.l.bf16 %v2383_v0  ;;  %v2390_v6 = vunpack.i.h.bf16 %v2388_v1  ;;  %v2389_v7 = vunpack.i.l.bf16 %v2388_v1  ;;  %2094 = vmatprep.subr.bf16.mxu1 %v2093_v63  ;;  %v1192_v63 = vld [vmem:[#allocation2 + $0x160] sm:$0xff]  ;;  %v1195_v0 = vld [vmem:[#allocation2 + $0x178] sm:$0xff] }
  0xd9   : > { %2096 = vmatpush3.bf16.msra.mxu1 %v2095_v2  ;;  %2022 = vmatprep.subr.bf16.mxu0 %v2021_v3  ;;  %v1228_v12 = vld [vmem:[#allocation2 + $0x280] sm:$0xff] }
  0xda   : > { %806 = vst.msk [vmem:[#allocation2 + $0x2b0] sm:$0xff] %vm405_vm0, %v2385_v4  ;;  %v795_v8 = vsel %vm544_vm5, %v2384_v5, %v2385_v4  ;;  %809 = vst.msk [vmem:[#allocation2 + $0x2c8] sm:$0xff] %vm405_vm0, %v2390_v6  ;;  %v797_v9 = vsel %vm544_vm5, %v2389_v7, %v2390_v6  ;;  %2024 = vmatpush1.bf16.msra.mxu0 %v2023_v35 }
  0xdb   : > { %v2393_v10 = vpop.permute.xlu0 %2392  ;;  %v2398_v11 = vpop.permute.xlu1 %2397  ;;  %v2025_v13 = vpack.c.bf16 %v797_v9, %v795_v8 }
  0xdc   : > { %v2395_v14 = vunpack.i.h.bf16 %v2393_v10  ;;  %v2394_v18 = vunpack.i.l.bf16 %v2393_v10  ;;  %v2400_v36 = vunpack.i.h.bf16 %v2398_v11  ;;  %v2399_v15 = vunpack.i.l.bf16 %v2398_v11 }
  0xdd   : > { %v1231_v19 = vld [vmem:[#allocation2 + $0x298] sm:$0xff]  ;;  %2026 = vmatprep.subr.bf16.mxu0 %v2025_v13  ;;  %v1257_v13 = vld [vmem:[#allocation2 + $0x368] sm:$0xff] }
  0xde   : > { %v794_v20 = vsel %vm544_vm5, %v2394_v18, %v2384_v5  ;;  %v796_v21 = vsel %vm544_vm5, %v2395_v14, %v2389_v7  ;;  %834 = vst.msk [vmem:[#allocation2 + $0x2e0] sm:$0xff] %vm405_vm0, %v2400_v36  ;;  %v823_v22 = vsel %vm573_vm6, %v2399_v15, %v2400_v36  ;;  %v2097_v23 = vpack.c.bf16 %v1231_v19, %v1228_v12  ;;  %v1260_v14 = vld [vmem:[#allocation2 + $0x380] sm:$0xff] }
  0xdf   : > { %v2403_v24 = vpop.permute.xlu0 %2402  ;;  %v2408_v25 = vpop.permute.xlu1 %2407  ;;  %v2027_v27 = vpack.c.bf16 %v796_v21, %v794_v20  ;;  %v2107_v7 = vpack.c.bf16 %v1195_v0, %v1192_v63  ;;  %v1144_v18 = vld [vmem:[%s3085_s4 + $0x20] sm:$0xff]  ;;  %v2613_v21 = vmov 0.0|0.0  }
  0xe0   : > { %v2405_v28 = vunpack.i.h.bf16 %v2403_v24  ;;  %v2404_v29 = vunpack.i.l.bf16 %v2403_v24  ;;  %v2410_v30 = vunpack.i.h.bf16 %v2408_v25  ;;  %v2409_v32 = vunpack.i.l.bf16 %v2408_v25  ;;  %2098 = vmatprep.subr.bf16.mxu1 %v2097_v23 }
  0xe1   : > { %2100 = vmatpush3.bf16.msra.mxu1 %v2099_v26  ;;  %v1234_v39 = vld [vmem:[#allocation2 + $0x2b0] sm:$0xff]  ;;  %v1237_v40 = vld [vmem:[#allocation2 + $0x2c8] sm:$0xff]  ;;  %2028 = vmatpush1.bf16.msra.mxu0 %v2027_v27  ;;  %v2041_v27 = vpack.c.bf16 %v1260_v14, %v1257_v13 }
  0xe2   : > { %837 = vst.msk [vmem:[#allocation2 + $0x2f8] sm:$0xff] %vm405_vm0, %v2405_v28  ;;  %v825_v41 = vsel %vm573_vm6, %v2404_v29, %v2405_v28  ;;  %v824_v42 = vsel %vm573_vm6, %v2410_v30, %v2404_v29  ;;  %v822_v43 = vsel %vm573_vm6, %v2409_v32, %v2399_v15  ;;  %v2101_v44 = vpack.c.bf16 %v1237_v40, %v1234_v39  ;;  %v1256_v28 = vld [vmem:[#allocation2 + $0x360] sm:$0xff]  ;;  %v1259_v29 = vld [vmem:[#allocation2 + $0x378] sm:$0xff] }
  0xe3   : > { %v2413_v45 = vpop.permute.xlu0 %2412  ;;  %v2418_v46 = vpop.permute.xlu1 %2417  ;;  %v2029_v48 = vpack.c.bf16 %v825_v41, %v823_v22  ;;  %v2031_v49 = vpack.c.bf16 %v824_v42, %v822_v43  ;;  %v2043_v41 = vpack.c.bf16 %v1259_v29, %v1256_v28 }
  0xe4   : > { %v2415_v31 = vunpack.i.h.bf16 %v2413_v45  ;;  %v2414_v50 = vunpack.i.l.bf16 %v2413_v45  ;;  %v2420_v51 = vunpack.i.h.bf16 %v2418_v46  ;;  %v2419_v52 = vunpack.i.l.bf16 %v2418_v46  ;;  %2102 = vmatprep.subr.bf16.mxu1 %v2101_v44 }
  0xe5   : > { %2104 = vmatpush3.bf16.msra.mxu1 %v2103_v47  ;;  %2030 = vmatprep.subr.bf16.mxu0 %v2029_v48  ;;  %v1240_v34 = vld [vmem:[#allocation2 + $0x2e0] sm:$0xff] }
  0xe6   : > { %862 = vst.msk [vmem:[#allocation2 + $0x310] sm:$0xff] %vm405_vm0, %v2415_v31  ;;  %v851_v53 = vsel %vm602_vm7, %v2414_v50, %v2415_v31  ;;  %865 = vst.msk [vmem:[#allocation2 + $0x328] sm:$0xff] %vm405_vm0, %v2420_v51  ;;  %v853_v54 = vsel %vm602_vm7, %v2419_v52, %v2420_v51  ;;  %2032 = vmatpush1.bf16.msra.mxu0 %v2031_v49  ;;  %v1258_v49 = vld [vmem:[#allocation2 + $0x370] sm:$0xff]  ;;  %v1261_v31 = vld [vmem:[#allocation2 + $0x388] sm:$0xff] }
  0xe7   : > { %v2423_v33 = vpop.permute.xlu0 %2422  ;;  %v2428_v56 = vpop.permute.xlu1 %2427  ;;  %v2033_v57 = vpack.c.bf16 %v853_v54, %v851_v53 }
  0xe8   : > { %v2425_v59 = vunpack.i.h.bf16 %v2423_v33  ;;  %v2424_v60 = vunpack.i.l.bf16 %v2423_v33  ;;  %v2430_v61 = vunpack.i.h.bf16 %v2428_v56  ;;  %v2429_v62 = vunpack.i.l.bf16 %v2428_v56 }
  0xe9   : > { %v1243_v1 = vld [vmem:[#allocation2 + $0x2f8] sm:$0xff]  ;;  %2034 = vmatprep.subr.bf16.mxu0 %v2033_v57  ;;  %1382 = vmatmul.mubr.f32.vlgmr.msra.gmra.mrb[0].mxu0 %v1140_v55 }
  0xea   : > { %v850_v2 = vsel %vm602_vm7, %v2424_v60, %v2414_v50  ;;  %v852_v3 = vsel %vm602_vm7, %v2425_v59, %v2419_v52  ;;  %890 = vst.msk [vmem:[#allocation2 + $0x340] sm:$0xff] %vm405_vm0, %v2430_v61  ;;  %v879_v35 = vsel %vm631_vm8, %v2429_v62, %v2430_v61  ;;  %v2105_v4 = vpack.c.bf16 %v1243_v1, %v1240_v34 }
  0xeb   : > { %1387 = vmatprep.mubr.f32.mxu0 %v2955_v58  ;;  %v2433_v5 = vpop.permute.xlu0 %2432  ;;  %v2438_v6 = vpop.permute.xlu1 %2437  ;;  %v2035_v8 = vpack.c.bf16 %v852_v3, %v850_v2  ;;  %v2116_v34 = vpack.c.bf16 %v1261_v31, %v1258_v49 }
  0xec   : > { %v2435_v9 = vunpack.i.h.bf16 %v2433_v5  ;;  %v2434_v10 = vunpack.i.l.bf16 %v2433_v5  ;;  %v2440_v11 = vunpack.i.h.bf16 %v2438_v6  ;;  %v2439_v12 = vunpack.i.l.bf16 %v2438_v6  ;;  %2106 = vmatprep.subr.bf16.mxu1 %v2105_v4 }
  0xed   : > { %2108 = vmatpush3.bf16.msra.mxu1 %v2107_v7  ;;  %v1246_v36 = vld [vmem:[#allocation2 + $0x310] sm:$0xff]  ;;  %v1249_v15 = vld [vmem:[#allocation2 + $0x328] sm:$0xff]  ;;  %2036 = vmatpush1.bf16.msra.mxu0 %v2035_v8 }
  0xee   : > { %893 = vst.msk [vmem:[#allocation2 + $0x358] sm:$0xff] %vm405_vm0, %v2435_v9  ;;  %v881_v17 = vsel %vm631_vm8, %v2434_v10, %v2435_v9  ;;  %v880_v19 = vsel %vm631_vm8, %v2440_v11, %v2434_v10  ;;  %v878_v20 = vsel %vm631_vm8, %v2439_v12, %v2429_v62  ;;  %2109 = vmatprep.subr.bf16.mxu1 %v2613_v21 }
  0xef   : > { %v2110_v22 = vpack.c.bf16 %v1249_v15, %v1246_v36  ;;  %v2443_v23 = vpop.permute.xlu0 %2442  ;;  %v2448_v24 = vpop.permute.xlu1 %2447  ;;  %v2037_v25 = vpack.c.bf16 %v881_v17, %v879_v35  ;;  %v2039_v26 = vpack.c.bf16 %v880_v19, %v878_v20  ;;  %1388 = vmatmul.mubr.f32.gmra.mrb[2].mxu0 %v1144_v18 }
  0xf0   : > { %v2445_v30 = vunpack.i.h.bf16 %v2443_v23  ;;  %v2444_v32 = vunpack.i.l.bf16 %v2443_v23  ;;  %v2450_v37 = vunpack.i.h.bf16 %v2448_v24  ;;  %v2449_v38 = vunpack.i.l.bf16 %v2448_v24  ;;  %1536 = vmatmul.mubr.f32.vlgmr.msra.gmra.mrb[0].mxu1 %v1140_v55  ;;  %1917 = vmatprep.mubr.msk.f32.mxu0 %vm1310_vm9, %v1143_v16 }
  0xf1   : > { %2111 = vmatpush1.bf16.msra.mxu1 %v2110_v22  ;;  %2038 = vmatprep.subr.bf16.mxu0 %v2037_v25  ;;  %v1252_v44 = vld [vmem:[#allocation2 + $0x340] sm:$0xff] }
  0xf2   : > { %940 = vst.msk [vmem:[#allocation2 + $0x3a0] sm:$0xff] %vm405_vm0, %v2445_v30  ;;  %v929_v39 = vsel %vm428_vm1, %v2444_v32, %v2445_v30  ;;  %943 = vst.msk [vmem:[#allocation2 + $0x3b8] sm:$0xff] %vm405_vm0, %v2450_v37  ;;  %v931_v40 = vsel %vm428_vm1, %v2449_v38, %v2450_v37  ;;  %2112 = vmatprep.subr.bf16.mxu1 %v2613_v21  ;;  %2040 = vmatpush1.bf16.msra.mxu0 %v2039_v26 }
  0xf3   : > { %v2453_v42 = vpop.permute.xlu0 %2452  ;;  %v2458_v43 = vpop.permute.xlu1 %2457  ;;  %2042 = vmatprep.subr.bf16.mxu0 %v2041_v27  ;;  %1540 = vmatprep.mubr.f32.mxu1 %v2955_v58  ;;  %v2045_v51 = vpack.c.bf16 %v931_v40, %v929_v39 }
  0xf4   : > { %v2455_v45 = vunpack.i.h.bf16 %v2453_v42  ;;  %v2454_v46 = vunpack.i.l.bf16 %v2453_v42  ;;  %v2460_v47 = vunpack.i.h.bf16 %v2458_v43  ;;  %v2459_v48 = vunpack.i.l.bf16 %v2458_v43  ;;  %1541 = vmatmul.mubr.f32.gmra.mrb[2].mxu1 %v1144_v18 }
  0xf5   : > { %v1255_v50 = vld [vmem:[#allocation2 + $0x358] sm:$0xff]  ;;  %1919 = vmatprep.mubr.msk.f32.mxu1 %vm1310_vm9, %v1143_v16 }
  0xf6   : > { %v928_v52 = vsel %vm428_vm1, %v2454_v46, %v2444_v32  ;;  %v930_v53 = vsel %vm428_vm1, %v2455_v45, %v2449_v38  ;;  %968 = vst.msk [vmem:[#allocation2 + $0x3d0] sm:$0xff] %vm405_vm0, %v2460_v47  ;;  %v957_v54 = vsel %vm457_vm2, %v2459_v48, %v2460_v47  ;;  %v2113_v55 = vpack.c.bf16 %v1255_v50, %v1252_v44 }
  0xf7   : > { %2044 = vmatpush1.bf16.msra.mxu0 %v2043_v41  ;;  %v2463_v33 = vpop.permute.xlu0 %2462  ;;  %v2468_v56 = vpop.permute.xlu1 %2467  ;;  %v2047_v57 = vpack.c.bf16 %v930_v53, %v928_v52 }
  0xf8   : > { %2046 = vmatprep.subr.bf16.mxu0 %v2045_v51  ;;  %v2465_v58 = vunpack.i.h.bf16 %v2463_v33  ;;  %v2464_v59 = vunpack.i.l.bf16 %v2463_v33  ;;  %v2470_v60 = vunpack.i.h.bf16 %v2468_v56  ;;  %v2469_v61 = vunpack.i.l.bf16 %v2468_v56  ;;  %2114 = vmatpush1.bf16.msra.mxu1 %v2113_v55 }
  0xf9   : > { %2115 = vmatprep.subr.bf16.mxu1 %v2613_v21  ;;  %v1264_v3 = vld [vmem:[#allocation2 + $0x3a0] sm:$0xff]  ;;  %v1267_v35 = vld [vmem:[#allocation2 + $0x3b8] sm:$0xff] }
  0xfa   : > { %971 = vst.msk [vmem:[#allocation2 + $0x3e8] sm:$0xff] %vm405_vm0, %v2465_v58  ;;  %v959_v62 = vsel %vm457_vm2, %v2464_v59, %v2465_v58  ;;  %v958_v63 = vsel %vm457_vm2, %v2470_v60, %v2464_v59  ;;  %v956_v0 = vsel %vm457_vm2, %v2469_v61, %v2459_v48  ;;  %v2119_v12 = vpack.c.bf16 %v1267_v35, %v1264_v3 }
  0xfb   : > { %2048 = vmatpush1.bf16.msra.mxu0 %v2047_v57  ;;  %v2473_v1 = vpop.permute.xlu0 %2472  ;;  %v2478_v2 = vpop.permute.xlu1 %2477  ;;  %v2049_v4 = vpack.c.bf16 %v959_v62, %v957_v54  ;;  %v2051_v5 = vpack.c.bf16 %v958_v63, %v956_v0 }
  0xfc   : > { %v2475_v6 = vunpack.i.h.bf16 %v2473_v1  ;;  %v2474_v7 = vunpack.i.l.bf16 %v2473_v1  ;;  %v2480_v8 = vunpack.i.h.bf16 %v2478_v2  ;;  %v2479_v9 = vunpack.i.l.bf16 %v2478_v2  ;;  %2117 = vmatpush1.bf16.msra.mxu1 %v2116_v34 }
  0xfd   : > { %2118 = vmatprep.subr.bf16.mxu1 %v2613_v21  ;;  %2050 = vmatprep.subr.bf16.mxu0 %v2049_v4  ;;  %v1270_v18 = vld [vmem:[#allocation2 + $0x3d0] sm:$0xff] }
  0xfe   : > { %996 = vst.msk [vmem:[#allocation2 + $0x400] sm:$0xff] %vm405_vm0, %v2475_v6  ;;  %v985_v10 = vsel %vm486_vm3, %v2474_v7, %v2475_v6  ;;  %999 = vst.msk [vmem:[#allocation2 + $0x418] sm:$0xff] %vm405_vm0, %v2480_v8  ;;  %v987_v11 = vsel %vm486_vm3, %v2479_v9, %v2480_v8 }
  0xff   : > { %2052 = vmatpush1.bf16.msra.mxu0 %v2051_v5  ;;  %v2483_v13 = vpop.permute.xlu0 %2482  ;;  %v2488_v14 = vpop.permute.xlu1 %2487  ;;  %v2053_v36 = vpack.c.bf16 %v987_v11, %v985_v10 }
 0x100   : > { %v2485_v15 = vunpack.i.h.bf16 %v2483_v13  ;;  %v2484_v16 = vunpack.i.l.bf16 %v2483_v13  ;;  %v2490_v17 = vunpack.i.h.bf16 %v2488_v14  ;;  %v2489_v19 = vunpack.i.l.bf16 %v2488_v14  ;;  %2120 = vmatpush1.bf16.msra.mxu1 %v2119_v12 }
 0x101   : > { %2121 = vmatprep.subr.bf16.mxu1 %v2613_v21  ;;  %v1273_v20 = vld [vmem:[#allocation2 + $0x3e8] sm:$0xff]  ;;  %2054 = vmatprep.subr.bf16.mxu0 %v2053_v36 }
 0x102   : > { %v984_v22 = vsel %vm486_vm3, %v2484_v16, %v2474_v7  ;;  %v986_v23 = vsel %vm486_vm3, %v2485_v15, %v2479_v9  ;;  %1024 = vst.msk [vmem:[#allocation2 + $0x430] sm:$0xff] %vm405_vm0, %v2490_v17  ;;  %v1013_v24 = vsel %vm515_vm4, %v2489_v19, %v2490_v17  ;;  %v2122_v25 = vpack.c.bf16 %v1273_v20, %v1270_v18 }
 0x103   : > { %v2493_v26 = vpop.permute.xlu0 %2492  ;;  %v2498_v27 = vpop.permute.xlu1 %2497  ;;  %v2055_v28 = vpack.c.bf16 %v986_v23, %v984_v22 }
 0x104   : > { %v2495_v29 = vunpack.i.h.bf16 %v2493_v26  ;;  %v2494_v30 = vunpack.i.l.bf16 %v2493_v26  ;;  %v2500_v32 = vunpack.i.h.bf16 %v2498_v27  ;;  %v2499_v37 = vunpack.i.l.bf16 %v2498_v27  ;;  %2123 = vmatpush1.bf16.msra.mxu1 %v2122_v25 }
 0x105   : > { %2124 = vmatprep.subr.bf16.mxu1 %v2613_v21  ;;  %v1276_v38 = vld [vmem:[#allocation2 + $0x400] sm:$0xff]  ;;  %v1279_v39 = vld [vmem:[#allocation2 + $0x418] sm:$0xff]  ;;  %2056 = vmatpush1.bf16.msra.mxu0 %v2055_v28 }
 0x106   : > { %1027 = vst.msk [vmem:[#allocation2 + $0x448] sm:$0xff] %vm405_vm0, %v2495_v29  ;;  %v1015_v40 = vsel %vm515_vm4, %v2494_v30, %v2495_v29  ;;  %v1014_v41 = vsel %vm515_vm4, %v2500_v32, %v2494_v30  ;;  %v1012_v42 = vsel %vm515_vm4, %v2499_v37, %v2489_v19  ;;  %v2125_v43 = vpack.c.bf16 %v1279_v39, %v1276_v38 }
 0x107   : > { %v2503_v44 = vpop.permute.xlu0 %2502  ;;  %v2508_v45 = vpop.permute.xlu1 %2507  ;;  %v2057_v46 = vpack.c.bf16 %v1015_v40, %v1013_v24  ;;  %v2059_v47 = vpack.c.bf16 %v1014_v41, %v1012_v42 }
 0x108   : > { %v2505_v48 = vunpack.i.h.bf16 %v2503_v44  ;;  %v2504_v49 = vunpack.i.l.bf16 %v2503_v44  ;;  %v2510_v31 = vunpack.i.h.bf16 %v2508_v45  ;;  %v2509_v50 = vunpack.i.l.bf16 %v2508_v45  ;;  %2126 = vmatpush1.bf16.msra.mxu1 %v2125_v43 }
 0x109   : > { %2127 = vmatprep.subr.bf16.mxu1 %v2613_v21  ;;  %2058 = vmatprep.subr.bf16.mxu0 %v2057_v46  ;;  %v1282_v55 = vld [vmem:[#allocation2 + $0x430] sm:$0xff] }
 0x10a   : > { %1052 = vst.msk [vmem:[#allocation2 + $0x460] sm:$0xff] %vm405_vm0, %v2505_v48  ;;  %v1041_v51 = vsel %vm544_vm5, %v2504_v49, %v2505_v48  ;;  %1055 = vst.msk [vmem:[#allocation2 + $0x478] sm:$0xff] %vm405_vm0, %v2510_v31  ;;  %v1043_v52 = vsel %vm544_vm5, %v2509_v50, %v2510_v31  ;;  %2060 = vmatpush1.bf16.msra.mxu0 %v2059_v47 }
 0x10b   : > { %v2513_v53 = vpop.permute.xlu0 %2512  ;;  %v2518_v54 = vpop.permute.xlu1 %2517  ;;  %v2061_v33 = vpack.c.bf16 %v1043_v52, %v1041_v51 }
 0x10c   : > { %v2515_v56 = vunpack.i.h.bf16 %v2513_v53  ;;  %v2514_v34 = vunpack.i.l.bf16 %v2513_v53  ;;  %v2520_v57 = vunpack.i.h.bf16 %v2518_v54  ;;  %v2519_v58 = vunpack.i.l.bf16 %v2518_v54  ;;  %v1142_v54 = vld [vmem:[%s3085_s4 + $0x10] sm:$0xff] }
 0x10d   : > { %v1285_v59 = vld [vmem:[#allocation2 + $0x448] sm:$0xff]  ;;  %2062 = vmatprep.subr.bf16.mxu0 %v2061_v33  ;;  %v1147_v33 = vld [vmem:[%s3085_s4 + $0x38] sm:$0xff] }
 0x10e   : > { %v1040_v60 = vsel %vm544_vm5, %v2514_v34, %v2504_v49  ;;  %v1042_v61 = vsel %vm544_vm5, %v2515_v56, %v2509_v50  ;;  %1080 = vst.msk [vmem:[#allocation2 + $0x490] sm:$0xff] %vm405_vm0, %v2520_v57  ;;  %v1069_v62 = vsel %vm573_vm6, %v2519_v58, %v2520_v57  ;;  %v2128_v63 = vpack.c.bf16 %v1285_v59, %v1282_v55 }
 0x10f   : > { %v2523_v0 = vpop.permute.xlu0 %2522  ;;  %v2528_v1 = vpop.permute.xlu1 %2527  ;;  %v2063_v2 = vpack.c.bf16 %v1042_v61, %v1040_v60 }
 0x110   : > { %v2525_v3 = vunpack.i.h.bf16 %v2523_v0  ;;  %v2524_v35 = vunpack.i.l.bf16 %v2523_v0  ;;  %v2530_v4 = vunpack.i.h.bf16 %v2528_v1  ;;  %v2529_v5 = vunpack.i.l.bf16 %v2528_v1  ;;  %2129 = vmatpush1.bf16.msra.mxu1 %v2128_v63 }
 0x111   : > { %2130 = vmatprep.subr.bf16.mxu1 %v2613_v21  ;;  %v1288_v6 = vld [vmem:[#allocation2 + $0x460] sm:$0xff]  ;;  %v1291_v7 = vld [vmem:[#allocation2 + $0x478] sm:$0xff]  ;;  %2064 = vmatpush1.bf16.msra.mxu0 %v2063_v2  ;;  %v1648_v63 = vlaneseq }
 0x112   : > { %1083 = vst.msk [vmem:[#allocation2 + $0x4a8] sm:$0xff] %vm405_vm0, %v2525_v3  ;;  %v1071_v8 = vsel %vm573_vm6, %v2524_v35, %v2525_v3  ;;  %v1070_v9 = vsel %vm573_vm6, %v2530_v4, %v2524_v35  ;;  %v1068_v10 = vsel %vm573_vm6, %v2529_v5, %v2519_v58  ;;  %v2131_v11 = vpack.c.bf16 %v1291_v7, %v1288_v6  ;;  %v1646_v2 = vld [vmem:[%s3081_s0] sm:$0x7] }
 0x113   : > { %v2533_v12 = vpop.permute.xlu0 %2532  ;;  %v2538_v13 = vpop.permute.xlu1 %2537  ;;  %v2065_v14 = vpack.c.bf16 %v1071_v8, %v1069_v62  ;;  %v2067_v18 = vpack.c.bf16 %v1070_v9, %v1068_v10  ;;  %v1649_v0 = vshrl.u32 %v1648_v63, 7 }
 0x114   : > { %v2535_v36 = vunpack.i.h.bf16 %v2533_v12  ;;  %v2534_v15 = vunpack.i.l.bf16 %v2533_v12  ;;  %v2540_v16 = vunpack.i.h.bf16 %v2538_v13  ;;  %v2539_v17 = vunpack.i.l.bf16 %v2538_v13  ;;  %2132 = vmatpush1.bf16.msra.mxu1 %v2131_v11 }
 0x115   : > { %2133 = vmatprep.subr.bf16.mxu1 %v2613_v21  ;;  %2066 = vmatprep.subr.bf16.mxu0 %v2065_v14  ;;  %v1294_v24 = vld [vmem:[#allocation2 + $0x490] sm:$0xff]  ;;  %v1650_v1 = vsub.s32 0, %v1649_v0  ;;  %v1654_v3 = vsub.s32 1, %v1649_v0  ;;  %v1658_v8 = vsub.s32 2, %v1649_v0 }
 0x116   : > { %1108 = vst.msk [vmem:[#allocation2 + $0x4c0] sm:$0xff] %vm405_vm0, %v2535_v36  ;;  %v1097_v19 = vsel %vm602_vm7, %v2534_v15, %v2535_v36  ;;  %1111 = vst.msk [vmem:[#allocation2 + $0x4d8] sm:$0xff] %vm405_vm0, %v2540_v16  ;;  %v1099_v20 = vsel %vm602_vm7, %v2539_v17, %v2540_v16  ;;  %2068 = vmatpush1.bf16.msra.mxu0 %v2067_v18 }
 0x117   : > { %v2543_v22 = vpop.permute.xlu0 %2542  ;;  %v2548_v23 = vpop.permute.xlu1 %2547  ;;  %v2069_v25 = vpack.c.bf16 %v1099_v20, %v1097_v19  ;;  %v1651_v35 = vrot.slane %v1646_v2, %v1650_v1  ;;  %v1655_v4 = vrot.slane %v1646_v2, %v1654_v3  ;;  %v1659_v18 = vrot.slane %v1646_v2, %v1658_v8 }
 0x118   : > { %v2545_v26 = vunpack.i.h.bf16 %v2543_v22  ;;  %v2544_v27 = vunpack.i.l.bf16 %v2543_v22  ;;  %v2550_v28 = vunpack.i.h.bf16 %v2548_v23  ;;  %v2549_v29 = vunpack.i.l.bf16 %v2548_v23 }
 0x119   : > { %v1297_v30 = vld [vmem:[#allocation2 + $0x4a8] sm:$0xff]  ;;  %2070 = vmatprep.subr.bf16.mxu0 %v2069_v25 }
 0x11a   : > { %v1096_v32 = vsel %vm602_vm7, %v2544_v27, %v2534_v15  ;;  %v1098_v37 = vsel %vm602_vm7, %v2545_v26, %v2539_v17  ;;  %1136 = vst.msk [vmem:[#allocation2 + $0x4f0] sm:$0xff] %vm405_vm0, %v2550_v28  ;;  %v1125_v38 = vsel %vm631_vm8, %v2549_v29, %v2550_v28  ;;  %v2134_v39 = vpack.c.bf16 %v1297_v30, %v1294_v24 }
 0x11b   : > { %v2553_v40 = vpop.permute.xlu0 %2552  ;;  %v2558_v41 = vpop.permute.xlu1 %2557  ;;  %v2071_v42 = vpack.c.bf16 %v1098_v37, %v1096_v32 }
 0x11c   : > { %v2555_v43 = vunpack.i.h.bf16 %v2553_v40  ;;  %v2554_v44 = vunpack.i.l.bf16 %v2553_v40  ;;  %v2560_v45 = vunpack.i.h.bf16 %v2558_v41  ;;  %v2559_v46 = vunpack.i.l.bf16 %v2558_v41  ;;  %2135 = vmatpush1.bf16.msra.mxu1 %v2134_v39 }
 0x11d   : > { %2136 = vmatprep.subr.bf16.mxu1 %v2613_v21  ;;  %v1300_v47 = vld [vmem:[#allocation2 + $0x4c0] sm:$0xff]  ;;  %v1303_v48 = vld [vmem:[#allocation2 + $0x4d8] sm:$0xff]  ;;  %2072 = vmatpush1.bf16.msra.mxu0 %v2071_v42 }
 0x11e   : > { %1139 = vst.msk [vmem:[#allocation2 + $0x508] sm:$0xff] %vm405_vm0, %v2555_v43  ;;  %v1127_v49 = vsel %vm631_vm8, %v2554_v44, %v2555_v43  ;;  %v1126_v31 = vsel %vm631_vm8, %v2560_v45, %v2554_v44  ;;  %v1124_v50 = vsel %vm631_vm8, %v2559_v46, %v2549_v29  ;;  %v2137_v51 = vpack.c.bf16 %v1303_v48, %v1300_v47 }
 0x11f   : > { %v2073_v52 = vpack.c.bf16 %v1127_v49, %v1125_v38  ;;  %v2075_v53 = vpack.c.bf16 %v1126_v31, %v1124_v50 }
 0x120   : > { %2138 = vmatpush1.bf16.msra.mxu1 %v2137_v51 }
 0x121   : > { %2139 = vmatprep.subr.bf16.mxu1 %v2613_v21  ;;  %2074 = vmatprep.subr.bf16.mxu0 %v2073_v52  ;;  %v1306_v55 = vld [vmem:[#allocation2 + $0x4f0] sm:$0xff] }
 0x122   : > { %2076 = vmatpush1.bf16.msra.mxu0 %v2075_v53  ;;  %v1146_v21 = vld [vmem:[%s3085_s4 + $0x30] sm:$0xff] }
 0x125   : > { %v1309_v56 = vld [vmem:[#allocation2 + $0x508] sm:$0xff]  ;;  %1459 = vmatmul.mubr.f32.vlgmr.msra.gmra.mrb[0].mxu0 %v1142_v54 }
 0x126   : > { %v2140_v34 = vpack.c.bf16 %v1309_v56, %v1306_v55  ;;  %1918 = vmatprep.mubr.msk.f32.mxu0 %vm1310_vm9, %v1147_v33 }
 0x128   : > { %2141 = vmatpush1.bf16.msra.mxu1 %v2140_v34 }
 0x129   : > { %1465 = vmatmul.mubr.f32.gmra.mrb[2].mxu0 %v1146_v21 }
 0x12b   : > { %1611 = vmatmul.mubr.f32.vlgmr.msra.gmra.mrb[4].mxu1 %v1142_v54 }
 0x12c   : > { %1920 = vmatprep.mubr.msk.f32.mxu1 %vm1310_vm9, %v1147_v33 }
 0x12f   : > { %1616 = vmatmul.mubr.f32.gmra.mrb[6].mxu1 %v1146_v21 }
 0x1c3   : > { %v1963_v57 = vpop.f32.mrb[0].mxu1 }
 0x1c4   : > { %v1964_v58 = vpop.f32.mrb[1].mxu1 }
 0x1c5   : > { %v1965_v59 = vadd.f32 %v1964_v58, %v1963_v57 }
 0x1c7   : > { %v1966_v60 = vpop.f32.mrb[2].mxu1 }
 0x1c8   : > { %v1967_v61 = vpop.f32.mrb[3].mxu1 }
 0x1c9   : > { %v1968_v62 = vadd.f32 %v1967_v61, %v1966_v60 }
 0x1f8   : > { %v1460_v5 = vpop.f32.mrb[0].mxu0 }
 0x1f9   : > { %v1663_v6 = vmul.f32 %v1651_v35, %v1460_v5  ;;  %v1462_v7 = vpop.f32.mrb[1].mxu0 }
 0x1fa   : > { %v1927_v9 = vpack.c.bf16 %v1462_v7, %v1460_v5  ;;  %v1664_v10 = vmul.f32 %v1655_v4, %v1462_v7 }
 0x1fc   : > { %1641 = vst [vmem:[%s383_s8] sm:$0xff] %v1927_v9  ;;  %v1466_v11 = vpop.f32.mrb[2].mxu0  ;;  %v1669_v12 = vadd.f32 %v1664_v10, %v1663_v6 }
 0x1fd   : > { %v1666_v13 = vmul.f32 %v1651_v35, %v1466_v11  ;;  %v1468_v14 = vpop.f32.mrb[3].mxu0 }
 0x1fe   : > { %v1612_v36 = vpop.f32.mrb[4].mxu1  ;;  %v1929_v15 = vpack.c.bf16 %v1468_v14, %v1466_v11  ;;  %v1667_v16 = vmul.f32 %v1655_v4, %v1468_v14 }
 0x1ff   : > { %v1613_v17 = vadd.f32 %v1965_v59, %v1612_v36  ;;  %v1614_v19 = vpop.f32.mrb[5].mxu1 }
 0x200   : > { %1644 = vst [vmem:[%s383_s8 + $0xc] sm:$0xff] %v1929_v15  ;;  %v1674_v20 = vadd.f32 %v1667_v16, %v1666_v13 }
 0x201   : > { %v1928_v22 = vpack.c.bf16 %v1613_v17, %v1613_v17  ;;  %v1665_v23 = vmul.f32 %v1659_v18, %v1613_v17 }
 0x202   : > { %v1617_v24 = vpop.f32.mrb[6].mxu1 }
 0x203   : > { %1643 = vst.msk [vmem:[%s383_s8 + $0x8] sm:$0xf] %vm1642_vm10, %v1928_v22  ;;  %v1618_v25 = vadd.f32 %v1968_v62, %v1617_v24  ;;  %v1619_v26 = vpop.f32.mrb[7].mxu1  ;;  %v1670_v27 = vsel %vm405_vm0, %v1665_v23, 0.0 }
 0x204   : > { %v1671_v28 = vadd.f32 %v1670_v27, %v1669_v12 }
 0x205   : > { %v1930_v29 = vpack.c.bf16 %v1618_v25, %v1618_v25  ;;  %v1668_v30 = vmul.f32 %v1659_v18, %v1618_v25 }
 0x206   : > { %1672 = vadd.xlane.f32.xlu0 %v1671_v28 }
 0x207   : > { %1645 = vst.msk [vmem:[%s383_s8 + $0x14] sm:$0xf] %vm1642_vm10, %v1930_v29  ;;  %v1675_v32 = vsel %vm405_vm0, %v1668_v30, 0.0 }
 0x208   : > { %v1676_v37 = vadd.f32 %v1675_v32, %v1674_v20 }
 0x20a   : > { %1677 = vadd.xlane.f32.xlu1 %v1676_v37 }
 0x293   : > { %v1673_v38 = vpop.xlane.xlu0 %1672 }
 0x294   : > { %v1679_v39 = vmul.f32 0.00390625, %v1673_v38 }
 0x296   : > { %v1681_v40 = vsub.f32 %v1460_v5, %v1679_v39  ;;  %v1682_v41 = vsub.f32 %v1462_v7, %v1679_v39  ;;  %v1683_v42 = vsub.f32 %v1613_v17, %v1679_v39 }
 0x297   : > { %v1678_v43 = vpop.xlane.xlu1 %1677 }
 0x298   : > { %v1680_v44 = vmul.f32 0.00390625, %v1678_v43  ;;  %v1687_v45 = vmul.f32 %v1681_v40, %v1651_v35  ;;  %v1688_v46 = vmul.f32 %v1682_v41, %v1655_v4  ;;  %v1689_v47 = vmul.f32 %v1683_v42, %v1659_v18 }
 0x29a   : > { %v1684_v48 = vsub.f32 %v1466_v11, %v1680_v44  ;;  %v1685_v49 = vsub.f32 %v1468_v14, %v1680_v44  ;;  %v1693_v31 = vmul.f32 %v1687_v45, %v1687_v45  ;;  %v1694_v50 = vmul.f32 %v1688_v46, %v1688_v46 }
 0x29b   : > { %v1695_v51 = vmul.f32 %v1689_v47, %v1689_v47  ;;  %v1686_v52 = vsub.f32 %v1618_v25, %v1680_v44 }
 0x29c   : > { %v1699_v53 = vadd.f32 %v1694_v50, %v1693_v31  ;;  %v1690_v54 = vmul.f32 %v1684_v48, %v1651_v35  ;;  %v1691_v55 = vmul.f32 %v1685_v49, %v1655_v4 }
 0x29d   : > { %v1700_v33 = vsel %vm405_vm0, %v1695_v51, 0.0  ;;  %v1692_v56 = vmul.f32 %v1686_v52, %v1659_v18 }
 0x29e   : > { %v1701_v34 = vadd.f32 %v1700_v33, %v1699_v53  ;;  %v1696_v21 = vmul.f32 %v1690_v54, %v1690_v54  ;;  %v1697_v57 = vmul.f32 %v1691_v55, %v1691_v55 }
 0x29f   : > { %v1698_v58 = vmul.f32 %v1692_v56, %v1692_v56 }
 0x2a0   : > { %1702 = vadd.xlane.f32.xlu0 %v1701_v34  ;;  %v1704_v59 = vadd.f32 %v1697_v57, %v1696_v21 }
 0x2a1   : > { %v1705_v60 = vsel %vm405_vm0, %v1698_v58, 0.0 }
 0x2a2   : > { %v1706_v61 = vadd.f32 %v1705_v60, %v1704_v59 }
 0x2a4   : > { %1707 = vadd.xlane.f32.xlu0 %v1706_v61 }
 0x32d   : > { %v1703_v62 = vpop.xlane.xlu0 %1702 }
 0x32e   : > { %v1710_v63 = vsel %vm1709_vm11, %v1679_v39, %v1703_v62 }
 0x32f   : > { %1713 = vst.msk [vmem:[%s392_s14] sm:$0xff] %vm1712_vm12, %v1710_v63 }
 0x331   : > { %v1708_v0 = vpop.xlane.xlu0 %1707 }
 0x332   : > { %v1711_v1 = vsel %vm1709_vm11, %v1680_v44, %v1708_v0 }
 0x333   : > { %1714 = vst.msk [vmem:[%s392_s14 + $0x8] sm:$0xff] %vm1712_vm12, %v1711_v1 }
 0x334 PF: > { %s17_s25 = sadd.s32 1, %s2603_s25   ;;  %s3088_s21 = smov %s2595_s23 }
 0x335   : > { %p14_p10 = scmp.ge.s32.totalorder %s17_s25, 34   ;;  %s3089_s22 = smov %s2599_s24 }
 0x336   : > { %s3090_s23 = smov %s3093_s26  ;;  %s3091_s24 = smov %s3097_s27 }
 0x337   :  { %16 = sbr.rel (!%p14_p10) target bundleno = 3 (0x3), region = 88 }

// kernel: normalization_forward.5
= control target key start
LH: loop header
LB: loop body
LE: loop exit
PB: predicated region body
PF: predicated region fallthrough
CT: control target
= control target key end

     0   :  { %s2371_s15 = smov 0   ;;  %s2373_s16 = smov 0   ;;  %s2775_s0 = inlined_call_operand.vmem [shape: bf16[2,18,16,384], index: 0, kind: input, shape index: {}, may-alias: {0,1,2}]   ;;  %s2776_s1 = inlined_call_operand.vmem [shape: bf16[2,18,16,384], index: 1, kind: input, shape index: {}, may-alias: {0,1,2}]   ;;  %s2777_s2 = inlined_call_operand.vmem [shape: bf16[2,18,16,384], index: 2, kind: input, shape index: {}, may-alias: {0,1,2}]   ;;  %s2778_s3 = inlined_call_operand.vmem [shape: f32[8,432], index: 3, kind: input, shape index: {}]   ;;  %s2779_s4 = inlined_call_operand.vmem [shape: f32[2,16,8,324], index: 4, kind: output, shape index: {}]  }
   0x1   :  { %s2375_s17 = smov 0   ;;  %s2377_s18 = smov 0  }
   0x2   :  { %s2379_s19 = smov 0  }
   0x3 LB: > { %s23_s20 = sadd.s32 1, %s2327_s17  ;;  %s26_s21 = sadd.s32 1, %s2331_s18  ;;  %s2335_s19 = sphi %s2379_s19, %s14_s19   ;;  %s2331_s18 = sphi %s2377_s18, %s2783_s18   ;;  %s2327_s17 = sphi %s2375_s17, %s2782_s17   ;;  %s2323_s16 = sphi %s2373_s16, %s2781_s16   ;;  %s2319_s15 = sphi %s2371_s15, %s2780_s15  }
   0x4   : > { %p24_p0 = scmp.ge.s32.totalorder %s23_s20, 16  ;;  %p1659_p1 = scmp.ge.s32.totalorder %s2335_s19, 1 }
   0x5   : > { %p222_p2 = scmp.lt.s32.totalorder %s2335_s19, 33 }
   0x6   : > { %s2785_s20 = smov (%p24_p0, %s23_s20), 0  ;;  %s2787_s21 = smov (!%p24_p0, %s26_s21), %s2331_s18 }
   0x7   : > { %p223_p3 = pnand %p1659_p1, %p222_p2  ;;  %p28_p4 = scmp.ge.s32.totalorder %s2787_s21, 2 }
   0x8   : > { %p276_p5 = scmp.lt.s32.totalorder (!%p223_p3), %s2323_s16, 1  ;;  %p278_p6 = scmp.lt.s32.totalorder (!%p223_p3), %s2319_s15, 17  ;;  %vm328_vm0 = vcmask (!%p223_p3), 556032   ;;  %v1064_v40 = vld [vmem:[%s2778_s3 + $0x8] sm:$0xff] (!%p223_p3)  ;;  %vm351_vm1 = vcmask (!%p223_p3), 1039360   ;;  %vm380_vm2 = vcmask (!%p223_p3), 1031168  }
   0x9   : > { %s2789_s21 = smov (%p28_p4, %s2787_s21), 0  ;;  %226 = sbr.rel (%p223_p3) target bundleno = 514 (0x202), region = 36 }
   0xa   : > { %s285_s30 = sadd.s32 (!%p223_p3), 1, %s2319_s15  ;;  %s296_s5 = sadd.s32 (!%p223_p3), 2, %s2319_s15  ;;  %1439 = vmatprep.mubr.f32.mxu1 (!%p223_p3), %v1064_v40  ;;  %1297 = vmatprep.mubr.f32.mxu0 (!%p223_p3), %v1064_v40  ;;  %vm409_vm3 = vcmask (!%p223_p3), 900096   ;;  %vm438_vm4 = vcmask (!%p223_p3), 891904   ;;  %vm467_vm5 = vcmask (!%p223_p3), 883712   ;;  %vm496_vm6 = vcmask (!%p223_p3), 752640  }
   0xb   : > { %p288_p7 = scmp.lt.s32.totalorder (!%p223_p3), %s285_s30, 17  ;;  %p299_p8 = scmp.lt.s32.totalorder (!%p223_p3), %s296_s5, 17  ;;  %vm525_vm7 = vcmask (!%p223_p3), 744448   ;;  %vm554_vm8 = vcmask (!%p223_p3), 736256   ;;  %vm1229_vm9 = vcmask (!%p223_p3), 392192  }
   0xc   : > { %s2337_s7 = smov (!%p223_p3), 127   ;;  %s2339_s27 = smov (!%p223_p3), 110  }
   0xd   : > { %s2340_s28 = smov (!%p223_p3), 109   ;;  %p309_p9 = scmp.lt.s32.totalorder (!%p223_p3), %s2319_s15, 15 }
  0x10   : > { %s2791_s16 = smov (!%p276_p5, %s2323_s16), 1  ;;  %s2793_s30 = smov (!%p288_p7, %s285_s30), 17 }
  0x11   : > { %s279_s22 = scalar_select %p278_p6, %s2319_s15, 17 }
  0x12   : > { %s2408_s23 = smul.u32 108, %s2791_s16  ;;  %s2795_s5 = smov (!%p299_p8, %s296_s5), 17 }
  0x13   : > { %s1878_s24 = smul.u32 6, %s279_s22  ;;  %s2797_s15 = smov (!%p309_p9, %s2319_s15), 15 }
  0x14   : > { %s1880_s6 = smul.u32 6, %s2793_s30  ;;  %s2342_s30 = smov 92  }
  0x15   : > { %s282_s25 = sadd.s32 %s2408_s23, %s1878_s24  ;;  %s1881_s8 = smul.u32 6, %s2795_s5 }
  0x16   : > { %s1660_s26 = sshll.u32 %s282_s25, 2  ;;  %s292_s9 = sadd.s32 %s1880_s6, %s2408_s23 }
  0x17   : > { %s284_s29 = scalar_lea.vmem %s2775_s0, %s1660_s26  ;;  %s1661_s10 = sshll.u32 %s292_s9, 2 }
  0x18   : > { %v316_v0 = vld [vmem:[%s284_s29] sm:$0xff]  ;;  %v317_v1 = vld [vmem:[%s284_s29 + $0x8] ss:$12 sps:$4 sm:$0xff]   ;;  %v318_v2 = vld [vmem:[%s284_s29 + $0xc] sm:$0xff]  ;;  %s303_s11 = sadd.s32 %s1881_s8, %s2408_s23  ;;  %s294_s14 = scalar_lea.vmem %s2776_s1, %s1661_s10 }
  0x19   : > { %v321_v3 = vunpack.c.h.bf16 %v316_v0  ;;  %v322_v4 = vunpack.c.l.bf16 %v317_v1  ;;  %v320_v5 = vunpack.c.l.bf16 %v316_v0  ;;  %v323_v6 = vunpack.c.l.bf16 %v318_v2  ;;  %s1662_s22 = sshll.u32 %s303_s11, 2  ;;  %s2338_s24 = smov 126   ;;  %v2437_v14 = vld [vmem:[%s294_s14] sm:$0xff]  ;;  %v572_v15 = vld [vmem:[%s294_s14 + $0x8] ss:$12 sps:$4 sm:$0xff]   ;;  %v2443_v18 = vld [vmem:[%s294_s14 + $0xc] sm:$0xff] }
  0x1a   : > { %v324_v7 = vunpack.c.h.bf16 %v318_v2  ;;  %v325_v8 = vunpack.c.h.bf16 %v317_v1  ;;  %v2293_v11 = vcombine.low %v316_v0, %v318_v2  ;;  %v2294_v12 = vcombine.high %v316_v0, %v318_v2  ;;  %s305_s23 = scalar_lea.vmem %s2777_s2, %s1662_s22  ;;  %s2341_s29 = smov 108  }
  0x1b   : > { %v2416_v9 = vpack.i.bf16 %v322_v4, %v321_v3  ;;  %v2418_v10 = vpack.i.bf16 %v323_v6, %v320_v5  ;;  %329 = vst.msk [vmem:[#allocation2 + $0x10] sm:$0xff] %vm328_vm0, %v322_v4  ;;  %v576_v16 = vunpack.c.h.bf16 %v2437_v14  ;;  %v577_v17 = vunpack.c.l.bf16 %v572_v15  ;;  %v817_v21 = vld [vmem:[%s305_s23] sm:$0xff]  ;;  %v818_v22 = vld [vmem:[%s305_s23 + $0x8] ss:$12 sps:$4 sm:$0xff]   ;;  %v819_v27 = vld [vmem:[%s305_s23 + $0xc] sm:$0xff]  ;;  %s2343_s5 = smov 91  }
  0x1c   : > { %332 = vst.msk [vmem:[#allocation2 + $0x28] sm:$0xff] %vm328_vm0, %v325_v8  ;;  %v2426_v13 = vpack.i.bf16 %v325_v8, %v324_v7  ;;  %1704 = vmatprep.subr.bf16.mxu0 %v2294_v12  ;;  %v580_v19 = vunpack.c.h.bf16 %v572_v15  ;;  %v575_v20 = vunpack.c.l.bf16 %v2437_v14  ;;  %v579_v23 = vunpack.c.h.bf16 %v2443_v18  ;;  %s2344_s6 = smov 90   ;;  %s1882_s22 = smul.u32 3, %s2797_s15 }
  0x1d   : > { %1934 = vrot.lane.b32.xlu0 %v2416_v9, %s2337_s7  ;;  %1944 = vrot.lane.b32.xlu1 %v2418_v10, %s2337_s7  ;;  %v578_v24 = vunpack.c.l.bf16 %v2443_v18  ;;  %v822_v25 = vunpack.c.h.bf16 %v817_v21  ;;  %v823_v26 = vunpack.c.l.bf16 %v818_v22  ;;  %v825_v28 = vunpack.c.h.bf16 %v819_v27  ;;  %583 = vst.msk [vmem:[#allocation2 + $0x1c0] sm:$0xff] %vm328_vm0, %v577_v17 }
  0x1e   : > { %1706 = vmatpush1.bf16.msra.mxu0 %v2293_v11  ;;  %v826_v29 = vunpack.c.h.bf16 %v818_v22  ;;  %v821_v30 = vunpack.c.l.bf16 %v817_v21  ;;  %586 = vst.msk [vmem:[#allocation2 + $0x1d8] sm:$0xff] %vm328_vm0, %v580_v19  ;;  %v824_v32 = vunpack.c.l.bf16 %v819_v27  ;;  %v2295_v35 = vcombine.high %v2437_v14, %v2443_v18 }
  0x1f   : > { %v2454_v31 = vpack.i.bf16 %v823_v26, %v822_v25  ;;  %828 = vst [vmem:[#allocation2 + $0x368] sm:$0xff] %v822_v25  ;;  %829 = vst.msk [vmem:[#allocation2 + $0x370] sm:$0xff] %vm328_vm0, %v823_v26  ;;  %v2296_v36 = vcombine.low %v2437_v14, %v2443_v18  ;;  %v2053_v37 = vpack.i.bf16 %v577_v17, %v576_v16 }
  0x20   : > { %v2457_v33 = vpack.i.bf16 %v826_v29, %v825_v28  ;;  %831 = vst [vmem:[#allocation2 + $0x380] sm:$0xff] %v825_v28  ;;  %827 = vst [vmem:[#allocation2 + $0x360] sm:$0xff] %v821_v30  ;;  %v2460_v34 = vpack.i.bf16 %v824_v32, %v821_v30  ;;  %v2058_v38 = vpack.i.bf16 %v580_v19, %v579_v23 }
  0x21   : > { %1939 = vrot.lane.b32.xlu0 %v2426_v13, %s2337_s7  ;;  %1949 = vrot.lane.b32.xlu1 %v2416_v9, %s2338_s24  ;;  %832 = vst.msk [vmem:[#allocation2 + $0x388] sm:$0xff] %vm328_vm0, %v826_v29  ;;  %830 = vst [vmem:[#allocation2 + $0x378] sm:$0xff] %v824_v32  ;;  %v2063_v39 = vpack.i.bf16 %v578_v24, %v575_v20 }
  0x25   : > { %1954 = vrot.lane.b32.xlu0 %v2426_v13, %s2338_s24  ;;  %1959 = vrot.lane.b32.xlu1 %v2418_v10, %s2338_s24 }
  0x29   : > { %1964 = vrot.lane.b32.xlu0 %v2416_v9, %s2339_s27  ;;  %1969 = vrot.lane.b32.xlu1 %v2426_v13, %s2339_s27 }
  0x2d   : > { %1974 = vrot.lane.b32.xlu0 %v2418_v10, %s2339_s27  ;;  %1979 = vrot.lane.b32.xlu1 %v2416_v9, %s2340_s28 }
  0x31   : > { %1984 = vrot.lane.b32.xlu0 %v2426_v13, %s2340_s28  ;;  %1989 = vrot.lane.b32.xlu1 %v2418_v10, %s2340_s28 }
  0x35   : > { %1994 = vrot.lane.b32.xlu0 %v2416_v9, %s2341_s29  ;;  %1999 = vrot.lane.b32.xlu1 %v2426_v13, %s2341_s29 }
  0x39   : > { %2004 = vrot.lane.b32.xlu0 %v2418_v10, %s2341_s29  ;;  %2009 = vrot.lane.b32.xlu1 %v2416_v9, %s2342_s30 }
  0x3d   : > { %2014 = vrot.lane.b32.xlu0 %v2426_v13, %s2342_s30  ;;  %2019 = vrot.lane.b32.xlu1 %v2418_v10, %s2342_s30 }
  0x41   : > { %2024 = vrot.lane.b32.xlu0 %v2416_v9, %s2343_s5  ;;  %2029 = vrot.lane.b32.xlu1 %v2426_v13, %s2343_s5 }
  0x45   : > { %2034 = vrot.lane.b32.xlu0 %v2418_v10, %s2343_s5  ;;  %2039 = vrot.lane.b32.xlu1 %v2416_v9, %s2344_s6 }
  0x49   : > { %2044 = vrot.lane.b32.xlu0 %v2426_v13, %s2344_s6  ;;  %2049 = vrot.lane.b32.xlu1 %v2418_v10, %s2344_s6 }
  0x4d   : > { %2054 = vrot.lane.b32.xlu0 %v2053_v37, %s2337_s7  ;;  %2059 = vrot.lane.b32.xlu1 %v2058_v38, %s2337_s7 }
  0x51   : > { %2064 = vrot.lane.b32.xlu0 %v2063_v39, %s2337_s7  ;;  %2069 = vrot.lane.b32.xlu1 %v2053_v37, %s2338_s24 }
  0x55   : > { %2074 = vrot.lane.b32.xlu0 %v2058_v38, %s2338_s24  ;;  %2079 = vrot.lane.b32.xlu1 %v2063_v39, %s2338_s24 }
  0x59   : > { %2084 = vrot.lane.b32.xlu0 %v2053_v37, %s2339_s27  ;;  %2089 = vrot.lane.b32.xlu1 %v2058_v38, %s2339_s27 }
  0x5d   : > { %2094 = vrot.lane.b32.xlu0 %v2063_v39, %s2339_s27  ;;  %2099 = vrot.lane.b32.xlu1 %v2053_v37, %s2340_s28 }
  0x61   : > { %2104 = vrot.lane.b32.xlu0 %v2058_v38, %s2340_s28  ;;  %2109 = vrot.lane.b32.xlu1 %v2063_v39, %s2340_s28 }
  0x65   : > { %2114 = vrot.lane.b32.xlu0 %v2053_v37, %s2341_s29  ;;  %2119 = vrot.lane.b32.xlu1 %v2058_v38, %s2341_s29 }
  0x69   : > { %2124 = vrot.lane.b32.xlu0 %v2063_v39, %s2341_s29  ;;  %2129 = vrot.lane.b32.xlu1 %v2053_v37, %s2342_s30 }
  0x6d   : > { %2134 = vrot.lane.b32.xlu0 %v2058_v38, %s2342_s30  ;;  %2139 = vrot.lane.b32.xlu1 %v2063_v39, %s2342_s30 }
  0x71   : > { %2144 = vrot.lane.b32.xlu0 %v2053_v37, %s2343_s5  ;;  %2149 = vrot.lane.b32.xlu1 %v2058_v38, %s2343_s5 }
  0x75   : > { %2154 = vrot.lane.b32.xlu0 %v2063_v39, %s2343_s5  ;;  %2159 = vrot.lane.b32.xlu1 %v2053_v37, %s2344_s6 }
  0x79   : > { %2164 = vrot.lane.b32.xlu0 %v2058_v38, %s2344_s6  ;;  %2169 = vrot.lane.b32.xlu1 %v2063_v39, %s2344_s6 }
  0x7d   : > { %2174 = vrot.lane.b32.xlu0 %v2454_v31, %s2337_s7  ;;  %2179 = vrot.lane.b32.xlu1 %v2457_v33, %s2337_s7 }
  0x81   : > { %2184 = vrot.lane.b32.xlu0 %v2460_v34, %s2337_s7  ;;  %2189 = vrot.lane.b32.xlu1 %v2454_v31, %s2338_s24 }
  0x85   : > { %2194 = vrot.lane.b32.xlu0 %v2457_v33, %s2338_s24  ;;  %2199 = vrot.lane.b32.xlu1 %v2460_v34, %s2338_s24  ;;  %s1883_s24 = smul.u32 48, %s2791_s16 }
  0x87   : > { %s313_s25 = sadd.s32 %s1883_s24, %s1882_s22 }
  0x88   : > { %s1663_s26 = sshll.u32 %s313_s25, 3 }
  0x89   : > { %2204 = vrot.lane.b32.xlu0 %v2454_v31, %s2339_s27  ;;  %2209 = vrot.lane.b32.xlu1 %v2457_v33, %s2339_s27 }
  0x8d   : > { %2214 = vrot.lane.b32.xlu0 %v2460_v34, %s2339_s27  ;;  %2219 = vrot.lane.b32.xlu1 %v2454_v31, %s2340_s28 }
  0x8f   : > { %v1935_v41 = vpop.permute.xlu0 %1934  ;;  %v1945_v42 = vpop.permute.xlu1 %1944 }
  0x90   : > { %v1937_v43 = vunpack.i.h.bf16 %v1935_v41  ;;  %v1936_v44 = vunpack.i.l.bf16 %v1935_v41  ;;  %v1946_v45 = vunpack.i.l.bf16 %v1945_v42  ;;  %v1947_v47 = vunpack.i.h.bf16 %v1945_v42 }
  0x91   : > { %2224 = vrot.lane.b32.xlu0 %v2457_v33, %s2340_s28  ;;  %2229 = vrot.lane.b32.xlu1 %v2460_v34, %s2340_s28  ;;  %s315_s28 = scalar_lea.vmem %s2779_s4, %s1663_s26 }
  0x92   : > { %364 = vst.msk [vmem:[#allocation2 + $0x40] sm:$0xff] %vm328_vm0, %v1937_v43  ;;  %v353_v46 = vsel %vm351_vm1, %v1936_v44, %v1937_v43  ;;  %v352_v48 = vsel %vm351_vm1, %v1946_v45, %v1936_v44 }
  0x93   : > { %v1940_v49 = vpop.permute.xlu0 %1939  ;;  %v1950_v50 = vpop.permute.xlu1 %1949 }
  0x94   : > { %v1942_v51 = vunpack.i.h.bf16 %v1940_v49  ;;  %v1941_v52 = vunpack.i.l.bf16 %v1940_v49  ;;  %v1952_v53 = vunpack.i.h.bf16 %v1950_v50  ;;  %v1951_v54 = vunpack.i.l.bf16 %v1950_v50 }
  0x95   : > { %2234 = vrot.lane.b32.xlu0 %v2454_v31, %s2341_s29  ;;  %2239 = vrot.lane.b32.xlu1 %v2457_v33, %s2341_s29 }
  0x96   : > { %367 = vst.msk [vmem:[#allocation2 + $0x58] sm:$0xff] %vm328_vm0, %v1942_v51  ;;  %v354_v55 = vsel %vm351_vm1, %v1947_v47, %v1941_v52  ;;  %v355_v56 = vsel %vm351_vm1, %v1941_v52, %v1942_v51  ;;  %393 = vst.msk [vmem:[#allocation2 + $0x70] sm:$0xff] %vm328_vm0, %v1952_v53  ;;  %v382_v57 = vsel %vm380_vm2, %v1951_v54, %v1952_v53 }
  0x97   : > { %v1955_v58 = vpop.permute.xlu0 %1954  ;;  %v1960_v59 = vpop.permute.xlu1 %1959  ;;  %v1707_v60 = vpack.c.bf16 %v355_v56, %v353_v46  ;;  %v1709_v61 = vpack.c.bf16 %v354_v55, %v352_v48 }
  0x98   : > { %v1957_v62 = vunpack.i.h.bf16 %v1955_v58  ;;  %v1956_v63 = vunpack.i.l.bf16 %v1955_v58  ;;  %v1962_v0 = vunpack.i.h.bf16 %v1960_v59  ;;  %v1961_v1 = vunpack.i.l.bf16 %v1960_v59 }
  0x99   : > { %2244 = vrot.lane.b32.xlu0 %v2460_v34, %s2341_s29  ;;  %2249 = vrot.lane.b32.xlu1 %v2454_v31, %s2342_s30 }
  0x9a   : > { %396 = vst.msk [vmem:[#allocation2 + $0x88] sm:$0xff] %vm328_vm0, %v1957_v62  ;;  %v384_v2 = vsel %vm380_vm2, %v1956_v63, %v1957_v62  ;;  %v383_v3 = vsel %vm380_vm2, %v1962_v0, %v1956_v63  ;;  %v381_v4 = vsel %vm380_vm2, %v1961_v1, %v1951_v54  ;;  %1708 = vmatprep.subr.bf16.mxu0 %v1707_v60 }
  0x9b   : > { %v1965_v5 = vpop.permute.xlu0 %1964  ;;  %v1970_v6 = vpop.permute.xlu1 %1969  ;;  %1710 = vmatpush1.bf16.msra.mxu0 %v1709_v61  ;;  %v1711_v7 = vpack.c.bf16 %v384_v2, %v382_v57  ;;  %v1713_v8 = vpack.c.bf16 %v383_v3, %v381_v4 }
  0x9c   : > { %v1967_v9 = vunpack.i.h.bf16 %v1965_v5  ;;  %v1966_v10 = vunpack.i.l.bf16 %v1965_v5  ;;  %v1972_v11 = vunpack.i.h.bf16 %v1970_v6  ;;  %v1971_v12 = vunpack.i.l.bf16 %v1970_v6 }
  0x9d   : > { %2254 = vrot.lane.b32.xlu0 %v2457_v33, %s2342_s30  ;;  %2259 = vrot.lane.b32.xlu1 %v2460_v34, %s2342_s30 }
  0x9e   : > { %422 = vst.msk [vmem:[#allocation2 + $0xa0] sm:$0xff] %vm328_vm0, %v1967_v9  ;;  %v411_v13 = vsel %vm409_vm3, %v1966_v10, %v1967_v9  ;;  %425 = vst.msk [vmem:[#allocation2 + $0xb8] sm:$0xff] %vm328_vm0, %v1972_v11  ;;  %v413_v15 = vsel %vm409_vm3, %v1971_v12, %v1972_v11  ;;  %1712 = vmatprep.subr.bf16.mxu0 %v1711_v7 }
  0x9f   : > { %v1975_v16 = vpop.permute.xlu0 %1974  ;;  %v1980_v17 = vpop.permute.xlu1 %1979  ;;  %1714 = vmatpush1.bf16.msra.mxu0 %v1713_v8  ;;  %v1715_v19 = vpack.c.bf16 %v413_v15, %v411_v13 }
  0xa0   : > { %v1977_v20 = vunpack.i.h.bf16 %v1975_v16  ;;  %v1976_v21 = vunpack.i.l.bf16 %v1975_v16  ;;  %v1982_v22 = vunpack.i.h.bf16 %v1980_v17  ;;  %v1981_v23 = vunpack.i.l.bf16 %v1980_v17 }
  0xa1   : > { %2264 = vrot.lane.b32.xlu0 %v2454_v31, %s2343_s5  ;;  %2269 = vrot.lane.b32.xlu1 %v2457_v33, %s2343_s5 }
  0xa2   : > { %v410_v24 = vsel %vm409_vm3, %v1976_v21, %v1966_v10  ;;  %v412_v25 = vsel %vm409_vm3, %v1977_v20, %v1971_v12  ;;  %451 = vst.msk [vmem:[#allocation2 + $0xd0] sm:$0xff] %vm328_vm0, %v1982_v22  ;;  %v440_v26 = vsel %vm438_vm4, %v1981_v23, %v1982_v22  ;;  %1716 = vmatprep.subr.bf16.mxu0 %v1715_v19 }
  0xa3   : > { %v1985_v27 = vpop.permute.xlu0 %1984  ;;  %v1990_v28 = vpop.permute.xlu1 %1989  ;;  %v1717_v29 = vpack.c.bf16 %v412_v25, %v410_v24 }
  0xa4   : > { %v1987_v30 = vunpack.i.h.bf16 %v1985_v27  ;;  %v1986_v32 = vunpack.i.l.bf16 %v1985_v27  ;;  %v1992_v37 = vunpack.i.h.bf16 %v1990_v28  ;;  %v1991_v38 = vunpack.i.l.bf16 %v1990_v28 }
  0xa5   : > { %2274 = vrot.lane.b32.xlu0 %v2460_v34, %s2343_s5  ;;  %2279 = vrot.lane.b32.xlu1 %v2454_v31, %s2344_s6 }
  0xa6   : > { %454 = vst.msk [vmem:[#allocation2 + $0xe8] sm:$0xff] %vm328_vm0, %v1987_v30  ;;  %v442_v39 = vsel %vm438_vm4, %v1986_v32, %v1987_v30  ;;  %v441_v40 = vsel %vm438_vm4, %v1992_v37, %v1986_v32  ;;  %v439_v41 = vsel %vm438_vm4, %v1991_v38, %v1981_v23  ;;  %1718 = vmatpush1.bf16.msra.mxu0 %v1717_v29 }
  0xa7   : > { %v1995_v42 = vpop.permute.xlu0 %1994  ;;  %v2000_v43 = vpop.permute.xlu1 %1999  ;;  %v1719_v44 = vpack.c.bf16 %v442_v39, %v440_v26  ;;  %v1721_v45 = vpack.c.bf16 %v441_v40, %v439_v41 }
  0xa8   : > { %v1997_v46 = vunpack.i.h.bf16 %v1995_v42  ;;  %v1996_v47 = vunpack.i.l.bf16 %v1995_v42  ;;  %v2002_v48 = vunpack.i.h.bf16 %v2000_v43  ;;  %v2001_v49 = vunpack.i.l.bf16 %v2000_v43 }
  0xa9   : > { %2284 = vrot.lane.b32.xlu0 %v2457_v33, %s2344_s6  ;;  %2289 = vrot.lane.b32.xlu1 %v2460_v34, %s2344_s6 }
  0xaa   : > { %480 = vst.msk [vmem:[#allocation2 + $0x100] sm:$0xff] %vm328_vm0, %v1997_v46  ;;  %v469_v31 = vsel %vm467_vm5, %v1996_v47, %v1997_v46  ;;  %483 = vst.msk [vmem:[#allocation2 + $0x118] sm:$0xff] %vm328_vm0, %v2002_v48  ;;  %v471_v50 = vsel %vm467_vm5, %v2001_v49, %v2002_v48  ;;  %1720 = vmatprep.subr.bf16.mxu0 %v1719_v44 }
  0xab   : > { %v2005_v51 = vpop.permute.xlu0 %2004  ;;  %v2010_v52 = vpop.permute.xlu1 %2009  ;;  %1722 = vmatpush1.bf16.msra.mxu0 %v1721_v45  ;;  %v1723_v53 = vpack.c.bf16 %v471_v50, %v469_v31  ;;  %v1069_v31 = vld [vmem:[#allocation2 + $0x10] sm:$0xff] }
  0xac   : > { %v2007_v54 = vunpack.i.h.bf16 %v2005_v51  ;;  %v2006_v55 = vunpack.i.l.bf16 %v2005_v51  ;;  %v2012_v33 = vunpack.i.h.bf16 %v2010_v52  ;;  %v2011_v56 = vunpack.i.l.bf16 %v2010_v52  ;;  %v1072_v52 = vld [vmem:[#allocation2 + $0x28] sm:$0xff] }
  0xad   : > { %1724 = vmatprep.subr.bf16.mxu0 %v1723_v53  ;;  %v1123_v53 = vld [vmem:[#allocation2 + $0x1c0] sm:$0xff] }
  0xae   : > { %v468_v34 = vsel %vm467_vm5, %v2006_v55, %v1996_v47  ;;  %v470_v57 = vsel %vm467_vm5, %v2007_v54, %v2001_v49  ;;  %509 = vst.msk [vmem:[#allocation2 + $0x130] sm:$0xff] %vm328_vm0, %v2012_v33  ;;  %v498_v58 = vsel %vm496_vm6, %v2011_v56, %v2012_v33  ;;  %v1126_v54 = vld [vmem:[#allocation2 + $0x1d8] sm:$0xff] }
  0xaf   : > { %v2015_v59 = vpop.permute.xlu0 %2014  ;;  %v2020_v60 = vpop.permute.xlu1 %2019  ;;  %v1725_v61 = vpack.c.bf16 %v470_v57, %v468_v34 }
  0xb0   : > { %v2017_v62 = vunpack.i.h.bf16 %v2015_v59  ;;  %v2016_v63 = vunpack.i.l.bf16 %v2015_v59  ;;  %v2022_v0 = vunpack.i.h.bf16 %v2020_v60  ;;  %v2021_v1 = vunpack.i.l.bf16 %v2020_v60 }
  0xb1   : > { %1726 = vmatpush1.bf16.msra.mxu0 %v1725_v61  ;;  %v1813_v61 = vpack.c.bf16 %v1072_v52, %v1069_v31 }
  0xb2   : > { %512 = vst.msk [vmem:[#allocation2 + $0x148] sm:$0xff] %vm328_vm0, %v2017_v62  ;;  %v500_v2 = vsel %vm496_vm6, %v2016_v63, %v2017_v62  ;;  %v499_v3 = vsel %vm496_vm6, %v2022_v0, %v2016_v63  ;;  %v497_v4 = vsel %vm496_vm6, %v2021_v1, %v2011_v56  ;;  %v1815_v62 = vpack.c.bf16 %v1126_v54, %v1123_v53 }
  0xb3   : > { %v2025_v5 = vpop.permute.xlu0 %2024  ;;  %v2030_v6 = vpop.permute.xlu1 %2029  ;;  %v1727_v7 = vpack.c.bf16 %v500_v2, %v498_v58  ;;  %v1729_v8 = vpack.c.bf16 %v499_v3, %v497_v4 }
  0xb4   : > { %v2027_v9 = vunpack.i.h.bf16 %v2025_v5  ;;  %v2026_v10 = vunpack.i.l.bf16 %v2025_v5  ;;  %v2032_v11 = vunpack.i.h.bf16 %v2030_v6  ;;  %v2031_v12 = vunpack.i.l.bf16 %v2030_v6 }
  0xb5   : > { %1728 = vmatprep.subr.bf16.mxu0 %v1727_v7 }
  0xb6   : > { %538 = vst.msk [vmem:[#allocation2 + $0x160] sm:$0xff] %vm328_vm0, %v2027_v9  ;;  %v527_v13 = vsel %vm525_vm7, %v2026_v10, %v2027_v9  ;;  %541 = vst.msk [vmem:[#allocation2 + $0x178] sm:$0xff] %vm328_vm0, %v2032_v11  ;;  %v529_v15 = vsel %vm525_vm7, %v2031_v12, %v2032_v11  ;;  %1730 = vmatpush1.bf16.msra.mxu0 %v1729_v8 }
  0xb7   : > { %v2035_v16 = vpop.permute.xlu0 %2034  ;;  %v2040_v17 = vpop.permute.xlu1 %2039  ;;  %v1731_v19 = vpack.c.bf16 %v529_v15, %v527_v13 }
  0xb8   : > { %v2037_v20 = vunpack.i.h.bf16 %v2035_v16  ;;  %v2036_v21 = vunpack.i.l.bf16 %v2035_v16  ;;  %v2042_v22 = vunpack.i.h.bf16 %v2040_v17  ;;  %v2041_v23 = vunpack.i.l.bf16 %v2040_v17 }
  0xb9   : > { %1732 = vmatprep.subr.bf16.mxu0 %v1731_v19 }
  0xba   : > { %v526_v24 = vsel %vm525_vm7, %v2036_v21, %v2026_v10  ;;  %v528_v25 = vsel %vm525_vm7, %v2037_v20, %v2031_v12  ;;  %567 = vst.msk [vmem:[#allocation2 + $0x190] sm:$0xff] %vm328_vm0, %v2042_v22  ;;  %v556_v26 = vsel %vm554_vm8, %v2041_v23, %v2042_v22  ;;  %v1078_v10 = vld [vmem:[#allocation2 + $0x58] sm:$0xff] }
  0xbb   : > { %v2045_v27 = vpop.permute.xlu0 %2044  ;;  %v2050_v28 = vpop.permute.xlu1 %2049  ;;  %v1733_v29 = vpack.c.bf16 %v528_v25, %v526_v24 }
  0xbc   : > { %v2047_v30 = vunpack.i.h.bf16 %v2045_v27  ;;  %v2046_v32 = vunpack.i.l.bf16 %v2045_v27  ;;  %v2052_v37 = vunpack.i.h.bf16 %v2050_v28  ;;  %v2051_v38 = vunpack.i.l.bf16 %v2050_v28  ;;  %v1084_v27 = vld [vmem:[#allocation2 + $0x88] sm:$0xff] }
  0xbd   : > { %1734 = vmatpush1.bf16.msra.mxu0 %v1733_v29 }
  0xbe   : > { %570 = vst.msk [vmem:[#allocation2 + $0x1a8] sm:$0xff] %vm328_vm0, %v2047_v30  ;;  %v558_v39 = vsel %vm554_vm8, %v2046_v32, %v2047_v30  ;;  %v557_v40 = vsel %vm554_vm8, %v2052_v37, %v2046_v32  ;;  %v555_v41 = vsel %vm554_vm8, %v2051_v38, %v2041_v23 }
  0xbf   : > { %v2055_v42 = vpop.permute.xlu0 %2054  ;;  %v2060_v43 = vpop.permute.xlu1 %2059  ;;  %v1735_v44 = vpack.c.bf16 %v558_v39, %v556_v26  ;;  %v1737_v45 = vpack.c.bf16 %v557_v40, %v555_v41  ;;  %v1081_v26 = vld [vmem:[#allocation2 + $0x70] sm:$0xff] }
  0xc0   : > { %v2057_v46 = vunpack.i.h.bf16 %v2055_v42  ;;  %v2056_v47 = vunpack.i.l.bf16 %v2055_v42  ;;  %v2062_v48 = vunpack.i.h.bf16 %v2060_v43  ;;  %v2061_v49 = vunpack.i.l.bf16 %v2060_v43 }
  0xc1   : > { %1736 = vmatprep.subr.bf16.mxu0 %v1735_v44  ;;  %v1117_v56 = vld [vmem:[#allocation2 + $0x190] sm:$0xff]  ;;  %v1821_v37 = vpack.c.bf16 %v1084_v27, %v1081_v26  ;;  %v1087_v44 = vld [vmem:[#allocation2 + $0xa0] sm:$0xff] }
  0xc2   : > { %617 = vst.msk [vmem:[#allocation2 + $0x1f0] sm:$0xff] %vm328_vm0, %v2057_v46  ;;  %v606_v50 = vsel %vm351_vm1, %v2056_v47, %v2057_v46  ;;  %620 = vst.msk [vmem:[#allocation2 + $0x208] sm:$0xff] %vm328_vm0, %v2062_v48  ;;  %v608_v51 = vsel %vm351_vm1, %v2061_v49, %v2062_v48  ;;  %1738 = vmatpush1.bf16.msra.mxu0 %v1737_v45  ;;  %v1090_v45 = vld [vmem:[#allocation2 + $0xb8] sm:$0xff] }
  0xc3   : > { %v2065_v55 = vpop.permute.xlu0 %2064  ;;  %v2070_v33 = vpop.permute.xlu1 %2069  ;;  %1740 = vmatprep.subr.bf16.mxu0 %v2295_v35  ;;  %v1743_v63 = vpack.c.bf16 %v608_v51, %v606_v50  ;;  %v1825_v52 = vpack.c.bf16 %v1090_v45, %v1087_v44 }
  0xc4   : > { %v2067_v34 = vunpack.i.h.bf16 %v2065_v55  ;;  %v2066_v57 = vunpack.i.l.bf16 %v2065_v55  ;;  %v2072_v58 = vunpack.i.h.bf16 %v2070_v33  ;;  %v2071_v59 = vunpack.i.l.bf16 %v2070_v33 }
  0xc5   : > { %v1120_v60 = vld [vmem:[#allocation2 + $0x1a8] sm:$0xff] }
  0xc6   : > { %v605_v0 = vsel %vm351_vm1, %v2066_v57, %v2056_v47  ;;  %v607_v1 = vsel %vm351_vm1, %v2067_v34, %v2061_v49  ;;  %645 = vst.msk [vmem:[#allocation2 + $0x220] sm:$0xff] %vm328_vm0, %v2072_v58  ;;  %v634_v2 = vsel %vm380_vm2, %v2071_v59, %v2072_v58  ;;  %v1811_v3 = vpack.c.bf16 %v1120_v60, %v1117_v56  ;;  %v1093_v34 = vld [vmem:[#allocation2 + $0xd0] sm:$0xff]  ;;  %v1096_v57 = vld [vmem:[#allocation2 + $0xe8] sm:$0xff] }
  0xc7   : > { %1742 = vmatpush1.bf16.msra.mxu0 %v2296_v36  ;;  %v2075_v35 = vpop.permute.xlu0 %2074  ;;  %v2080_v4 = vpop.permute.xlu1 %2079  ;;  %v1745_v5 = vpack.c.bf16 %v607_v1, %v605_v0  ;;  %v1075_v36 = vld [vmem:[#allocation2 + $0x40] sm:$0xff] }
  0xc8   : > { %1744 = vmatprep.subr.bf16.mxu0 %v1743_v63  ;;  %v2077_v6 = vunpack.i.h.bf16 %v2075_v35  ;;  %v2076_v7 = vunpack.i.l.bf16 %v2075_v35  ;;  %v2082_v8 = vunpack.i.h.bf16 %v2080_v4  ;;  %v2081_v9 = vunpack.i.l.bf16 %v2080_v4  ;;  %1812 = vmatprep.subr.bf16.mxu1 %v1811_v3 }
  0xc9   : > { %1814 = vmatpush3.bf16.msra.mxu1 %v1813_v61  ;;  %v1129_v11 = vld [vmem:[#allocation2 + $0x1f0] sm:$0xff]  ;;  %v1132_v12 = vld [vmem:[#allocation2 + $0x208] sm:$0xff]  ;;  %v1817_v17 = vpack.c.bf16 %v1078_v10, %v1075_v36 }
  0xca   : > { %648 = vst.msk [vmem:[#allocation2 + $0x238] sm:$0xff] %vm328_vm0, %v2077_v6  ;;  %v636_v13 = vsel %vm380_vm2, %v2076_v7, %v2077_v6  ;;  %v635_v14 = vsel %vm380_vm2, %v2082_v8, %v2076_v7  ;;  %v633_v18 = vsel %vm380_vm2, %v2081_v9, %v2071_v59  ;;  %1816 = vmatprep.subr.bf16.mxu1 %v1815_v62 }
  0xcb   : > { %v2085_v15 = vpop.permute.xlu0 %2084  ;;  %v2090_v16 = vpop.permute.xlu1 %2089  ;;  %v1819_v19 = vpack.c.bf16 %v1132_v12, %v1129_v11  ;;  %1746 = vmatpush1.bf16.msra.mxu0 %v1745_v5  ;;  %v1747_v20 = vpack.c.bf16 %v636_v13, %v634_v2  ;;  %v1749_v21 = vpack.c.bf16 %v635_v14, %v633_v18  ;;  %v1829_v2 = vpack.c.bf16 %v1096_v57, %v1093_v34 }
  0xcc   : > { %v2087_v22 = vunpack.i.h.bf16 %v2085_v15  ;;  %v2086_v23 = vunpack.i.l.bf16 %v2085_v15  ;;  %v2092_v24 = vunpack.i.h.bf16 %v2090_v16  ;;  %v2091_v25 = vunpack.i.l.bf16 %v2090_v16  ;;  %v1099_v16 = vld [vmem:[#allocation2 + $0x100] sm:$0xff] }
  0xcd   : > { %1818 = vmatpush3.bf16.msra.mxu1 %v1817_v17  ;;  %1748 = vmatprep.subr.bf16.mxu0 %v1747_v20  ;;  %v1135_v38 = vld [vmem:[#allocation2 + $0x220] sm:$0xff]  ;;  %v1102_v17 = vld [vmem:[#allocation2 + $0x118] sm:$0xff] }
  0xce   : > { %673 = vst.msk [vmem:[#allocation2 + $0x250] sm:$0xff] %vm328_vm0, %v2087_v22  ;;  %v662_v28 = vsel %vm409_vm3, %v2086_v23, %v2087_v22  ;;  %676 = vst.msk [vmem:[#allocation2 + $0x268] sm:$0xff] %vm328_vm0, %v2092_v24  ;;  %v664_v29 = vsel %vm409_vm3, %v2091_v25, %v2092_v24  ;;  %1820 = vmatprep.subr.bf16.mxu1 %v1819_v19  ;;  %v1833_v26 = vpack.c.bf16 %v1102_v17, %v1099_v16 }
  0xcf   : > { %v2095_v30 = vpop.permute.xlu0 %2094  ;;  %v2100_v32 = vpop.permute.xlu1 %2099  ;;  %1750 = vmatpush1.bf16.msra.mxu0 %v1749_v21  ;;  %v1751_v39 = vpack.c.bf16 %v664_v29, %v662_v28 }
  0xd0   : > { %v2097_v40 = vunpack.i.h.bf16 %v2095_v30  ;;  %v2096_v41 = vunpack.i.l.bf16 %v2095_v30  ;;  %v2102_v42 = vunpack.i.h.bf16 %v2100_v32  ;;  %v2101_v43 = vunpack.i.l.bf16 %v2100_v32 }
  0xd1   : > { %1822 = vmatpush3.bf16.msra.mxu1 %v1821_v37  ;;  %v1138_v46 = vld [vmem:[#allocation2 + $0x238] sm:$0xff]  ;;  %1752 = vmatprep.subr.bf16.mxu0 %v1751_v39  ;;  %v1105_v37 = vld [vmem:[#allocation2 + $0x130] sm:$0xff] }
  0xd2   : > { %v661_v47 = vsel %vm409_vm3, %v2096_v41, %v2086_v23  ;;  %v663_v48 = vsel %vm409_vm3, %v2097_v40, %v2091_v25  ;;  %701 = vst.msk [vmem:[#allocation2 + $0x280] sm:$0xff] %vm328_vm0, %v2102_v42  ;;  %v690_v49 = vsel %vm438_vm4, %v2101_v43, %v2102_v42  ;;  %v1823_v31 = vpack.c.bf16 %v1138_v46, %v1135_v38  ;;  %v1108_v38 = vld [vmem:[#allocation2 + $0x148] sm:$0xff] }
  0xd3   : > { %v2105_v50 = vpop.permute.xlu0 %2104  ;;  %v2110_v51 = vpop.permute.xlu1 %2109  ;;  %v1753_v53 = vpack.c.bf16 %v663_v48, %v661_v47  ;;  %v1837_v47 = vpack.c.bf16 %v1108_v38, %v1105_v37 }
  0xd4   : > { %v2107_v54 = vunpack.i.h.bf16 %v2105_v50  ;;  %v2106_v55 = vunpack.i.l.bf16 %v2105_v50  ;;  %v2112_v33 = vunpack.i.h.bf16 %v2110_v51  ;;  %v2111_v56 = vunpack.i.l.bf16 %v2110_v51  ;;  %1824 = vmatprep.subr.bf16.mxu1 %v1823_v31 }
  0xd5   : > { %1826 = vmatpush3.bf16.msra.mxu1 %v1825_v52  ;;  %v1141_v58 = vld [vmem:[#allocation2 + $0x250] sm:$0xff]  ;;  %v1144_v59 = vld [vmem:[#allocation2 + $0x268] sm:$0xff]  ;;  %1754 = vmatpush1.bf16.msra.mxu0 %v1753_v53 }
  0xd6   : > { %704 = vst.msk [vmem:[#allocation2 + $0x298] sm:$0xff] %vm328_vm0, %v2107_v54  ;;  %v692_v60 = vsel %vm438_vm4, %v2106_v55, %v2107_v54  ;;  %v691_v61 = vsel %vm438_vm4, %v2112_v33, %v2106_v55  ;;  %v689_v62 = vsel %vm438_vm4, %v2111_v56, %v2101_v43  ;;  %v1827_v63 = vpack.c.bf16 %v1144_v59, %v1141_v58  ;;  %v1063_v55 = vld [vmem:[%s2778_s3] sm:$0xff]  ;;  %v2677_v58 = vld [vmem:[%s2778_s3 + $0x18] sm:$0xff] }
  0xd7   : > { %v2115_v0 = vpop.permute.xlu0 %2114  ;;  %v2120_v1 = vpop.permute.xlu1 %2119  ;;  %v1755_v3 = vpack.c.bf16 %v692_v60, %v690_v49  ;;  %v1757_v35 = vpack.c.bf16 %v691_v61, %v689_v62 }
  0xd8   : > { %v2117_v4 = vunpack.i.h.bf16 %v2115_v0  ;;  %v2116_v5 = vunpack.i.l.bf16 %v2115_v0  ;;  %v2122_v6 = vunpack.i.h.bf16 %v2120_v1  ;;  %v2121_v7 = vunpack.i.l.bf16 %v2120_v1  ;;  %1828 = vmatprep.subr.bf16.mxu1 %v1827_v63  ;;  %v1111_v63 = vld [vmem:[#allocation2 + $0x160] sm:$0xff]  ;;  %v1114_v0 = vld [vmem:[#allocation2 + $0x178] sm:$0xff] }
  0xd9   : > { %1830 = vmatpush3.bf16.msra.mxu1 %v1829_v2  ;;  %1756 = vmatprep.subr.bf16.mxu0 %v1755_v3  ;;  %v1147_v12 = vld [vmem:[#allocation2 + $0x280] sm:$0xff] }
  0xda   : > { %729 = vst.msk [vmem:[#allocation2 + $0x2b0] sm:$0xff] %vm328_vm0, %v2117_v4  ;;  %v718_v8 = vsel %vm467_vm5, %v2116_v5, %v2117_v4  ;;  %732 = vst.msk [vmem:[#allocation2 + $0x2c8] sm:$0xff] %vm328_vm0, %v2122_v6  ;;  %v720_v9 = vsel %vm467_vm5, %v2121_v7, %v2122_v6  ;;  %1758 = vmatpush1.bf16.msra.mxu0 %v1757_v35 }
  0xdb   : > { %v2125_v10 = vpop.permute.xlu0 %2124  ;;  %v2130_v11 = vpop.permute.xlu1 %2129  ;;  %v1759_v13 = vpack.c.bf16 %v720_v9, %v718_v8 }
  0xdc   : > { %v2127_v14 = vunpack.i.h.bf16 %v2125_v10  ;;  %v2126_v18 = vunpack.i.l.bf16 %v2125_v10  ;;  %v2132_v36 = vunpack.i.h.bf16 %v2130_v11  ;;  %v2131_v15 = vunpack.i.l.bf16 %v2130_v11 }
  0xdd   : > { %v1150_v19 = vld [vmem:[#allocation2 + $0x298] sm:$0xff]  ;;  %1760 = vmatprep.subr.bf16.mxu0 %v1759_v13  ;;  %v1176_v13 = vld [vmem:[#allocation2 + $0x368] sm:$0xff] }
  0xde   : > { %v717_v20 = vsel %vm467_vm5, %v2126_v18, %v2116_v5  ;;  %v719_v21 = vsel %vm467_vm5, %v2127_v14, %v2121_v7  ;;  %757 = vst.msk [vmem:[#allocation2 + $0x2e0] sm:$0xff] %vm328_vm0, %v2132_v36  ;;  %v746_v22 = vsel %vm496_vm6, %v2131_v15, %v2132_v36  ;;  %v1831_v23 = vpack.c.bf16 %v1150_v19, %v1147_v12  ;;  %v1179_v14 = vld [vmem:[#allocation2 + $0x380] sm:$0xff] }
  0xdf   : > { %v2135_v24 = vpop.permute.xlu0 %2134  ;;  %v2140_v25 = vpop.permute.xlu1 %2139  ;;  %v1761_v27 = vpack.c.bf16 %v719_v21, %v717_v20  ;;  %v1841_v7 = vpack.c.bf16 %v1114_v0, %v1111_v63  ;;  %v2345_v19 = vmov 0.0|0.0  }
  0xe0   : > { %v2137_v28 = vunpack.i.h.bf16 %v2135_v24  ;;  %v2136_v29 = vunpack.i.l.bf16 %v2135_v24  ;;  %v2142_v30 = vunpack.i.h.bf16 %v2140_v25  ;;  %v2141_v32 = vunpack.i.l.bf16 %v2140_v25  ;;  %1832 = vmatprep.subr.bf16.mxu1 %v1831_v23 }
  0xe1   : > { %1834 = vmatpush3.bf16.msra.mxu1 %v1833_v26  ;;  %v1153_v39 = vld [vmem:[#allocation2 + $0x2b0] sm:$0xff]  ;;  %v1156_v40 = vld [vmem:[#allocation2 + $0x2c8] sm:$0xff]  ;;  %1762 = vmatpush1.bf16.msra.mxu0 %v1761_v27  ;;  %v1775_v25 = vpack.c.bf16 %v1179_v14, %v1176_v13  ;;  %v1175_v26 = vld [vmem:[#allocation2 + $0x360] sm:$0xff] }
  0xe2   : > { %760 = vst.msk [vmem:[#allocation2 + $0x2f8] sm:$0xff] %vm328_vm0, %v2137_v28  ;;  %v748_v41 = vsel %vm496_vm6, %v2136_v29, %v2137_v28  ;;  %v747_v42 = vsel %vm496_vm6, %v2142_v30, %v2136_v29  ;;  %v745_v43 = vsel %vm496_vm6, %v2141_v32, %v2131_v15  ;;  %v1835_v44 = vpack.c.bf16 %v1156_v40, %v1153_v39  ;;  %v1178_v27 = vld [vmem:[#allocation2 + $0x378] sm:$0xff] }
  0xe3   : > { %v2145_v45 = vpop.permute.xlu0 %2144  ;;  %v2150_v46 = vpop.permute.xlu1 %2149  ;;  %v1763_v48 = vpack.c.bf16 %v748_v41, %v746_v22  ;;  %v1765_v49 = vpack.c.bf16 %v747_v42, %v745_v43  ;;  %v1777_v39 = vpack.c.bf16 %v1178_v27, %v1175_v26 }
  0xe4   : > { %v2147_v31 = vunpack.i.h.bf16 %v2145_v45  ;;  %v2146_v50 = vunpack.i.l.bf16 %v2145_v45  ;;  %v2152_v51 = vunpack.i.h.bf16 %v2150_v46  ;;  %v2151_v52 = vunpack.i.l.bf16 %v2150_v46  ;;  %1836 = vmatprep.subr.bf16.mxu1 %v1835_v44 }
  0xe5   : > { %1838 = vmatpush3.bf16.msra.mxu1 %v1837_v47  ;;  %1764 = vmatprep.subr.bf16.mxu0 %v1763_v48  ;;  %v1159_v34 = vld [vmem:[#allocation2 + $0x2e0] sm:$0xff]  ;;  %v1177_v47 = vld [vmem:[#allocation2 + $0x370] sm:$0xff]  ;;  %v1180_v48 = vld [vmem:[#allocation2 + $0x388] sm:$0xff] }
  0xe6   : > { %785 = vst.msk [vmem:[#allocation2 + $0x310] sm:$0xff] %vm328_vm0, %v2147_v31  ;;  %v774_v53 = vsel %vm525_vm7, %v2146_v50, %v2147_v31  ;;  %788 = vst.msk [vmem:[#allocation2 + $0x328] sm:$0xff] %vm328_vm0, %v2152_v51  ;;  %v776_v54 = vsel %vm525_vm7, %v2151_v52, %v2152_v51  ;;  %1766 = vmatpush1.bf16.msra.mxu0 %v1765_v49 }
  0xe7   : > { %v2155_v33 = vpop.permute.xlu0 %2154  ;;  %v2160_v56 = vpop.permute.xlu1 %2159  ;;  %v1767_v57 = vpack.c.bf16 %v776_v54, %v774_v53 }
  0xe8   : > { %v2157_v59 = vunpack.i.h.bf16 %v2155_v33  ;;  %v2156_v60 = vunpack.i.l.bf16 %v2155_v33  ;;  %v2162_v61 = vunpack.i.h.bf16 %v2160_v56  ;;  %v2161_v62 = vunpack.i.l.bf16 %v2160_v56 }
  0xe9   : > { %v1162_v1 = vld [vmem:[#allocation2 + $0x2f8] sm:$0xff]  ;;  %1768 = vmatprep.subr.bf16.mxu0 %v1767_v57  ;;  %1298 = vmatmul.mubr.f32.vlgmr.msra.gmra.mrb[0].mxu0 %v1063_v55  ;;  %v1850_v33 = vpack.c.bf16 %v1180_v48, %v1177_v47 }
  0xea   : > { %v773_v2 = vsel %vm525_vm7, %v2156_v60, %v2146_v50  ;;  %v775_v3 = vsel %vm525_vm7, %v2157_v59, %v2151_v52  ;;  %813 = vst.msk [vmem:[#allocation2 + $0x340] sm:$0xff] %vm328_vm0, %v2162_v61  ;;  %v802_v35 = vsel %vm554_vm8, %v2161_v62, %v2162_v61  ;;  %v1839_v4 = vpack.c.bf16 %v1162_v1, %v1159_v34 }
  0xeb   : > { %1664 = vmatprep.mubr.msk.f32.mxu0 %vm1229_vm9, %v2677_v58  ;;  %v2165_v5 = vpop.permute.xlu0 %2164  ;;  %v2170_v6 = vpop.permute.xlu1 %2169  ;;  %v1769_v8 = vpack.c.bf16 %v775_v3, %v773_v2 }
  0xec   : > { %v2167_v9 = vunpack.i.h.bf16 %v2165_v5  ;;  %v2166_v10 = vunpack.i.l.bf16 %v2165_v5  ;;  %v2172_v11 = vunpack.i.h.bf16 %v2170_v6  ;;  %v2171_v12 = vunpack.i.l.bf16 %v2170_v6  ;;  %1840 = vmatprep.subr.bf16.mxu1 %v1839_v4 }
  0xed   : > { %1842 = vmatpush3.bf16.msra.mxu1 %v1841_v7  ;;  %v1165_v18 = vld [vmem:[#allocation2 + $0x310] sm:$0xff]  ;;  %v1168_v36 = vld [vmem:[#allocation2 + $0x328] sm:$0xff]  ;;  %1770 = vmatpush1.bf16.msra.mxu0 %v1769_v8 }
  0xee   : > { %816 = vst.msk [vmem:[#allocation2 + $0x358] sm:$0xff] %vm328_vm0, %v2167_v9  ;;  %v804_v15 = vsel %vm554_vm8, %v2166_v10, %v2167_v9  ;;  %v803_v16 = vsel %vm554_vm8, %v2172_v11, %v2166_v10  ;;  %v801_v17 = vsel %vm554_vm8, %v2171_v12, %v2161_v62  ;;  %1843 = vmatprep.subr.bf16.mxu1 %v2345_v19 }
  0xef   : > { %v1844_v20 = vpack.c.bf16 %v1168_v36, %v1165_v18  ;;  %v2175_v21 = vpop.permute.xlu0 %2174  ;;  %v2180_v22 = vpop.permute.xlu1 %2179  ;;  %v1771_v23 = vpack.c.bf16 %v804_v15, %v802_v35  ;;  %v1773_v24 = vpack.c.bf16 %v803_v16, %v801_v17 }
  0xf0   : > { %v2177_v28 = vunpack.i.h.bf16 %v2175_v21  ;;  %v2176_v29 = vunpack.i.l.bf16 %v2175_v21  ;;  %v2182_v30 = vunpack.i.h.bf16 %v2180_v22  ;;  %v2181_v32 = vunpack.i.l.bf16 %v2180_v22  ;;  %1440 = vmatmul.mubr.f32.vlgmr.msra.gmra.mrb[0].mxu1 %v1063_v55 }
  0xf1   : > { %1845 = vmatpush1.bf16.msra.mxu1 %v1844_v20  ;;  %1772 = vmatprep.subr.bf16.mxu0 %v1771_v23  ;;  %v1171_v42 = vld [vmem:[#allocation2 + $0x340] sm:$0xff] }
  0xf2   : > { %863 = vst.msk [vmem:[#allocation2 + $0x3a0] sm:$0xff] %vm328_vm0, %v2177_v28  ;;  %v852_v37 = vsel %vm351_vm1, %v2176_v29, %v2177_v28  ;;  %866 = vst.msk [vmem:[#allocation2 + $0x3b8] sm:$0xff] %vm328_vm0, %v2182_v30  ;;  %v854_v38 = vsel %vm351_vm1, %v2181_v32, %v2182_v30  ;;  %1846 = vmatprep.subr.bf16.mxu1 %v2345_v19  ;;  %1774 = vmatpush1.bf16.msra.mxu0 %v1773_v24 }
  0xf3   : > { %v2185_v40 = vpop.permute.xlu0 %2184  ;;  %v2190_v41 = vpop.permute.xlu1 %2189  ;;  %1776 = vmatprep.subr.bf16.mxu0 %v1775_v25  ;;  %1665 = vmatprep.mubr.msk.f32.mxu1 %vm1229_vm9, %v2677_v58  ;;  %v1779_v31 = vpack.c.bf16 %v854_v38, %v852_v37 }
  0xf4   : > { %v2187_v43 = vunpack.i.h.bf16 %v2185_v40  ;;  %v2186_v44 = vunpack.i.l.bf16 %v2185_v40  ;;  %v2192_v45 = vunpack.i.h.bf16 %v2190_v41  ;;  %v2191_v46 = vunpack.i.l.bf16 %v2190_v41 }
  0xf5   : > { %v1174_v49 = vld [vmem:[#allocation2 + $0x358] sm:$0xff] }
  0xf6   : > { %v851_v50 = vsel %vm351_vm1, %v2186_v44, %v2176_v29  ;;  %v853_v51 = vsel %vm351_vm1, %v2187_v43, %v2181_v32  ;;  %891 = vst.msk [vmem:[#allocation2 + $0x3d0] sm:$0xff] %vm328_vm0, %v2192_v45  ;;  %v880_v52 = vsel %vm380_vm2, %v2191_v46, %v2192_v45  ;;  %v1847_v53 = vpack.c.bf16 %v1174_v49, %v1171_v42 }
  0xf7   : > { %1778 = vmatpush1.bf16.msra.mxu0 %v1777_v39  ;;  %v2195_v54 = vpop.permute.xlu0 %2194  ;;  %v2200_v55 = vpop.permute.xlu1 %2199  ;;  %v1781_v56 = vpack.c.bf16 %v853_v51, %v851_v50 }
  0xf8   : > { %1780 = vmatprep.subr.bf16.mxu0 %v1779_v31  ;;  %v2197_v34 = vunpack.i.h.bf16 %v2195_v54  ;;  %v2196_v57 = vunpack.i.l.bf16 %v2195_v54  ;;  %v2202_v58 = vunpack.i.h.bf16 %v2200_v55  ;;  %v2201_v59 = vunpack.i.l.bf16 %v2200_v55  ;;  %1848 = vmatpush1.bf16.msra.mxu1 %v1847_v53 }
  0xf9   : > { %1849 = vmatprep.subr.bf16.mxu1 %v2345_v19  ;;  %v1183_v1 = vld [vmem:[#allocation2 + $0x3a0] sm:$0xff]  ;;  %v1186_v2 = vld [vmem:[#allocation2 + $0x3b8] sm:$0xff] }
  0xfa   : > { %894 = vst.msk [vmem:[#allocation2 + $0x3e8] sm:$0xff] %vm328_vm0, %v2197_v34  ;;  %v882_v60 = vsel %vm380_vm2, %v2196_v57, %v2197_v34  ;;  %v881_v61 = vsel %vm380_vm2, %v2202_v58, %v2196_v57  ;;  %v879_v62 = vsel %vm380_vm2, %v2201_v59, %v2191_v46  ;;  %v1853_v10 = vpack.c.bf16 %v1186_v2, %v1183_v1 }
  0xfb   : > { %1782 = vmatpush1.bf16.msra.mxu0 %v1781_v56  ;;  %v2205_v63 = vpop.permute.xlu0 %2204  ;;  %v2210_v0 = vpop.permute.xlu1 %2209  ;;  %v1783_v3 = vpack.c.bf16 %v882_v60, %v880_v52  ;;  %v1785_v35 = vpack.c.bf16 %v881_v61, %v879_v62 }
  0xfc   : > { %v2207_v4 = vunpack.i.h.bf16 %v2205_v63  ;;  %v2206_v5 = vunpack.i.l.bf16 %v2205_v63  ;;  %v2212_v6 = vunpack.i.h.bf16 %v2210_v0  ;;  %v2211_v7 = vunpack.i.l.bf16 %v2210_v0  ;;  %1851 = vmatpush1.bf16.msra.mxu1 %v1850_v33 }
  0xfd   : > { %1852 = vmatprep.subr.bf16.mxu1 %v2345_v19  ;;  %1784 = vmatprep.subr.bf16.mxu0 %v1783_v3  ;;  %v1189_v13 = vld [vmem:[#allocation2 + $0x3d0] sm:$0xff] }
  0xfe   : > { %919 = vst.msk [vmem:[#allocation2 + $0x400] sm:$0xff] %vm328_vm0, %v2207_v4  ;;  %v908_v8 = vsel %vm409_vm3, %v2206_v5, %v2207_v4  ;;  %922 = vst.msk [vmem:[#allocation2 + $0x418] sm:$0xff] %vm328_vm0, %v2212_v6  ;;  %v910_v9 = vsel %vm409_vm3, %v2211_v7, %v2212_v6 }
  0xff   : > { %1786 = vmatpush1.bf16.msra.mxu0 %v1785_v35  ;;  %v2215_v11 = vpop.permute.xlu0 %2214  ;;  %v2220_v12 = vpop.permute.xlu1 %2219  ;;  %v1787_v14 = vpack.c.bf16 %v910_v9, %v908_v8 }
 0x100   : > { %v2217_v18 = vunpack.i.h.bf16 %v2215_v11  ;;  %v2216_v36 = vunpack.i.l.bf16 %v2215_v11  ;;  %v2222_v15 = vunpack.i.h.bf16 %v2220_v12  ;;  %v2221_v16 = vunpack.i.l.bf16 %v2220_v12  ;;  %1854 = vmatpush1.bf16.msra.mxu1 %v1853_v10 }
 0x101   : > { %1855 = vmatprep.subr.bf16.mxu1 %v2345_v19  ;;  %v1192_v17 = vld [vmem:[#allocation2 + $0x3e8] sm:$0xff]  ;;  %1788 = vmatprep.subr.bf16.mxu0 %v1787_v14 }
 0x102   : > { %v907_v20 = vsel %vm409_vm3, %v2216_v36, %v2206_v5  ;;  %v909_v21 = vsel %vm409_vm3, %v2217_v18, %v2211_v7  ;;  %947 = vst.msk [vmem:[#allocation2 + $0x430] sm:$0xff] %vm328_vm0, %v2222_v15  ;;  %v936_v22 = vsel %vm438_vm4, %v2221_v16, %v2222_v15  ;;  %v1856_v23 = vpack.c.bf16 %v1192_v17, %v1189_v13 }
 0x103   : > { %v2225_v24 = vpop.permute.xlu0 %2224  ;;  %v2230_v25 = vpop.permute.xlu1 %2229  ;;  %v1789_v26 = vpack.c.bf16 %v909_v21, %v907_v20 }
 0x104   : > { %v2227_v27 = vunpack.i.h.bf16 %v2225_v24  ;;  %v2226_v28 = vunpack.i.l.bf16 %v2225_v24  ;;  %v2232_v29 = vunpack.i.h.bf16 %v2230_v25  ;;  %v2231_v30 = vunpack.i.l.bf16 %v2230_v25  ;;  %1857 = vmatpush1.bf16.msra.mxu1 %v1856_v23 }
 0x105   : > { %1858 = vmatprep.subr.bf16.mxu1 %v2345_v19  ;;  %v1195_v32 = vld [vmem:[#allocation2 + $0x400] sm:$0xff]  ;;  %v1198_v37 = vld [vmem:[#allocation2 + $0x418] sm:$0xff]  ;;  %1790 = vmatpush1.bf16.msra.mxu0 %v1789_v26 }
 0x106   : > { %950 = vst.msk [vmem:[#allocation2 + $0x448] sm:$0xff] %vm328_vm0, %v2227_v27  ;;  %v938_v38 = vsel %vm438_vm4, %v2226_v28, %v2227_v27  ;;  %v937_v39 = vsel %vm438_vm4, %v2232_v29, %v2226_v28  ;;  %v935_v40 = vsel %vm438_vm4, %v2231_v30, %v2221_v16  ;;  %v1859_v41 = vpack.c.bf16 %v1198_v37, %v1195_v32 }
 0x107   : > { %v2235_v42 = vpop.permute.xlu0 %2234  ;;  %v2240_v43 = vpop.permute.xlu1 %2239  ;;  %v1791_v44 = vpack.c.bf16 %v938_v38, %v936_v22  ;;  %v1793_v45 = vpack.c.bf16 %v937_v39, %v935_v40 }
 0x108   : > { %v2237_v46 = vunpack.i.h.bf16 %v2235_v42  ;;  %v2236_v47 = vunpack.i.l.bf16 %v2235_v42  ;;  %v2242_v48 = vunpack.i.h.bf16 %v2240_v43  ;;  %v2241_v49 = vunpack.i.l.bf16 %v2240_v43  ;;  %1860 = vmatpush1.bf16.msra.mxu1 %v1859_v41 }
 0x109   : > { %1861 = vmatprep.subr.bf16.mxu1 %v2345_v19  ;;  %1792 = vmatprep.subr.bf16.mxu0 %v1791_v44  ;;  %v1201_v53 = vld [vmem:[#allocation2 + $0x430] sm:$0xff] }
 0x10a   : > { %975 = vst.msk [vmem:[#allocation2 + $0x460] sm:$0xff] %vm328_vm0, %v2237_v46  ;;  %v964_v31 = vsel %vm467_vm5, %v2236_v47, %v2237_v46  ;;  %978 = vst.msk [vmem:[#allocation2 + $0x478] sm:$0xff] %vm328_vm0, %v2242_v48  ;;  %v966_v50 = vsel %vm467_vm5, %v2241_v49, %v2242_v48  ;;  %1794 = vmatpush1.bf16.msra.mxu0 %v1793_v45 }
 0x10b   : > { %v2245_v51 = vpop.permute.xlu0 %2244  ;;  %v2250_v52 = vpop.permute.xlu1 %2249  ;;  %v1795_v54 = vpack.c.bf16 %v966_v50, %v964_v31 }
 0x10c   : > { %v2247_v55 = vunpack.i.h.bf16 %v2245_v51  ;;  %v2246_v33 = vunpack.i.l.bf16 %v2245_v51  ;;  %v2252_v56 = vunpack.i.h.bf16 %v2250_v52  ;;  %v2251_v34 = vunpack.i.l.bf16 %v2250_v52  ;;  %v1065_v52 = vld [vmem:[%s2778_s3 + $0x10] sm:$0xff] }
 0x10d   : > { %v1204_v57 = vld [vmem:[#allocation2 + $0x448] sm:$0xff]  ;;  %1796 = vmatprep.subr.bf16.mxu0 %v1795_v54 }
 0x10e   : > { %v963_v58 = vsel %vm467_vm5, %v2246_v33, %v2236_v47  ;;  %v965_v59 = vsel %vm467_vm5, %v2247_v55, %v2241_v49  ;;  %1003 = vst.msk [vmem:[#allocation2 + $0x490] sm:$0xff] %vm328_vm0, %v2252_v56  ;;  %v992_v60 = vsel %vm496_vm6, %v2251_v34, %v2252_v56  ;;  %v1862_v61 = vpack.c.bf16 %v1204_v57, %v1201_v53 }
 0x10f   : > { %v2255_v62 = vpop.permute.xlu0 %2254  ;;  %v2260_v63 = vpop.permute.xlu1 %2259  ;;  %v1797_v0 = vpack.c.bf16 %v965_v59, %v963_v58 }
 0x110   : > { %v2257_v1 = vunpack.i.h.bf16 %v2255_v62  ;;  %v2256_v2 = vunpack.i.l.bf16 %v2255_v62  ;;  %v2262_v3 = vunpack.i.h.bf16 %v2260_v63  ;;  %v2261_v35 = vunpack.i.l.bf16 %v2260_v63  ;;  %1863 = vmatpush1.bf16.msra.mxu1 %v1862_v61 }
 0x111   : > { %1864 = vmatprep.subr.bf16.mxu1 %v2345_v19  ;;  %v1207_v4 = vld [vmem:[#allocation2 + $0x460] sm:$0xff]  ;;  %v1210_v5 = vld [vmem:[#allocation2 + $0x478] sm:$0xff]  ;;  %1798 = vmatpush1.bf16.msra.mxu0 %v1797_v0 }
 0x112   : > { %1006 = vst.msk [vmem:[#allocation2 + $0x4a8] sm:$0xff] %vm328_vm0, %v2257_v1  ;;  %v994_v6 = vsel %vm496_vm6, %v2256_v2, %v2257_v1  ;;  %v993_v7 = vsel %vm496_vm6, %v2262_v3, %v2256_v2  ;;  %v991_v8 = vsel %vm496_vm6, %v2261_v35, %v2251_v34  ;;  %v1865_v9 = vpack.c.bf16 %v1210_v5, %v1207_v4 }
 0x113   : > { %v2265_v10 = vpop.permute.xlu0 %2264  ;;  %v2270_v11 = vpop.permute.xlu1 %2269  ;;  %v1799_v12 = vpack.c.bf16 %v994_v6, %v992_v60  ;;  %v1801_v13 = vpack.c.bf16 %v993_v7, %v991_v8 }
 0x114   : > { %v2267_v14 = vunpack.i.h.bf16 %v2265_v10  ;;  %v2266_v18 = vunpack.i.l.bf16 %v2265_v10  ;;  %v2272_v36 = vunpack.i.h.bf16 %v2270_v11  ;;  %v2271_v15 = vunpack.i.l.bf16 %v2270_v11  ;;  %1866 = vmatpush1.bf16.msra.mxu1 %v1865_v9 }
 0x115   : > { %1867 = vmatprep.subr.bf16.mxu1 %v2345_v19  ;;  %1800 = vmatprep.subr.bf16.mxu0 %v1799_v12  ;;  %v1213_v22 = vld [vmem:[#allocation2 + $0x490] sm:$0xff] }
 0x116   : > { %1031 = vst.msk [vmem:[#allocation2 + $0x4c0] sm:$0xff] %vm328_vm0, %v2267_v14  ;;  %v1020_v16 = vsel %vm525_vm7, %v2266_v18, %v2267_v14  ;;  %1034 = vst.msk [vmem:[#allocation2 + $0x4d8] sm:$0xff] %vm328_vm0, %v2272_v36  ;;  %v1022_v17 = vsel %vm525_vm7, %v2271_v15, %v2272_v36  ;;  %1802 = vmatpush1.bf16.msra.mxu0 %v1801_v13 }
 0x117   : > { %v2275_v20 = vpop.permute.xlu0 %2274  ;;  %v2280_v21 = vpop.permute.xlu1 %2279  ;;  %v1803_v23 = vpack.c.bf16 %v1022_v17, %v1020_v16 }
 0x118   : > { %v2277_v24 = vunpack.i.h.bf16 %v2275_v20  ;;  %v2276_v25 = vunpack.i.l.bf16 %v2275_v20  ;;  %v2282_v26 = vunpack.i.h.bf16 %v2280_v21  ;;  %v2281_v27 = vunpack.i.l.bf16 %v2280_v21 }
 0x119   : > { %v1216_v28 = vld [vmem:[#allocation2 + $0x4a8] sm:$0xff]  ;;  %1804 = vmatprep.subr.bf16.mxu0 %v1803_v23 }
 0x11a   : > { %v1019_v29 = vsel %vm525_vm7, %v2276_v25, %v2266_v18  ;;  %v1021_v30 = vsel %vm525_vm7, %v2277_v24, %v2271_v15  ;;  %1059 = vst.msk [vmem:[#allocation2 + $0x4f0] sm:$0xff] %vm328_vm0, %v2282_v26  ;;  %v1048_v32 = vsel %vm554_vm8, %v2281_v27, %v2282_v26  ;;  %v1868_v37 = vpack.c.bf16 %v1216_v28, %v1213_v22 }
 0x11b   : > { %v2285_v38 = vpop.permute.xlu0 %2284  ;;  %v2290_v39 = vpop.permute.xlu1 %2289  ;;  %v1805_v40 = vpack.c.bf16 %v1021_v30, %v1019_v29 }
 0x11c   : > { %v2287_v41 = vunpack.i.h.bf16 %v2285_v38  ;;  %v2286_v42 = vunpack.i.l.bf16 %v2285_v38  ;;  %v2292_v43 = vunpack.i.h.bf16 %v2290_v39  ;;  %v2291_v44 = vunpack.i.l.bf16 %v2290_v39  ;;  %1869 = vmatpush1.bf16.msra.mxu1 %v1868_v37 }
 0x11d   : > { %1870 = vmatprep.subr.bf16.mxu1 %v2345_v19  ;;  %v1219_v45 = vld [vmem:[#allocation2 + $0x4c0] sm:$0xff]  ;;  %v1222_v46 = vld [vmem:[#allocation2 + $0x4d8] sm:$0xff]  ;;  %1806 = vmatpush1.bf16.msra.mxu0 %v1805_v40 }
 0x11e   : > { %1062 = vst.msk [vmem:[#allocation2 + $0x508] sm:$0xff] %vm328_vm0, %v2287_v41  ;;  %v1050_v47 = vsel %vm554_vm8, %v2286_v42, %v2287_v41  ;;  %v1049_v48 = vsel %vm554_vm8, %v2292_v43, %v2286_v42  ;;  %v1047_v49 = vsel %vm554_vm8, %v2291_v44, %v2281_v27  ;;  %v1871_v31 = vpack.c.bf16 %v1222_v46, %v1219_v45 }
 0x11f   : > { %v1807_v50 = vpack.c.bf16 %v1050_v47, %v1048_v32  ;;  %v1809_v51 = vpack.c.bf16 %v1049_v48, %v1047_v49 }
 0x120   : > { %1872 = vmatpush1.bf16.msra.mxu1 %v1871_v31 }
 0x121   : > { %1873 = vmatprep.subr.bf16.mxu1 %v2345_v19  ;;  %1808 = vmatprep.subr.bf16.mxu0 %v1807_v50  ;;  %v1225_v53 = vld [vmem:[#allocation2 + $0x4f0] sm:$0xff] }
 0x122   : > { %1810 = vmatpush1.bf16.msra.mxu0 %v1809_v51 }
 0x125   : > { %v1228_v54 = vld [vmem:[#allocation2 + $0x508] sm:$0xff]  ;;  %1369 = vmatmul.mubr.f32.vlgmr.msra.gmra.mrb[0].mxu0 %v1065_v52 }
 0x126   : > { %v1874_v55 = vpack.c.bf16 %v1228_v54, %v1225_v53 }
 0x128   : > { %1875 = vmatpush1.bf16.msra.mxu1 %v1874_v55 }
 0x12b   : > { %1510 = vmatmul.mubr.f32.vlgmr.msra.gmra.mrb[2].mxu1 %v1065_v52 }
 0x1c3   : > { %v1700_v33 = vpop.f32.mrb[0].mxu1 }
 0x1c4   : > { %v1701_v56 = vpop.f32.mrb[1].mxu1 }
 0x1c5   : > { %v1702_v34 = vadd.f32 %v1701_v56, %v1700_v33 }
 0x1f8   : > { %v1370_v19 = vpop.f32.mrb[0].mxu0 }
 0x1f9   : > { %1515 = vst [vmem:[%s315_s28] sm:$0xff] %v1370_v19  ;;  %v1372_v57 = vpop.f32.mrb[1].mxu0 }
 0x1fa   : > { %1516 = vst [vmem:[%s315_s28 + $0x8] sm:$0xff] %v1372_v57 }
 0x1fe   : > { %v1511_v58 = vpop.f32.mrb[2].mxu1 }
 0x1ff   : > { %v1512_v59 = vadd.f32 %v1702_v34, %v1511_v58  ;;  %v1513_v60 = vpop.f32.mrb[3].mxu1 }
 0x201   : > { %1517 = vst.msk [vmem:[%s315_s28 + $0x10] sm:$0xff] %vm328_vm0, %v1512_v59 }
 0x202 PF: > { %s14_s19 = sadd.s32 1, %s2335_s19   ;;  %s2780_s15 = smov %s2327_s17 }
 0x203   : > { %p11_p10 = scmp.ge.s32.totalorder %s14_s19, 34   ;;  %s2781_s16 = smov %s2331_s18 }
 0x204   : > { %s2782_s17 = smov %s2785_s20  ;;  %s2783_s18 = smov %s2789_s21 }
 0x205   :  { %13 = sbr.rel (!%p11_p10) target bundleno = 3 (0x3), region = 72 }

</bundles_post_ra>
